<compile_context>
chip_gen: v5e
topology: v5e:2x2
jax: 0.10.0
libtpu: 0.0.40
codegen_flags: <defaults>
</compile_context>

<pallas_src>
import functools

import jax
import jax.numpy as jnp
from jax import lax
from jax.experimental import pallas as pl
from jax.experimental.pallas import tpu as pltpu


def _pick_tile_n(cin, C, x_itemsize, t_itemsize, has_proj, vmem_budget_bytes):
    """Largest voxel (lane) tile keeping double-buffered input blocks, the
    resident accumulator row and the f32 softmax/KL temporaries under the
    given VMEM budget.  Returned value is a multiple of 128, capped at 32768."""
    cin_p = -(-cin // 8) * 8
    c_p = -(-C // 8) * 8
    per_lane = 2 * c_p * t_itemsize                              # teacher block (x2 buf)
    per_lane += 2 * (cin_p if has_proj else c_p) * x_itemsize    # student block (x2 buf)
    per_lane += 2 * 8 * 4                                        # accumulator row (padded)
    per_lane += 10 * c_p * 4                                     # f32 softmax/KL temps
    if has_proj:
        per_lane += cin_p * 4                                    # f32 upcast of student
    tile = (vmem_budget_bytes // per_lane) // 128 * 128
    return int(max(128, min(tile, 32768)))


def _dsd_kernel(*refs, has_proj, tau_not_one, inv_tau, tile_n, n_valid,
                tiles_per_chunk):
    """One (batch, voxel-chunk, voxel-tile) grid step.

    refs (has_proj=True):  x(1,cin,tile_n), t(1,C,tile_n), w(C,cin), b(C,1), acc(1,1,tile_n)
    refs (has_proj=False): x(1,C,tile_n),   t(1,C,tile_n),                   acc(1,1,tile_n)
    acc is the per-(batch, chunk) resident channel-reduced KL partial-sum row.
    """
    if has_proj:
        x_ref, t_ref, w_ref, b_ref, acc_ref = refs
    else:
        x_ref, t_ref, acc_ref = refs

    pi = pl.program_id(1)
    j = pl.program_id(2)

    @pl.when(j == 0)
    def _():
        acc_ref[...] = jnp.zeros_like(acc_ref)

    x = x_ref[0].astype(jnp.float32)                 # (cin, tile_n)
    t = t_ref[0].astype(jnp.float32)                 # (C,   tile_n)
    if tau_not_one:
        t = t * inv_tau

    if has_proj:
        # projector: 1x1x1 Conv3d == channel matmul (+ bias); inv_tau is
        # already folded into w/b in the wrapper.
        s = jnp.dot(w_ref[...], x, preferred_element_type=jnp.float32) + b_ref[...]
    else:
        # Identity projector (num_classes == in_chans): no matmul, no bias.
        s = x * inv_tau if tau_not_one else x        # (C, tile_n)

    # student log-softmax over the channel (sublane) axis
    s_max = jnp.max(s, axis=0, keepdims=True)
    s_sh = s - s_max
    log_zs = jnp.log(jnp.sum(jnp.exp(s_sh), axis=0, keepdims=True))
    log_p_s = s_sh - log_zs

    # teacher softmax / log-softmax over channels
    t_max = jnp.max(t, axis=0, keepdims=True)
    t_sh = t - t_max
    et = jnp.exp(t_sh)
    z_t = jnp.sum(et, axis=0, keepdims=True)
    p_t = et * pl.reciprocal(z_t)                    # exact (approx=False)
    log_p_t = t_sh - jnp.log(z_t)

    # per-voxel KL, reduced over channels -> (1, tile_n) row (cheap XLU reduce)
    kl_row = jnp.sum(p_t * (log_p_t - log_p_s), axis=0, keepdims=True)

    if n_valid is None:
        acc_ref[0] += kl_row
    else:
        tile_idx = pi * tiles_per_chunk + j
        tail_tile = (tile_idx + 1) * tile_n > n_valid

        # Only tiles overlapping the ragged tail (or fully-clamped duplicate
        # tiles) pay for iota/compare/select; mask stays on kl_row so garbage
        # lanes of the partial block never reach the accumulator.
        @pl.when(tail_tile)
        def _():
            col = tile_idx * tile_n + lax.broadcasted_iota(jnp.int32, (1, tile_n), 1)
            acc_ref[0] += jnp.where(col < n_valid, kl_row, 0.0)

        @pl.when(jnp.logical_not(tail_tile))
        def _():
            acc_ref[0] += kl_row


def dsd_loss8_bkd(feat_student, logits_teacher, w=None, b=None, *, tau=1.0,
                  loss_weight=1.0, overall_loss_weight=1.0, tile_n=None,
                  num_voxel_chunks=2, vmem_budget_bytes=12 * 1024 * 1024):
    """feat_student: (B, in_chans, D, H, W); logits_teacher: (B, C, D, H, W).

    w: (C, in_chans, 1, 1, 1), b: (C,)  -- Conv3d(in_chans -> num_classes, k=1),
    or w = b = None for the Identity projector (num_classes == in_chans).
    """
    B, cin, D, H, W = feat_student.shape
    Bt, C, Dt, Ht, Wt = logits_teacher.shape
    assert (B, D, H, W) == (Bt, Dt, Ht, Wt)
    has_proj = w is not None
    if not has_proj:
        assert C == cin, "Identity projector requires num_classes == in_chans"
    Ns = D * H * W

    # native channel-major layout: (B, chans, voxels); reshape only (no transpose),
    # native dtype (bf16 inputs are DMA'd as bf16 and upcast in-register).
    x = feat_student.reshape(B, cin, Ns)
    t = logits_teacher.reshape(B, C, Ns)

    inv_tau = 1.0 / float(tau)
    tau_not_one = float(tau) != 1.0

    # --- voxel (lane) tile: as large as the VMEM budget allows, multiple of 128 ---
    lane_ns = pl.cdiv(Ns, 128) * 128
    if tile_n is None:
        tile_n = _pick_tile_n(cin, C, x.dtype.itemsize, t.dtype.itemsize,
                              has_proj, vmem_budget_bytes)
    tile_n = max(128, (min(int(tile_n), lane_ns) // 128) * 128)
    n_tiles = pl.cdiv(Ns, tile_n)

    # --- voxel-chunk "parallel" axis: keeps both v7x TensorCores busy even for B=1 ---
    P = max(1, min(int(num_voxel_chunks), n_tiles))
    tpc = pl.cdiv(n_tiles, P)
    clamp = P * tpc > n_tiles                      # last chunk may own a dummy tile
    needs_mask = clamp or (Ns % tile_n != 0)       # no wrapper-side jnp.pad: rely on
    n_valid = Ns if needs_mask else None           # partial blocks + in-kernel mask

    def vox_block(pi, j):
        blk = pi * tpc + j
        if clamp:
            blk = jnp.minimum(blk, n_tiles - 1)    # dummy tiles re-read the last block;
        return blk                                 # their contribution is fully masked

    in_specs = [
        pl.BlockSpec((1, cin, tile_n), lambda bi, pi, j: (bi, 0, vox_block(pi, j))),
        pl.BlockSpec((1, C, tile_n), lambda bi, pi, j: (bi, 0, vox_block(pi, j))),
    ]
    args = [x, t]
    if has_proj:
        # fold inv_tau into the tiny weight/bias (C*cin and C elements only)
        w_mat = w.reshape(C, cin).astype(jnp.float32) * inv_tau
        b_col = (b.astype(jnp.float32) * inv_tau).reshape(C, 1)
        in_specs += [pl.BlockSpec((C, cin), lambda bi, pi, j: (0, 0)),
                     pl.BlockSpec((C, 1), lambda bi, pi, j: (0, 0))]
        args += [w_mat, b_col]

    kernel = functools.partial(
        _dsd_kernel, has_proj=has_proj, tau_not_one=tau_not_one,
        inv_tau=inv_tau, tile_n=tile_n, n_valid=n_valid, tiles_per_chunk=tpc)

    partial_sums = pl.pallas_call(
        kernel,
        out_shape=jax.ShapeDtypeStruct((B * P, 1, tile_n), jnp.float32),
        grid_spec=pltpu.PrefetchScalarGridSpec(
            num_scalar_prefetch=0,
            grid=(B, P, tpc),                       # reduction axis last
            in_specs=in_specs,
            # per-(batch, chunk) resident channel-reduced partial-sum row
            out_specs=pl.BlockSpec((1, 1, tile_n),
                                   lambda bi, pi, j: (bi * P + pi, 0, 0)),
        ),
        compiler_params=pltpu.CompilerParams(
            dimension_semantics=("parallel", "parallel", "arbitrary"),
            vmem_limit_bytes=32 * 1024 * 1024),
    )(*args)

    # final tiny reduction + 'mean' scaling outside the kernel
    scale = (float(loss_weight) * float(overall_loss_weight) * float(tau) ** 2
             / float(B * Ns * C))
    return jnp.sum(partial_sums) * scale


def _reference(feat_student, logits_teacher, w, b, tau, loss_weight,
               overall_loss_weight):
    C = logits_teacher.shape[1]
    x = feat_student.astype(jnp.float32)
    if w is not None:
        cin = feat_student.shape[1]
        w_mat = w.reshape(C, cin).astype(jnp.float32)
        s = jnp.einsum("oc,bcdhw->bodhw", w_mat, x)
        s = s + b.astype(jnp.float32).reshape(1, C, 1, 1, 1)
    else:
        s = x
    t = logits_teacher.astype(jnp.float32)
    p_t = jax.nn.softmax(t / tau, axis=1)
    log_p_s = jax.nn.log_softmax(s / tau, axis=1)
    log_p_t = jax.nn.log_softmax(t / tau, axis=1)
    kl = p_t * (log_p_t - log_p_s)
    return loss_weight * overall_loss_weight * tau ** 2 * jnp.mean(kl)


if __name__ == "__main__":
    key = jax.random.PRNGKey(0)

    # --- Case 1: Conv3d(1x1x1) projector (num_classes != in_chans), tau = 1 ---
    B, in_chans, num_classes, D, H, W = 2, 16, 4, 16, 16, 16
    k_feat, k_teach, k_w, k_b, key = jax.random.split(key, 5)
    feat_student = jax.random.normal(k_feat, (B, in_chans, D, H, W), jnp.float32)
    logits_teacher = jax.random.normal(k_teach, (B, num_classes, D, H, W),
                                       jnp.float32)
    std = (2.0 / num_classes) ** 0.5       # kaiming_normal (fan_out / relu)
    w = std * jax.random.normal(k_w, (num_classes, in_chans, 1, 1, 1), jnp.float32)
    b = 0.01 * jax.random.normal(k_b, (num_classes,), jnp.float32)

    loss = dsd_loss8_bkd(feat_student, logits_teacher, w, b, tau=1.0)
    loss = jax.block_until_ready(loss)
    ref = _reference(feat_student, logits_teacher, w, b, 1.0, 1.0, 1.0)
    assert jnp.allclose(loss, ref, rtol=1e-4, atol=1e-6), (loss, ref)

    # --- Case 2: Identity projector, tau != 1, ragged spatial size (mask path) ---
    B2, C2, D2, H2, W2 = 1, 8, 7, 9, 11
    k_f2, k_t2, key = jax.random.split(key, 3)
    feat2 = jax.random.normal(k_f2, (B2, C2, D2, H2, W2), jnp.float32)
    teach2 = jax.random.normal(k_t2, (B2, C2, D2, H2, W2), jnp.float32)
    loss2 = dsd_loss8_bkd(feat2, teach2, None, None, tau=2.0,
                          loss_weight=0.7, overall_loss_weight=0.5)
    loss2 = jax.block_until_ready(loss2)
    ref2 = _reference(feat2, teach2, None, None, 2.0, 0.7, 0.5)
    assert jnp.allclose(loss2, ref2, rtol=1e-4, atol=1e-6), (loss2, ref2)

    # --- Case 3: multi-tile + 2-chunk voxel-parallel axis + clamped dummy tile ---
    B3, cin3, C3, D3, H3, W3 = 1, 16, 4, 8, 8, 20     # Ns=1280, tile=512 -> 3 tiles
    k_f3, k_t3, k_w3, k_b3, key = jax.random.split(key, 5)
    feat3 = jax.random.normal(k_f3, (B3, cin3, D3, H3, W3), jnp.float32)
    teach3 = jax.random.normal(k_t3, (B3, C3, D3, H3, W3), jnp.float32)
    w3 = (2.0 / C3) ** 0.5 * jax.random.normal(k_w3, (C3, cin3, 1, 1, 1),
                                               jnp.float32)
    b3 = 0.01 * jax.random.normal(k_b3, (C3,), jnp.float32)
    loss3 = dsd_loss8_bkd(feat3, teach3, w3, b3, tau=1.0, tile_n=512)
    loss3 = jax.block_until_ready(loss3)
    ref3 = _reference(feat3, teach3, w3, b3, 1.0, 1.0, 1.0)
    assert jnp.allclose(loss3, ref3, rtol=1e-4, atol=1e-6), (loss3, ref3)

    print("KERNEL_OK")
</pallas_src>

<mosaic_0001>
module attributes {stable_mosaic.version = 11 : i64} {
  func.func @_dsd_kernel(%arg0: i32, %arg1: i32, %arg2: i32, %arg3: memref<1x16x4096xf32, #tpu.memory_space<vmem>>, %arg4: memref<1x4x4096xf32, #tpu.memory_space<vmem>>, %arg5: memref<4x16xf32, #tpu.memory_space<vmem>>, %arg6: memref<4x1xf32, #tpu.memory_space<vmem>>, %arg7: memref<1x1x4096xf32, #tpu.memory_space<vmem>>) attributes {dimension_semantics = [#tpu.dimension_semantics<parallel>, #tpu.dimension_semantics<parallel>, #tpu.dimension_semantics<arbitrary>], iteration_bounds = array<i64: 2, 1, 1>, scalar_prefetch = 0 : i64, scratch_operands = 0 : i64, tpu.core_type = #tpu.core_type<tc>, window_params = [{transform_indices = @transform_0, window_bounds = array<i64: 1, 16, 4096>}, {transform_indices = @transform_1, window_bounds = array<i64: 1, 4, 4096>}, {pipeline_mode = #tpu.pipeline_mode<synchronous>, transform_indices = @transform_2, window_bounds = array<i64: 4, 16>}, {pipeline_mode = #tpu.pipeline_mode<synchronous>, transform_indices = @transform_3, window_bounds = array<i64: 4, 1>}, {transform_indices = @transform_4, window_bounds = array<i64: 1, 1, 4096>}]} {
    %c0_i32 = arith.constant 0 : i32
    %0 = arith.cmpi eq, %arg2, %c0_i32 : i32
    %1 = arith.extui %0 : i1 to i32
    %c0_i32_0 = arith.constant 0 : i32
    %2 = arith.cmpi ne, %1, %c0_i32_0 : i32
    scf.if %2 {
      %cst_21 = arith.constant 0.000000e+00 : f32
      %45 = vector.broadcast %cst_21 : f32 to vector<1x1x4096xf32>
      %c0_22 = arith.constant 0 : index
      %c0_23 = arith.constant 0 : index
      %c0_24 = arith.constant 0 : index
      %46 = vector.load %arg7[%c0_22, %c0_23, %c0_24] : memref<1x1x4096xf32, #tpu.memory_space<vmem>>, vector<1x1x4096xf32>
      tpu.vector_store %arg7[%c0_22, %c0_23, %c0_24], %45 {strides = array<i32>} : memref<1x1x4096xf32, #tpu.memory_space<vmem>>, vector<1x1x4096xf32>,
    } else {
    }
    %c0 = arith.constant 0 : index
    %c0_1 = arith.constant 0 : index
    %c0_2 = arith.constant 0 : index
    %3 = vector.load %arg3[%c0, %c0_1, %c0_2] : memref<1x16x4096xf32, #tpu.memory_space<vmem>>, vector<1x16x4096xf32>
    %4 = vector.shape_cast %3 : vector<1x16x4096xf32> to vector<16x4096xf32>
    %c0_3 = arith.constant 0 : index
    %c0_4 = arith.constant 0 : index
    %c0_5 = arith.constant 0 : index
    %5 = vector.load %arg4[%c0_3, %c0_4, %c0_5] : memref<1x4x4096xf32, #tpu.memory_space<vmem>>, vector<1x4x4096xf32>
    %6 = vector.shape_cast %5 : vector<1x4x4096xf32> to vector<4x4096xf32>
    %c0_6 = arith.constant 0 : index
    %c0_7 = arith.constant 0 : index
    %7 = vector.load %arg5[%c0_6, %c0_7] : memref<4x16xf32, #tpu.memory_space<vmem>>, vector<4x16xf32>
    %cst = arith.constant dense<0.000000e+00> : vector<4x4096xf32>
    %8 = tpu.matmul %7, %4, %cst {dimension_numbers = #tpu.dot_dimension_numbers<[1], [0], [0], [1], [0, 0, 1, 1], [], []>} : vector<4x16xf32>, vector<16x4096xf32>, vector<4x4096xf32> -> vector<4x4096xf32>
    %c0_8 = arith.constant 0 : index
    %c0_9 = arith.constant 0 : index
    %9 = vector.load %arg6[%c0_8, %c0_9] : memref<4x1xf32, #tpu.memory_space<vmem>>, vector<4x1xf32>
    %10 = vector.broadcast %9 : vector<4x1xf32> to vector<4x4096xf32>
    %11 = arith.addf %8, %10 : vector<4x4096xf32>
    %cst_10 = arith.constant dense<0xFF800000> : vector<4096xf32>
    %12 = vector.multi_reduction <maximumf>, %11, %cst_10 [0] : vector<4x4096xf32> to vector<4096xf32>
    %13 = vector.shape_cast %12 : vector<4096xf32> to vector<1x4096xf32>
    %14 = vector.broadcast %13 : vector<1x4096xf32> to vector<4x4096xf32>
    %15 = arith.subf %11, %14 : vector<4x4096xf32>
    %16 = math.exp %15 : vector<4x4096xf32>
    %cst_11 = arith.constant dense<0.000000e+00> : vector<4096xf32>
    %17 = vector.multi_reduction <add>, %16, %cst_11 [0] : vector<4x4096xf32> to vector<4096xf32>
    %18 = vector.shape_cast %17 : vector<4096xf32> to vector<1x4096xf32>
    %19 = math.log %18 : vector<1x4096xf32>
    %20 = vector.broadcast %19 : vector<1x4096xf32> to vector<4x4096xf32>
    %21 = arith.subf %15, %20 : vector<4x4096xf32>
    %cst_12 = arith.constant dense<0xFF800000> : vector<4096xf32>
    %22 = vector.multi_reduction <maximumf>, %6, %cst_12 [0] : vector<4x4096xf32> to vector<4096xf32>
    %23 = vector.shape_cast %22 : vector<4096xf32> to vector<1x4096xf32>
    %24 = vector.broadcast %23 : vector<1x4096xf32> to vector<4x4096xf32>
    %25 = arith.subf %6, %24 : vector<4x4096xf32>
    %26 = math.exp %25 : vector<4x4096xf32>
    %cst_13 = arith.constant dense<0.000000e+00> : vector<4096xf32>
    %27 = vector.multi_reduction <add>, %26, %cst_13 [0] : vector<4x4096xf32> to vector<4096xf32>
    %28 = vector.shape_cast %27 : vector<4096xf32> to vector<1x4096xf32>
    %29 = tpu.reciprocal %28 : vector<1x4096xf32> -> vector<1x4096xf32>
    %30 = vector.broadcast %29 : vector<1x4096xf32> to vector<4x4096xf32>
    %31 = arith.mulf %26, %30 : vector<4x4096xf32>
    %32 = math.log %28 : vector<1x4096xf32>
    %33 = vector.broadcast %32 : vector<1x4096xf32> to vector<4x4096xf32>
    %34 = arith.subf %25, %33 : vector<4x4096xf32>
    %35 = arith.subf %34, %21 : vector<4x4096xf32>
    %36 = arith.mulf %31, %35 : vector<4x4096xf32>
    %cst_14 = arith.constant dense<0.000000e+00> : vector<4096xf32>
    %37 = vector.multi_reduction <add>, %36, %cst_14 [0] : vector<4x4096xf32> to vector<4096xf32>
    %38 = vector.shape_cast %37 : vector<4096xf32> to vector<1x4096xf32>
    %c0_15 = arith.constant 0 : index
    %c0_16 = arith.constant 0 : index
    %c0_17 = arith.constant 0 : index
    %39 = vector.load %arg7[%c0_15, %c0_16, %c0_17] : memref<1x1x4096xf32, #tpu.memory_space<vmem>>, vector<1x1x4096xf32>
    %40 = vector.shape_cast %39 : vector<1x1x4096xf32> to vector<1x4096xf32>
    %41 = arith.addf %40, %38 : vector<1x4096xf32>
    %c0_18 = arith.constant 0 : index
    %c0_19 = arith.constant 0 : index
    %c0_20 = arith.constant 0 : index
    %42 = vector.load %arg7[%c0_18, %c0_19, %c0_20] : memref<1x1x4096xf32, #tpu.memory_space<vmem>>, vector<1x1x4096xf32>
    %43 = vector.shape_cast %42 : vector<1x1x4096xf32> to vector<1x4096xf32>
    %44 = vector.shape_cast %41 : vector<1x4096xf32> to vector<1x1x4096xf32>
    tpu.vector_store %arg7[%c0_18, %c0_19, %c0_20], %44 {strides = array<i32>} : memref<1x1x4096xf32, #tpu.memory_space<vmem>>, vector<1x1x4096xf32>,
    return
  }
  func.func @transform_0(%arg0: i32, %arg1: i32, %arg2: i32) -> (i32, i32, i32) {
    %c1_i32 = arith.constant 1 : i32
    %0 = arith.muli %arg1, %c1_i32 : i32
    %1 = arith.addi %0, %arg2 : i32
    %c0_i32 = arith.constant 0 : i32
    %c0_i32_0 = arith.constant 0 : i32
    return %arg0, %c0_i32, %1 : i32, i32, i32
  }
  func.func @transform_1(%arg0: i32, %arg1: i32, %arg2: i32) -> (i32, i32, i32) {
    %c1_i32 = arith.constant 1 : i32
    %0 = arith.muli %arg1, %c1_i32 : i32
    %1 = arith.addi %0, %arg2 : i32
    %c0_i32 = arith.constant 0 : i32
    %c0_i32_0 = arith.constant 0 : i32
    return %arg0, %c0_i32, %1 : i32, i32, i32
  }
  func.func @transform_2(%arg0: i32, %arg1: i32, %arg2: i32) -> (i32, i32) {
    %c0_i32 = arith.constant 0 : i32
    %c0_i32_0 = arith.constant 0 : i32
    %c0_i32_1 = arith.constant 0 : i32
    return %c0_i32, %c0_i32_0 : i32, i32
  }
  func.func @transform_3(%arg0: i32, %arg1: i32, %arg2: i32) -> (i32, i32) {
    %c0_i32 = arith.constant 0 : i32
    %c0_i32_0 = arith.constant 0 : i32
    %c0_i32_1 = arith.constant 0 : i32
    return %c0_i32, %c0_i32_0 : i32, i32
  }
  func.func @transform_4(%arg0: i32, %arg1: i32, %arg2: i32) -> (i32, i32, i32) {
    %c1_i32 = arith.constant 1 : i32
    %0 = arith.muli %arg0, %c1_i32 : i32
    %1 = arith.addi %0, %arg1 : i32
    %c0_i32 = arith.constant 0 : i32
    %c0_i32_0 = arith.constant 0 : i32
    %c0_i32_1 = arith.constant 0 : i32
    return %1, %c0_i32, %c0_i32_0 : i32, i32, i32
  }
}

</mosaic_0001>

<bundles_post_ra>
// kernel: tpu_custom_call.1
= control target key start
LH: loop header
LB: loop body
LE: loop exit
PB: predicated region body
PF: predicated region fallthrough
CT: control target
= control target key end

     0   :  { %s6734_s0 = inlined_call_operand.hbm [shape: f32[2,16,4096], index: 0, kind: input, shape index: {}]   ;;  %s6735_s1 = inlined_call_operand.hbm [shape: f32[2,4,4096], index: 1, kind: input, shape index: {}]   ;;  %s6736_s2 = inlined_call_operand.vmem [shape: f32[4,16], index: 2, kind: input, shape index: {}]   ;;  %s6737_s3 = inlined_call_operand.vmem [shape: f32[4,1], index: 3, kind: input, shape index: {}]   ;;  %s6738_s4 = inlined_call_operand.hbm [shape: f32[2,1,4096], index: 4, kind: output, shape index: {}]  }
   0x1   :  { %6756 = sst [smem:[#allocation44_spill]] %s6734_s0 }
   0x2   :  { %9 = vsyncpa [#allocation3], 0 }
   0x3   :  { %11 = vsyncpa [#allocation3 + $0x1], 0 }
   0x4   :  { %12 = vsyncpa [#allocation6], 0 }
   0x5   :  { %14 = vsyncpa [#allocation6 + $0x1], 0 }
   0x6   :  { %15 = vsyncpa [#allocation4], 0 }
   0x7   :  { %17 = vsyncpa [#allocation4 + $0x1], 0  ;;  %s4419_s15 = smov 0   ;;  %s4421_s16 = smov 0  }
   0x8   :  { %s4423_s17 = smov 0   ;;  %s4425_s18 = smov 0  }
   0x9   :  { %s4427_s19 = smov 0   ;;  %s4429_s20 = smov 0  }
   0xa LB: > { %s3831_s21 = sadd.s32 4294967295, %s4389_s20   ;;  %s3832_s22 = sadd.s32 4294967294, %s4389_s20   ;;  %s4389_s20 = sphi %s4429_s20, %s23_s20   ;;  %s4385_s19 = sphi %s4427_s19, %s6968_s19   ;;  %s4381_s18 = sphi %s4425_s18, %s6967_s18   ;;  %s4377_s17 = sphi %s4423_s17, %s6966_s17   ;;  %s4373_s16 = sphi %s4421_s16, %s6965_s16   ;;  %s4369_s15 = sphi %s4419_s15, %s6964_s15  }
   0xb   : > { %s42_s23 = sadd.s32 1, %s4385_s19  ;;  %s53_s24 = sadd.s32 1, %s4377_s17 }
   0xc   : > { %p44_p0 = scmp.ge.s32.totalorder %s42_s23, 2  ;;  %p60_p1 = scmp.ne.s32.totalorder %s4377_s17, %s4373_s16 }
   0xd   : > { %p61_p2 = scmp.eq.s32.totalorder %s4389_s20, 0  ;;  %p66_p3 = scmp.ne.s32.totalorder %s4373_s16, %s4369_s15 }
   0xe   : > { %s6970_s23 = smov (%p44_p0, %s42_s23), 0  ;;  %p67_p5 = scmp.eq.s32.totalorder %s3831_s21, 0 }
   0xf   : > { %p4460_p4 = por %p61_p2, %p60_p1  ;;  %s48_s26 = ssub.s32 %s4385_s19, %s6970_s23 }
  0x10   : > { %p164_p6 = scmp.eq.s32.totalorder %s3831_s21, 1  ;;  %p51_p7 = scmp.eq.s32.totalorder %s48_s26, 0 }
  0x11   : > { %p4466_p8 = por %p67_p5, %p66_p3  ;;  %p170_p10 = scmp.eq.s32.totalorder %s3832_s22, 1 }
  0x12   : > { %p4470_p9 = por %p164_p6, %p60_p1  ;;  %p3834_p12 = scmp.ge.s32.totalorder %s4389_s20, 2 }
  0x13   : > { %s4475_s29 = scalar_select %p51_p7, %s4377_s17, %s53_s24  }
  0x14   : > { %p4477_p11 = por %p170_p10, %p66_p3  ;;  %p3900_p13 = scmp.lt.s32.totalorder %s4389_s20, 2 }
  0x15   : > { %s196_s5 = sand.u32 1, %s4377_s17   ;;  %s3881_s7 = sshll.u32 %s4385_s19, 9 }
  0x16   : > { %s3835_s6 = sshll.u32 %s196_s5, 9  ;;  %s6761_s0 = sld [smem:[#allocation44_spill]] }
  0x17   : > { %s200_s11 = scalar_lea.vmem [#allocation2], %s3835_s6  ;;  %p4490_p0 = pnand %p3900_p13, %p4460_p4 }
  0x18   : > { %s211_s12 = sshll.u32 %s200_s11, 4  ;;  %p3841_p1 = scmp.ge.s32.totalorder %s4389_s20, 1  ;;  %s212_s12 = int_to_ptr.vmem [resolvable:$true] %s211_s12 }
  0x19   : > { %s197_s21 = scalar_lea.sflag [#allocation3], %s196_s5  ;;  %s4391_s22 = smov 4096  }
  0x1a   : > { %s4392_s24 = smov 256   ;;  %p242_p2 = scmp.lt.s32.totalorder %s4389_s20, 3 }
  0x1b   : > { %s3838_s26 = sshll.u32 %s196_s5, 7  ;;  %s3882_s6 = sshll.u32 %s4385_s19, 7 }
  0x1c   : > { %s208_s10 = scalar_lea.hbm %s6761_s0, %s3881_s7  ;;  %p243_p3 = pnand %p3841_p1, %p242_p2 }
  0x1d   : > { %s209_s13 = sshll.u32 %s208_s10, 4  ;;  %s233_s25 = scalar_lea.hbm %s6735_s1, %s3882_s6  ;;  %s210_s13 = int_to_ptr.hbm [resolvable:$true] %s209_s13 }
  0x1e   : > { %3892 = dma.hbm_to_vmem [thread:$0]  (!%p4490_p0), %s210_s13, 8192, %s212_s12, %s197_s21, %s4391_s22, %s4391_s22, %s4392_s24  }
  0x1f   : > { %s225_s9 = scalar_lea.vmem [#allocation5], %s3838_s26  ;;  %s235_s11 = sshll.u32 %s233_s25, 4  ;;  %s236_s11 = int_to_ptr.hbm [resolvable:$true] %s235_s11 }
  0x20   : > { %s237_s10 = sshll.u32 %s225_s9, 4  ;;  %s222_s0 = scalar_lea.sflag [#allocation6], %s196_s5  ;;  %s238_s10 = int_to_ptr.vmem [resolvable:$true] %s237_s10 }
  0x21   : > { %3895 = dma.hbm_to_vmem [thread:$0]  (!%p4490_p0), %s236_s11, 2048, %s238_s10, %s222_s0  }
  0x22   : > { %246 = sbr.rel (%p243_p3) target bundleno = 702 (0x2be), region = 36 }
  0x27   : > { %s4505_s12 = sand.u32 1, %s4373_s16  }
  0x28   : > { %s3842_s13 = sshll.u32 %s4505_s12, 9  ;;  %s249_s21 = scalar_lea.sflag [#allocation3], %s4505_s12 }
  0x29   : > { %s4509_s22 = scalar_lea.vmem [#allocation2], %s3842_s13 }
  0x2a   : > { %4356 = dma.done.wait (%p4466_p8), %s249_s21, 8192  }
  0x2b   : > { %4358 = vsyncadd (%p4466_p8), %s249_s21, 4294959104  ;;  %s3843_s0 = sshll.u32 %s4505_s12, 7  ;;  %s259_s5 = scalar_lea.sflag [#allocation6], %s4505_s12 }
  0x2c   : > { %s4517_s14 = scalar_lea.vmem [#allocation5], %s3843_s0 }
  0x2d   : > { %4360 = dma.done.wait (%p4466_p8), %s259_s5, 2048  }
  0x2e   : > { %4362 = vsyncadd (%p4466_p8), %s259_s5, 4294965248  ;;  %v4393_v0 = vmov 0   ;;  %v338_v1 = vld [vmem:[%s4509_s22 + $0x100] sm:$0xff]  ;;  %v339_v2 = vld [vmem:[%s4509_s22 + $0x108] sm:$0xff]  ;;  %vm393_vm0 = vcmask 130048   ;;  %vm1037_vm1 = vcmask 1043456  }
  0x2f   : > { %3954 = vset.pattern.permute.xlu0 %v4393_v0  ;;  %v340_v3 = vld [vmem:[%s4509_s22 + $0x110] sm:$0xff]  ;;  %411 = vmatpush.msra.mxu0 %v338_v1  ;;  %v341_v4 = vld [vmem:[%s4509_s22 + $0x118] sm:$0xff]  ;;  %v306_v5 = vld [vmem:[%s4509_s22] sm:$0xff]  ;;  %s3878_s7 = sshll.u32 %s4381_s18, 5  ;;  %s3844_s8 = sshll.u32 %s4505_s12, 5 }
  0x30   : > { %431 = vmatpush.msra.mxu1 %v339_v2  ;;  %v307_v6 = vld [vmem:[%s4509_s22 + $0x8] sm:$0xff]  ;;  %451 = vmatpush.msra.mxu2 %v340_v3  ;;  %v308_v7 = vld [vmem:[%s4509_s22 + $0x10] sm:$0xff]  ;;  %v309_v8 = vld [vmem:[%s4509_s22 + $0x18] sm:$0xff]  ;;  %s3713_s9 = scalar_lea.hbm %s6738_s4, %s3878_s7  ;;  %s292_s10 = scalar_lea.vmem [#allocation7], %s3844_s8 }
  0x31   : > { %471 = vmatpush.msra.mxu3 %v341_v4  ;;  %v4534_v9 = vld [vmem:[%s6736_s2] sm:$0xf]  ;;  %412 = vmatpush.msra.mxu0 %v306_v5  ;;  %v344_v11 = vld [vmem:[%s4509_s22 + $0x130] sm:$0xff]  ;;  %v342_v12 = vld [vmem:[%s4509_s22 + $0x120] sm:$0xff]  ;;  %s3715_s11 = sshll.u32 %s292_s10, 4  ;;  %s3717_s13 = sshll.u32 %s3713_s9, 4  ;;  %s3716_s11 = int_to_ptr.vmem [resolvable:$true] %s3715_s11  ;;  %s3718_s13 = int_to_ptr.hbm [resolvable:$true] %s3717_s13 }
  0x32   : > { %432 = vmatpush.msra.mxu1 %v307_v6  ;;  %452 = vmatpush.msra.mxu2 %v308_v7  ;;  %v345_v10 = vld [vmem:[%s4509_s22 + $0x138] sm:$0xff]  ;;  %v343_v13 = vld [vmem:[%s4509_s22 + $0x128] sm:$0xff]  ;;  %v312_v15 = vld [vmem:[%s4509_s22 + $0x30] sm:$0xff]  ;;  %s3702_s21 = scalar_lea.sflag [#allocation4], %s4505_s12  ;;  %s4323_s27 = scalar_lea.hbm %s6738_s4, 64 }
  0x33   : > { %472 = vmatpush.msra.mxu3 %v309_v8  ;;  %3845 = vmatmul.msk.f32.vlgmr.msra.gmra.mxu0 %vm393_vm0, %v4534_v9  ;;  %v313_v14 = vld [vmem:[%s4509_s22 + $0x38] sm:$0xff]  ;;  %v310_v16 = vld [vmem:[%s4509_s22 + $0x20] sm:$0xff]  ;;  %v311_v17 = vld [vmem:[%s4509_s22 + $0x28] sm:$0xff] }
  0x34   : > { %3846 = vmatmul.msk.f32.vlgmr.msra.gmra.mxu1 %vm393_vm0, %v4534_v9  ;;  %3847 = vmatmul.msk.f32.vlgmr.msra.gmra.mxu2 %vm393_vm0, %v4534_v9  ;;  %v349_v18 = vld [vmem:[%s4509_s22 + $0x158] sm:$0xff]  ;;  %v348_v19 = vld [vmem:[%s4509_s22 + $0x150] sm:$0xff]  ;;  %v346_v21 = vld [vmem:[%s4509_s22 + $0x140] sm:$0xff] }
  0x35   : > { %3848 = vmatmul.msk.f32.vlgmr.msra.gmra.mxu3 %vm393_vm0, %v4534_v9  ;;  %531 = vmatpush.msrb.mxu2 %v344_v11  ;;  %v387_v20 = vld [vmem:[%s6737_s3] sm:$0xf]  ;;  %v347_v23 = vld [vmem:[%s4509_s22 + $0x148] sm:$0xff]  ;;  %v316_v24 = vld [vmem:[%s4509_s22 + $0x50] sm:$0xff] }
  0x36   : > { %551 = vmatpush.msrb.mxu3 %v345_v10  ;;  %491 = vmatpush.msrb.mxu0 %v342_v12  ;;  %v317_v22 = vld [vmem:[%s4509_s22 + $0x58] sm:$0xff]  ;;  %v314_v25 = vld [vmem:[%s4509_s22 + $0x40] sm:$0xff]  ;;  %v315_v26 = vld [vmem:[%s4509_s22 + $0x48] sm:$0xff] }
  0x37   : > { %511 = vmatpush.msrb.mxu1 %v343_v13  ;;  %532 = vmatpush.msrb.mxu2 %v312_v15  ;;  %v353_v27 = vld [vmem:[%s4509_s22 + $0x178] sm:$0xff]  ;;  %v352_v28 = vld [vmem:[%s4509_s22 + $0x170] sm:$0xff]  ;;  %v350_v29 = vld [vmem:[%s4509_s22 + $0x160] sm:$0xff] }
  0x38   : > { %552 = vmatpush.msrb.mxu3 %v313_v14  ;;  %492 = vmatpush.msrb.mxu0 %v310_v16  ;;  %v321_v30 = vld [vmem:[%s4509_s22 + $0x78] sm:$0xff]  ;;  %v351_v31 = vld [vmem:[%s4509_s22 + $0x168] sm:$0xff]  ;;  %v320_v32 = vld [vmem:[%s4509_s22 + $0x70] sm:$0xff] }
  0x39   : > { %512 = vmatpush.msrb.mxu1 %v311_v17  ;;  %611 = vmatpush.msra.mxu2 %v348_v19  ;;  %v318_v33 = vld [vmem:[%s4509_s22 + $0x60] sm:$0xff]  ;;  %v319_v34 = vld [vmem:[%s4509_s22 + $0x68] sm:$0xff]  ;;  %v357_v35 = vld [vmem:[%s4509_s22 + $0x198] sm:$0xff] }
  0x3a   : > { %631 = vmatpush.msra.mxu3 %v349_v18  ;;  %390 = vperm.xlu0 %3954, %v387_v20   ;;  %v356_v36 = vld [vmem:[%s4509_s22 + $0x190] sm:$0xff]  ;;  %v354_v37 = vld [vmem:[%s4509_s22 + $0x180] sm:$0xff]  ;;  %v325_v38 = vld [vmem:[%s4509_s22 + $0x98] sm:$0xff] }
  0x3b   : > { %571 = vmatpush.msra.mxu0 %v346_v21  ;;  %591 = vmatpush.msra.mxu1 %v347_v23  ;;  %v355_v39 = vld [vmem:[%s4509_s22 + $0x188] sm:$0xff]  ;;  %v324_v40 = vld [vmem:[%s4509_s22 + $0x90] sm:$0xff]  ;;  %v322_v41 = vld [vmem:[%s4509_s22 + $0x80] sm:$0xff] }
  0x3c   : > { %3849 = vmatmul.msk.f32.vlgmr.msrb.gmra.mxu0 %vm393_vm0, %v4534_v9  ;;  %3850 = vmatmul.msk.f32.vlgmr.msrb.gmra.mxu1 %vm393_vm0, %v4534_v9  ;;  %v323_v42 = vld [vmem:[%s4509_s22 + $0x88] sm:$0xff]  ;;  %v361_v43 = vld [vmem:[%s4509_s22 + $0x1b8] sm:$0xff]  ;;  %v360_v44 = vld [vmem:[%s4509_s22 + $0x1b0] sm:$0xff] }
  0x3d   : > { %3851 = vmatmul.msk.f32.vlgmr.msrb.gmra.mxu2 %vm393_vm0, %v4534_v9  ;;  %3852 = vmatmul.msk.f32.vlgmr.msrb.gmra.mxu3 %vm393_vm0, %v4534_v9  ;;  %v358_v45 = vld [vmem:[%s4509_s22 + $0x1a0] sm:$0xff]  ;;  %v359_v46 = vld [vmem:[%s4509_s22 + $0x1a8] sm:$0xff]  ;;  %v329_v47 = vld [vmem:[%s4509_s22 + $0xb8] sm:$0xff] }
  0x3e   : > { %632 = vmatpush.msra.mxu3 %v317_v22  ;;  %612 = vmatpush.msra.mxu2 %v316_v24  ;;  %v328_v48 = vld [vmem:[%s4509_s22 + $0xb0] sm:$0xff]  ;;  %v326_v49 = vld [vmem:[%s4509_s22 + $0xa0] sm:$0xff]  ;;  %v327_v50 = vld [vmem:[%s4509_s22 + $0xa8] sm:$0xff] }
  0x3f   : > { %572 = vmatpush.msra.mxu0 %v314_v25  ;;  %592 = vmatpush.msra.mxu1 %v315_v26  ;;  %v365_v51 = vld [vmem:[%s4509_s22 + $0x1d8] sm:$0xff]  ;;  %v364_v52 = vld [vmem:[%s4509_s22 + $0x1d0] sm:$0xff]  ;;  %v362_v53 = vld [vmem:[%s4509_s22 + $0x1c0] sm:$0xff] }
  0x40   : > { %711 = vmatpush.msrb.mxu3 %v353_v27  ;;  %691 = vmatpush.msrb.mxu2 %v352_v28  ;;  %v363_v54 = vld [vmem:[%s4509_s22 + $0x1c8] sm:$0xff]  ;;  %v333_v55 = vld [vmem:[%s4509_s22 + $0xd8] sm:$0xff]  ;;  %v332_v56 = vld [vmem:[%s4509_s22 + $0xd0] sm:$0xff] }
  0x41   : > { %651 = vmatpush.msrb.mxu0 %v350_v29  ;;  %671 = vmatpush.msrb.mxu1 %v351_v31  ;;  %v330_v57 = vld [vmem:[%s4509_s22 + $0xc0] sm:$0xff]  ;;  %v331_v58 = vld [vmem:[%s4509_s22 + $0xc8] sm:$0xff]  ;;  %v369_v59 = vld [vmem:[%s4509_s22 + $0x1f8] sm:$0xff] }
  0x42   : > { %712 = vmatpush.msrb.mxu3 %v321_v30  ;;  %692 = vmatpush.msrb.mxu2 %v320_v32  ;;  %v368_v60 = vld [vmem:[%s4509_s22 + $0x1f0] sm:$0xff]  ;;  %v366_v61 = vld [vmem:[%s4509_s22 + $0x1e0] sm:$0xff]  ;;  %v367_v62 = vld [vmem:[%s4509_s22 + $0x1e8] sm:$0xff] }
  0x43   : > { %652 = vmatpush.msrb.mxu0 %v318_v33  ;;  %672 = vmatpush.msrb.mxu1 %v319_v34  ;;  %v337_v63 = vld [vmem:[%s4509_s22 + $0xf8] sm:$0xff]  ;;  %v336_v0 = vld [vmem:[%s4509_s22 + $0xf0] sm:$0xff]  ;;  %v334_v1 = vld [vmem:[%s4509_s22 + $0xe0] sm:$0xff] }
  0x44   : > { %3853 = vmatmul.msk.f32.vlgmr.msra.gmra.mxu0 %vm393_vm0, %v4534_v9  ;;  %3854 = vmatmul.msk.f32.vlgmr.msra.gmra.mxu1 %vm393_vm0, %v4534_v9  ;;  %v335_v2 = vld [vmem:[%s4509_s22 + $0xe8] sm:$0xff]  ;;  %v370_v3 = vld [vmem:[%s4517_s14] sm:$0xff]  ;;  %s4317_s22 = sshra.s32 %s3718_s13, 4  ;;  %s4318_s22 = int_to_ptr.hbm [resolvable:$true] %s4317_s22 }
  0x45   : > { %3855 = vmatmul.msk.f32.vlgmr.msra.gmra.mxu2 %vm393_vm0, %v4534_v9  ;;  %3856 = vmatmul.msk.f32.vlgmr.msra.gmra.mxu3 %vm393_vm0, %v4534_v9  ;;  %1694 = vst [vmem:[#allocation1] ss:$2 sm:$0xff] %v370_v3  ;;  %v4662_v8 = vld [vmem:[%s4517_s14 + $0x20] sm:$0xff]  ;;  %v371_v11 = vld [vmem:[%s4517_s14 + $0x8] sm:$0xff]  ;;  %s4319_s0 = scalar_lea.hbm %s4318_s22, 32  ;;  %p4324_p7 = scmp.lt.s32.totalorder %s4318_s22, %s6738_s4 }
  0x46   : > { %791 = vmatpush.msra.mxu3 %v357_v35  ;;  %771 = vmatpush.msra.mxu2 %v356_v36  ;;  %1696 = vst [vmem:[#allocation1 + $0x10] ss:$2 sm:$0xff] %v371_v11  ;;  %v4668_v19 = vld [vmem:[%s4517_s14 + $0x40] sm:$0xff]  ;;  %v4676_v27 = vld [vmem:[%s4517_s14 + $0x28] sm:$0xff]  ;;  %p4320_p4 = scmp.ne.s32.totalorder %s4318_s22, %s4319_s0  ;;  %p4325_p8 = scmp.lt.s32.totalorder %s4323_s27, %s4319_s0 }
  0x47   : > { %731 = vmatpush.msra.mxu0 %v354_v37  ;;  %751 = vmatpush.msra.mxu1 %v355_v39  ;;  %6763 = vst [vmem:[#allocation11_spill] sm:$0xff] %v4668_v19  ;;  %v4685_v37 = vld [vmem:[%s4517_s14 + $0x10] sm:$0xff] }
  0x48   : > { %792 = vmatpush.msra.mxu3 %v325_v38  ;;  %772 = vmatpush.msra.mxu2 %v324_v40  ;;  %v4688_v38 = vld [vmem:[%s4517_s14 + $0x60] sm:$0xff]  ;;  %1698 = vst [vmem:[#allocation1 + $0x20] ss:$2 sm:$0xff] %v4685_v37  ;;  %p4321_p5 = pnand %p4320_p4, %p4470_p9  ;;  %p4326_p10 = por %p4325_p8, %p4324_p7 }
  0x49   : > { %732 = vmatpush.msra.mxu0 %v322_v41  ;;  %752 = vmatpush.msra.mxu1 %v323_v42  ;;  %6764 = vst [vmem:[#allocation12_spill] sm:$0xff] %v4688_v38 }
  0x4a   : > { %p4322_p6 = pneg %p4321_p5 }
  0x4c   : > { %3857 = vmatmul.msk.f32.vlgmr.msrb.gmra.mxu0 %vm393_vm0, %v4534_v9  ;;  %3858 = vmatmul.msk.f32.vlgmr.msrb.gmra.mxu1 %vm393_vm0, %v4534_v9  ;;  %v1702_v4 = vld.sshfl [vmem:[#allocation1 + $0x8] sm:$0xff pattern:$0x75316420]  ;;  %v1701_v6 = vld.sshfl [vmem:[#allocation1] sm:$0xff pattern:$0x75316420]  ;;  %p4327_p13 = pnand %p4326_p10, %p4322_p6 }
  0x4d   : > { %3859 = vmatmul.msk.f32.vlgmr.msrb.gmra.mxu2 %vm393_vm0, %v4534_v9  ;;  %3860 = vmatmul.msk.f32.vlgmr.msrb.gmra.mxu3 %vm393_vm0, %v4534_v9  ;;  %v1784_v5 = vsel %vm1037_vm1, %v1702_v4, -inf  ;;  %v1777_v10 = vsel %vm1037_vm1, %v1701_v6, -inf  ;;  %1709 = vst [vmem:[#allocation1] ss:$2 sm:$0xff] %v4662_v8 }
  0x4e   : > { %871 = vmatpush.msrb.mxu3 %v361_v43  ;;  %851 = vmatpush.msrb.mxu2 %v360_v44  ;;  %v1785_v7 = vrot.slane %v1784_v5, 4  ;;  %v1778_v12 = vrot.slane %v1777_v10, 4  ;;  %v1704_v24 = vld.sshfl [vmem:[#allocation1 + $0x18] sm:$0xff pattern:$0x75316420] }
  0x4f   : > { %811 = vmatpush.msrb.mxu0 %v358_v45  ;;  %831 = vmatpush.msrb.mxu1 %v359_v46  ;;  %v1703_v28 = vld.sshfl [vmem:[#allocation1 + $0x10] sm:$0xff pattern:$0x75316420]  ;;  %v1798_v29 = vsel %vm1037_vm1, %v1704_v24, -inf }
  0x50   : > { %872 = vmatpush.msrb.mxu3 %v329_v47  ;;  %852 = vmatpush.msrb.mxu2 %v328_v48  ;;  %v1786_v13 = vmax.f32 %v1784_v5, %v1785_v7  ;;  %1710 = vst [vmem:[#allocation1 + $0x10] ss:$2 sm:$0xff] %v4676_v27  ;;  %v1791_v30 = vsel %vm1037_vm1, %v1703_v28, -inf  ;;  %v1799_v31 = vrot.slane %v1798_v29, 4  ;;  %v4698_v45 = vld [vmem:[%s4517_s14 + $0x48] sm:$0xff] }
  0x51   : > { %812 = vmatpush.msrb.mxu0 %v326_v49  ;;  %832 = vmatpush.msrb.mxu1 %v327_v50  ;;  %v1792_v33 = vrot.slane %v1791_v30, 4  ;;  %6765 = vst [vmem:[#allocation13_spill] sm:$0xff] %v4698_v45 }
  0x52   : > { %v1787_v14 = vrot.slane %v1786_v13, 2  ;;  %v1800_v35 = vmax.f32 %v1798_v29, %v1799_v31 }
  0x53   : > { %v1793_v36 = vmax.f32 %v1791_v30, %v1792_v33  ;;  %v4743_v30 = vld [vmem:[%s4517_s14 + $0x18] sm:$0xff] }
  0x54   : > { %3861 = vmatmul.msk.f32.vlgmr.msra.gmra.mxu0 %vm393_vm0, %v4534_v9  ;;  %3862 = vmatmul.msk.f32.vlgmr.msra.gmra.mxu1 %vm393_vm0, %v4534_v9  ;;  %v1788_v16 = vmax.f32 %v1786_v13, %v1787_v14  ;;  %v4670_v20 = vld.sshfl [vmem:[#allocation1] sm:$0xff pattern:$0x75316420]  ;;  %v4672_v21 = vld.sshfl [vmem:[#allocation1 + $0x8] sm:$0xff pattern:$0x75316420] }
  0x55   : > { %3863 = vmatmul.msk.f32.vlgmr.msra.gmra.mxu2 %vm393_vm0, %v4534_v9  ;;  %3864 = vmatmul.msk.f32.vlgmr.msra.gmra.mxu3 %vm393_vm0, %v4534_v9  ;;  %1721 = vst [vmem:[#allocation1] ss:$2 sm:$0xff] %v4668_v19  ;;  %v1801_v40 = vrot.slane %v1800_v35, 2  ;;  %v1794_v43 = vrot.slane %v1793_v36, 2 }
  0x56   : > { %951 = vmatpush.msra.mxu3 %v365_v51  ;;  %931 = vmatpush.msra.mxu2 %v364_v52  ;;  %v1789_v18 = vrot.slane %v1788_v16, 1  ;;  %1700 = vst [vmem:[#allocation1 + $0x30] ss:$2 sm:$0xff] %v4743_v30 }
  0x57   : > { %891 = vmatpush.msra.mxu0 %v362_v53  ;;  %911 = vmatpush.msra.mxu1 %v363_v54  ;;  %v1802_v44 = vmax.f32 %v1800_v35, %v1801_v40  ;;  %v4700_v46 = vld.sshfl [vmem:[#allocation1 + $0x10] sm:$0xff pattern:$0x75316420]  ;;  %v4702_v47 = vld.sshfl [vmem:[#allocation1 + $0x18] sm:$0xff pattern:$0x75316420]  ;;  %v1795_v48 = vmax.f32 %v1793_v36, %v1794_v43 }
  0x58   : > { %952 = vmatpush.msra.mxu3 %v333_v55  ;;  %932 = vmatpush.msra.mxu2 %v332_v56  ;;  %v1790_v23 = vmax.f32 %v1788_v16, %v1789_v18  ;;  %1722 = vst [vmem:[#allocation1 + $0x10] ss:$2 sm:$0xff] %v4698_v45 }
  0x59   : > { %892 = vmatpush.msra.mxu0 %v330_v57  ;;  %912 = vmatpush.msra.mxu1 %v331_v58  ;;  %v1803_v49 = vrot.slane %v1802_v44, 1  ;;  %v1796_v50 = vrot.slane %v1795_v48, 1  ;;  %v4713_v57 = vld [vmem:[%s4517_s14 + $0x68] sm:$0xff] }
  0x5a   : > { %v2033_v26 = vrot.slane %v1790_v23, 4  ;;  %6768 = vst [vmem:[#allocation16_spill] sm:$0xff] %v4713_v57 }
  0x5b   : > { %v1804_v51 = vmax.f32 %v1802_v44, %v1803_v49  ;;  %v1797_v53 = vmax.f32 %v1795_v48, %v1796_v50 }
  0x5c   : > { %3865 = vmatmul.msk.f32.vlgmr.msrb.gmra.mxu0 %vm393_vm0, %v4534_v9  ;;  %3866 = vmatmul.msk.f32.vlgmr.msrb.gmra.mxu1 %vm393_vm0, %v4534_v9  ;;  %v4692_v41 = vld.sshfl [vmem:[#allocation1] sm:$0xff pattern:$0x75316420]  ;;  %v4694_v42 = vld.sshfl [vmem:[#allocation1 + $0x8] sm:$0xff pattern:$0x75316420] }
  0x5d   : > { %3867 = vmatmul.msk.f32.vlgmr.msrb.gmra.mxu2 %vm393_vm0, %v4534_v9  ;;  %3868 = vmatmul.msk.f32.vlgmr.msrb.gmra.mxu3 %vm393_vm0, %v4534_v9  ;;  %1733 = vst [vmem:[#allocation1] ss:$2 sm:$0xff] %v4688_v38  ;;  %v2034_v56 = vrot.slane %v1804_v51, 4 }
  0x5e   : > { %1031 = vmatpush.msrb.mxu3 %v369_v59  ;;  %1011 = vmatpush.msrb.mxu2 %v368_v60 }
  0x5f   : > { %971 = vmatpush.msrb.mxu0 %v366_v61  ;;  %991 = vmatpush.msrb.mxu1 %v367_v62  ;;  %v4715_v58 = vld.sshfl [vmem:[#allocation1 + $0x10] sm:$0xff pattern:$0x75316420]  ;;  %v4717_v59 = vld.sshfl [vmem:[#allocation1 + $0x18] sm:$0xff pattern:$0x75316420]  ;;  %v2050_v60 = vsel %vm1037_vm1, %v1797_v53, %v2034_v56 }
  0x60   : > { %1032 = vmatpush.msrb.mxu3 %v337_v63  ;;  %1012 = vmatpush.msrb.mxu2 %v336_v0  ;;  %6769 = vst [vmem:[#allocation17_spill] sm:$0xff] %v4715_v58  ;;  %v4721_v61 = vsub.f32 %v371_v11, %v2050_v60  ;;  %v4724_v62 = vld [vmem:[%s4517_s14 + $0x30] sm:$0xff]  ;;  %v1706_v63 = vld.sshfl [vmem:[#allocation1 + $0x28] sm:$0xff pattern:$0x75316420] }
  0x61   : > { %972 = vmatpush.msrb.mxu0 %v334_v1  ;;  %992 = vmatpush.msrb.mxu1 %v335_v2  ;;  %6770 = vst [vmem:[#allocation18_spill] sm:$0xff] %v4717_v59  ;;  %v1812_v1 = vsel %vm1037_vm1, %v1706_v63, -inf  ;;  %v1705_v2 = vld.sshfl [vmem:[#allocation1 + $0x20] sm:$0xff pattern:$0x75316420] }
  0x62   : > { %1734 = vst [vmem:[#allocation1 + $0x10] ss:$2 sm:$0xff] %v4713_v57  ;;  %v2099_v0 = vmul.f32 1.442695, %v4721_v61  ;;  %v1805_v5 = vsel %vm1037_vm1, %v1705_v2, -inf }
  0x63   : > { %1711 = vst [vmem:[#allocation1 + $0x20] ss:$2 sm:$0xff] %v4724_v62 }
  0x64   : > { %3869 = vmatmul.msk.f32.vlgmr.msra.gmra.mxu0 %vm393_vm0, %v4534_v9  ;;  %3870 = vmatmul.msk.f32.vlgmr.msra.gmra.mxu1 %vm393_vm0, %v4534_v9  ;;  %v4707_v54 = vld.sshfl [vmem:[#allocation1] sm:$0xff pattern:$0x75316420]  ;;  %v4709_v55 = vld.sshfl [vmem:[#allocation1 + $0x8] sm:$0xff pattern:$0x75316420] }
  0x65   : > { %3871 = vmatmul.msk.f32.vlgmr.msra.gmra.mxu2 %vm393_vm0, %v4534_v9  ;;  %3872 = vmatmul.msk.f32.vlgmr.msra.gmra.mxu3 %vm393_vm0, %v4534_v9  ;;  %6766 = vst [vmem:[#allocation14_spill] sm:$0xff] %v4707_v54 }
  0x66   : > { %6767 = vst [vmem:[#allocation15_spill] sm:$0xff] %v4709_v55 }
  0x69   : > { %v4734_v18 = vld.sshfl [vmem:[#allocation1 + $0x18] sm:$0xff pattern:$0x75316420] }
  0x6a   : > { %6772 = vst [vmem:[#allocation20_spill] sm:$0xff] %v4734_v18  ;;  %v4747_v33 = vld.sshfl [vmem:[#allocation1 + $0x20] sm:$0xff pattern:$0x75316420] }
  0x6b   : > { %v4749_v35 = vld.sshfl [vmem:[#allocation1 + $0x28] sm:$0xff pattern:$0x75316420] }
  0x6c   : > { %3873 = vmatmul.msk.f32.vlgmr.msrb.gmra.mxu0 %vm393_vm0, %v4534_v9  ;;  %3874 = vmatmul.msk.f32.vlgmr.msrb.gmra.mxu1 %vm393_vm0, %v4534_v9 }
  0x6d   : > { %3875 = vmatmul.msk.f32.vlgmr.msrb.gmra.mxu2 %vm393_vm0, %v4534_v9  ;;  %3876 = vmatmul.msk.f32.vlgmr.msrb.gmra.mxu3 %vm393_vm0, %v4534_v9  ;;  %v1779_v9 = vmax.f32 %v1777_v10, %v1778_v12  ;;  %v1806_v10 = vrot.slane %v1805_v5, 4 }
  0x6f   : > { %v1780_v15 = vrot.slane %v1779_v9, 2  ;;  %v1807_v14 = vmax.f32 %v1805_v5, %v1806_v10  ;;  %v4771_v5 = vld [vmem:[%s4517_s14 + $0x70] sm:$0xff] }
  0x70   : > { %6774 = vst [vmem:[#allocation22_spill] sm:$0xff] %v4771_v5 }
  0x71   : > { %v1781_v17 = vmax.f32 %v1779_v9, %v1780_v15 }
  0x73   : > { %v1782_v22 = vrot.slane %v1781_v17, 1 }
  0x75   : > { %v1783_v25 = vmax.f32 %v1781_v17, %v1782_v22  ;;  %v4732_v17 = vld.sshfl [vmem:[#allocation1 + $0x10] sm:$0xff pattern:$0x75316420] }
  0x76   : > { %6771 = vst [vmem:[#allocation19_spill] sm:$0xff] %v4732_v17 }
  0x77   : > { %v2049_v32 = vsel %vm1037_vm1, %v1783_v25, %v2033_v26  ;;  %v4739_v25 = vld [vmem:[%s4517_s14 + $0x50] sm:$0xff]  ;;  %v1808_v26 = vrot.slane %v1807_v14, 2 }
  0x78   : > { %v4682_v34 = vsub.f32 %v370_v3, %v2049_v32  ;;  %v1813_v3 = vrot.slane %v1812_v1, 4  ;;  %6773 = vst [vmem:[#allocation21_spill] sm:$0xff] %v4739_v25 }
  0x79   : > { %1723 = vst [vmem:[#allocation1 + $0x20] ss:$2 sm:$0xff] %v4739_v25  ;;  %v1809_v44 = vmax.f32 %v1807_v14, %v1808_v26 }
  0x7a   : > { %v2097_v39 = vmul.f32 1.442695, %v4682_v34  ;;  %v1814_v11 = vmax.f32 %v1812_v1, %v1813_v3 }
  0x7c   : > { %3955 = vpow2.f32 %v2097_v39  ;;  %v1815_v15 = vrot.slane %v1814_v11, 2 }
  0x7d   : > { %3957 = vpow2.f32 %v2099_v0 }
  0x7e   : > { %v1816_v29 = vmax.f32 %v1814_v11, %v1815_v15 }
  0x80   : > { %v1817_v51 = vrot.slane %v1816_v29, 1 }
  0x82   : > { %v4705_v52 = vpop.eup %3955 }
  0x83   : > { %2145 = vst [vmem:[#allocation1] ss:$2 sm:$0xff] %v4705_v52  ;;  %v4736_v23 = vpop.eup %3957 }
  0x84   : > { %2147 = vst [vmem:[#allocation1 + $0x10] ss:$2 sm:$0xff] %v4736_v23 }
  0x8a   : > { %v2153_v4 = vld.sshfl [vmem:[#allocation1 + $0x8] sm:$0xff pattern:$0x75316420]  ;;  %v2152_v6 = vld.sshfl [vmem:[#allocation1] sm:$0xff pattern:$0x75316420] }
  0x8b   : > { %v2235_v7 = vsel %vm1037_vm1, %v2153_v4, 0.0  ;;  %v2228_v12 = vsel %vm1037_vm1, %v2152_v6, 0.0  ;;  %v2154_v2 = vld.sshfl [vmem:[#allocation1 + $0x10] sm:$0xff pattern:$0x75316420]  ;;  %v1810_v6 = vrot.slane %v1809_v44, 1 }
  0x8c   : > { %v2236_v13 = vrot.slane %v2235_v7, 4  ;;  %v2229_v9 = vrot.slane %v2228_v12, 4  ;;  %v2155_v3 = vld.sshfl [vmem:[#allocation1 + $0x18] sm:$0xff pattern:$0x75316420]  ;;  %v2242_v4 = vsel %vm1037_vm1, %v2154_v2, 0.0 }
  0x8e   : > { %v2237_v16 = vadd.f32 %v2236_v13, %v2235_v7  ;;  %v2230_v22 = vadd.f32 %v2229_v9, %v2228_v12  ;;  %v1818_v7 = vmax.f32 %v1816_v29, %v1817_v51  ;;  %v2243_v12 = vrot.slane %v2242_v4, 4  ;;  %v4774_v9 = vld.sshfl [vmem:[#allocation1 + $0x20] sm:$0xff pattern:$0x75316420] }
  0x8f   : > { %v2249_v13 = vsel %vm1037_vm1, %v2155_v3, 0.0  ;;  %6775 = vst [vmem:[#allocation23_spill] sm:$0xff] %v4774_v9  ;;  %v4786_v29 = vld [vmem:[%s4517_s14 + $0x38] sm:$0xff] }
  0x90   : > { %v2238_v24 = vrot.slane %v2237_v16, 2  ;;  %v2231_v28 = vrot.slane %v2230_v22, 2 }
  0x92   : > { %v2239_v32 = vadd.f32 %v2238_v24, %v2237_v16  ;;  %v2232_v36 = vadd.f32 %v2231_v28, %v2230_v22  ;;  %v2250_v16 = vrot.slane %v2249_v13, 4  ;;  %v4776_v22 = vld.sshfl [vmem:[#allocation1 + $0x28] sm:$0xff pattern:$0x75316420] }
  0x93   : > { %6776 = vst [vmem:[#allocation24_spill] sm:$0xff] %v4776_v22 }
  0x94   : > { %v2240_v43 = vrot.slane %v2239_v32, 1  ;;  %v2233_v50 = vrot.slane %v2232_v36, 1  ;;  %1735 = vst [vmem:[#allocation1 + $0x20] ss:$2 sm:$0xff] %v4771_v5 }
  0x96   : > { %v4759_v53 = vadd.f32 %v2240_v43, %v2239_v32  ;;  %v4765_v63 = vadd.f32 %v2233_v50, %v2232_v36  ;;  %v2244_v36 = vadd.f32 %v2243_v12, %v2242_v4  ;;  %v4788_v43 = vld.sshfl [vmem:[#allocation1 + $0x38] sm:$0xff pattern:$0x75316420] }
  0x98   : > { %3959 = vrcp.f32 %v4759_v53  ;;  %v2245_v12 = vrot.slane %v2244_v36, 2  ;;  %vm2471_vm2 = vweird.f32 %v4759_v53  ;;  %vm2457_vm4 = vweird.f32 %v4765_v63 }
  0x99   : > { %3961 = vrcp.f32 %v4765_v63 }
  0x9a   : > { %3963 = vlog2.f32 %v4759_v53 }
  0x9b   : > { %3965 = vlog2.f32 %v4765_v63 }
  0x9e   : > { %v4790_v50 = vpop.eup %3959 }
  0x9f   : > { %v4798_v2 = vpop.eup %3961  ;;  %vm2472_vm3 = vweird.f32 %v4790_v50 }
  0xa0   : > { %vm2458_vm5 = vweird.f32 %v4798_v2  ;;  %vm4835_vm6 = vmor %vm2471_vm2, %vm2472_vm3 }
  0xa1   : > { %vm4851_vm7 = vmor %vm2457_vm4, %vm2458_vm5 }
  0xac   : > { %v4745_v31 = vpop.permute.xlu0 %390 }
  0xb0   : > { %v414_v39 = vpop.f32.mrf.mxu0 }
  0xb1   : > { %v434_v40 = vpop.f32.mrf.mxu1  ;;  %v4754_v48 = vadd.f32 %v414_v39, %v4745_v31  ;;  %v1811_v39 = vmax.f32 %v1809_v44, %v1810_v6  ;;  %v2467_v44 = vmul.f32 %v4790_v50, %v4759_v53  ;;  %v2251_v6 = vadd.f32 %v2250_v16, %v2249_v13 }
  0xb2   : > { %v4757_v49 = vadd.f32 %v434_v40, %v4745_v31  ;;  %v2035_v40 = vrot.slane %v1818_v7, 4 }
  0xb3   : > { %v1038_v56 = vsel %vm1037_vm1, %v4754_v48, -inf  ;;  %v2252_v13 = vrot.slane %v2251_v6, 2 }
  0xb4   : > { %v1045_v60 = vsel %vm1037_vm1, %v4757_v49, -inf  ;;  %v1039_v0 = vrot.slane %v1038_v56, 4  ;;  %v2051_v16 = vsel %vm1037_vm1, %v1811_v39, %v2035_v40  ;;  %v2463_v40 = vand.u32 2147483648, %v4765_v63 }
  0xb5   : > { %v1046_v1 = vrot.slane %v1045_v60, 4 }
  0xb6   : > { %v1040_v10 = vmax.f32 %v1038_v56, %v1039_v0 }
  0xb7   : > { %v1047_v11 = vmax.f32 %v1045_v60, %v1046_v1  ;;  %v454_v14 = vpop.f32.mrf.mxu2  ;;  %v4796_v1 = vld.sshfl [vmem:[#allocation1 + $0x30] sm:$0xff pattern:$0x75316420] }
  0xb8   : > { %v474_v15 = vpop.f32.mrf.mxu3  ;;  %v1041_v24 = vrot.slane %v1040_v10, 2  ;;  %v4779_v28 = vadd.f32 %v454_v14, %v4745_v31  ;;  %1712 = vst [vmem:[#allocation1 + $0x30] ss:$2 sm:$0xff] %v4786_v29  ;;  %v2468_v14 = vsub.f32 1.0, %v2467_v44  ;;  %v2477_v44 = vand.u32 2147483648, %v4759_v53 }
  0xb9   : > { %v1048_v26 = vrot.slane %v1047_v11, 2  ;;  %v4782_v32 = vadd.f32 %v474_v15, %v4745_v31 }
  0xba   : > { %v1042_v51 = vmax.f32 %v1040_v10, %v1041_v24  ;;  %v1052_v60 = vsel %vm1037_vm1, %v4779_v28, -inf  ;;  %v2469_v38 = vmul.f32 %v4790_v50, %v2468_v14  ;;  %v2461_v14 = vand.u32 2147483647, %v4765_v63 }
  0xbb   : > { %v1049_v56 = vmax.f32 %v1047_v11, %v1048_v26  ;;  %v1059_v0 = vsel %vm1037_vm1, %v4782_v32, -inf  ;;  %v1053_v3 = vrot.slane %v1052_v60, 4  ;;  %v2453_v11 = vmul.f32 %v4798_v2, %v4765_v63 }
  0xbc   : > { %v1060_v4 = vrot.slane %v1059_v0, 4  ;;  %v1043_v7 = vrot.slane %v1042_v51, 1  ;;  %vm4864_vm9 = vcmp.eq.f32.partialorder %v2461_v14, 8.507059e+37 }
  0xbd   : > { %v1050_v10 = vrot.slane %v1049_v56, 1  ;;  %v1054_v15 = vmax.f32 %v1052_v60, %v1053_v3  ;;  %v2454_v5 = vsub.f32 1.0, %v2453_v11  ;;  %v3964_v3 = vpop.eup %3963 }
  0xbe   : > { %v1044_v24 = vmax.f32 %v1042_v51, %v1043_v7  ;;  %v1061_v57 = vmax.f32 %v1059_v0, %v1060_v4  ;;  %v2246_v51 = vadd.f32 %v2245_v12, %v2244_v36  ;;  %v494_v0 = vpop.f32.mrf.mxu0  ;;  %v2475_v36 = vand.u32 2147483647, %v4759_v53  ;;  %v4827_v4 = vld [vmem:[%s4517_s14 + $0x58] sm:$0xff]  ;;  %v3966_v12 = vpop.eup %3965 }
  0xbf   : > { %v1051_v26 = vmax.f32 %v1049_v56, %v1050_v10  ;;  %v2455_v56 = vmul.f32 %v4798_v2, %v2454_v5  ;;  %v1055_v60 = vrot.slane %v1054_v15, 2  ;;  %v2470_v5 = vadd.f32 %v4790_v50, %v2469_v38  ;;  %6777 = vst [vmem:[#allocation25_spill] sm:$0xff] %v4827_v4  ;;  %v4829_v7 = vld.sshfl [vmem:[#allocation1 + $0x30] sm:$0xff pattern:$0x75316420] }
  0xc0   : > { %v4810_v18 = vsub.f32 %v4754_v48, %v1044_v24  ;;  %v4840_v11 = vadd.f32 %v494_v0, %v4745_v31  ;;  %v4845_v24 = vsub.f32 %v4685_v37, %v2051_v16  ;;  %v2478_v0 = vor.u32 1.1754944e-38, %v2477_v44 }
  0xc1   : > { %v4813_v17 = vsub.f32 %v4757_v49, %v1051_v26  ;;  %v1062_v49 = vrot.slane %v1061_v57, 2  ;;  %v2456_v38 = vadd.f32 %v4798_v2, %v2455_v56  ;;  %v4847_v26 = vld.sshfl [vmem:[#allocation1 + $0x38] sm:$0xff pattern:$0x75316420]  ;;  %v1056_v55 = vmax.f32 %v1054_v15, %v1055_v60 }
  0xc2   : > { %v1294_v39 = vmul.f32 1.442695, %v4810_v18  ;;  %6780 = vst [vmem:[#allocation26_spill] sm:$0xff] %v4845_v24  ;;  %v2474_v56 = vsel %vm4835_vm6, %v4790_v50, %v2470_v5  ;;  %vm2476_vm8 = vcmp.eq.f32.partialorder %v2475_v36, 8.507059e+37  ;;  %v2247_v37 = vrot.slane %v2246_v51, 1 }
  0xc3   : > { %v1296_v48 = vmul.f32 1.442695, %v4813_v17  ;;  %v1063_v54 = vmax.f32 %v1061_v57, %v1062_v49  ;;  %1724 = vst [vmem:[#allocation1 + $0x30] ss:$2 sm:$0xff] %v4827_v4  ;;  %v2253_v16 = vadd.f32 %v2252_v13, %v2251_v6  ;;  %v1057_v25 = vrot.slane %v1056_v55, 1 }
  0xc4   : > { %3967 = vpow2.f32 %v1294_v39  ;;  %v2464_v39 = vor.u32 1.1754944e-38, %v2463_v40  ;;  %v1066_v22 = vsel %vm1037_vm1, %v4840_v11, -inf  ;;  %v2460_v15 = vsel %vm4851_vm7, %v4798_v2, %v2456_v38 }
  0xc5   : > { %3969 = vpow2.f32 %v1296_v48  ;;  %v2997_v48 = vmul.f32 0.6931472, %v3966_v12  ;;  %v1064_v63 = vrot.slane %v1063_v54, 1  ;;  %v4868_v44 = vadd.f32 %v2247_v37, %v2246_v51 }
  0xc6   : > { %v2254_v50 = vrot.slane %v2253_v16, 1  ;;  %v2479_v40 = vsel %vm2476_vm8, %v2478_v0, %v2474_v56  ;;  %v2999_v6 = vmul.f32 0.6931472, %v3964_v3  ;;  %v1058_v13 = vmax.f32 %v1056_v55, %v1057_v25  ;;  %v514_v55 = vpop.f32.mrf.mxu1 }
  0xc7   : > { %v1065_v49 = vmax.f32 %v1063_v54, %v1064_v63  ;;  %3971 = vrcp.f32 %v4868_v44  ;;  %v1067_v2 = vrot.slane %v1066_v22, 4  ;;  %v2465_v25 = vsel %vm4864_vm9, %v2464_v39, %v2460_v15 }
  0xc8   : > { %v4871_v10 = vadd.f32 %v2254_v50, %v2253_v16  ;;  %v4876_v51 = vsub.f32 %v4779_v28, %v1058_v13  ;;  %v2932_v3 = vrot.slane %v2479_v40, 4  ;;  %v3092_v56 = vrot.slane %v2999_v6, 4  ;;  %v4889_v16 = vld [vmem:[%s4517_s14 + $0x78] sm:$0xff] }
  0xc9   : > { %v4879_v14 = vsub.f32 %v4782_v32, %v1065_v49  ;;  %6786 = vst [vmem:[#allocation28_spill] sm:$0xff] %v4889_v16  ;;  %v4892_v63 = vadd.f32 %v514_v55, %v4745_v31  ;;  %v1068_v39 = vmax.f32 %v1066_v22, %v1067_v2  ;;  %v2101_v49 = vmul.f32 1.442695, %v4845_v24 }
  0xca   : > { %v3968_v60 = vpop.eup %3967  ;;  %3973 = vrcp.f32 %v4871_v10  ;;  %v4884_v53 = vld.sshfl [vmem:[#allocation1 + $0x30] sm:$0xff pattern:$0x75316420]  ;;  %v1298_v37 = vmul.f32 1.442695, %v4876_v51  ;;  %v2948_v40 = vsel %vm1037_vm1, %v2465_v25, %v2932_v3  ;;  %v4901_v13 = vsel %vm1037_vm1, %v2997_v48, %v3092_v56 }
  0xcb   : > { %v3970_v5 = vpop.eup %3969  ;;  %v1358_v36 = vsel %vm1037_vm1, %v3968_v60, 0.0  ;;  %6785 = vst [vmem:[#allocation27_spill] sm:$0xff] %v4884_v53  ;;  %v1300_v28 = vmul.f32 1.442695, %v4879_v14  ;;  %v1069_v22 = vrot.slane %v1068_v39, 2  ;;  %v1073_v2 = vsel %vm1037_vm1, %v4892_v63, -inf }
  0xcc   : > { %v1359_v12 = vrot.slane %v1358_v36, 4  ;;  %v1365_v38 = vsel %vm1037_vm1, %v3970_v5, 0.0  ;;  %3975 = vpow2.f32 %v1298_v37  ;;  %v4894_v15 = vld.sshfl [vmem:[#allocation1 + $0x38] sm:$0xff pattern:$0x75316420]  ;;  %v1074_v3 = vrot.slane %v1073_v2, 4 }
  0xcd   : > { %v1366_v54 = vrot.slane %v1365_v38, 4  ;;  %6787 = vst [vmem:[#allocation29_spill] sm:$0xff] %v4894_v15  ;;  %v4896_v57 = vpop.eup %3971  ;;  %3977 = vpow2.f32 %v1300_v28  ;;  %v1070_v25 = vmax.f32 %v1068_v39, %v1069_v22  ;;  %vm2499_vm10 = vweird.f32 %v4871_v10 }
  0xce   : > { %v1360_v0 = vadd.f32 %v1359_v12, %v1358_v36  ;;  %1736 = vst [vmem:[#allocation1 + $0x30] ss:$2 sm:$0xff] %v4889_v16  ;;  %v2481_v37 = vmul.f32 %v4896_v57, %v4868_v44  ;;  %3979 = vpow2.f32 %v2101_v49  ;;  %vm2485_vm11 = vweird.f32 %v4868_v44 }
  0xcf   : > { %v1367_v32 = vadd.f32 %v1366_v54, %v1365_v38  ;;  %v4909_v38 = vmul.f32 %v4705_v52, %v2948_v40  ;;  %v1075_v40 = vmax.f32 %v1073_v2, %v1074_v3  ;;  %vm2486_vm14 = vweird.f32 %v4896_v57 }
  0xd0   : > { %v1361_v50 = vrot.slane %v1360_v0, 2  ;;  %v4904_v5 = vpop.eup %3973  ;;  %vm4978_vm0 = vmor %vm2485_vm11, %vm2486_vm14 }
  0xd1   : > { %v1368_v60 = vrot.slane %v1367_v32, 2  ;;  %v2495_v55 = vmul.f32 %v4904_v5, %v4871_v10  ;;  %v1076_v2 = vrot.slane %v1075_v40, 2  ;;  %vm2500_vm12 = vweird.f32 %v4904_v5 }
  0xd2   : > { %v1362_v6 = vadd.f32 %v1361_v50, %v1360_v0  ;;  %v3976_v0 = vpop.eup %3975  ;;  %vm4946_vm13 = vmor %vm2499_vm10, %vm2500_vm12 }
  0xd3   : > { %v1369_v36 = vadd.f32 %v1368_v60, %v1367_v32  ;;  %v2496_v28 = vsub.f32 1.0, %v2495_v55  ;;  %v3978_v32 = vpop.eup %3977  ;;  %v1372_v52 = vsel %vm1037_vm1, %v3976_v0, 0.0  ;;  %v1071_v60 = vrot.slane %v1070_v25, 1 }
  0xd4   : > { %v1363_v12 = vrot.slane %v1362_v6, 1  ;;  %v1373_v16 = vrot.slane %v1372_v52, 4  ;;  %v1379_v24 = vsel %vm1037_vm1, %v3978_v32, 0.0  ;;  %v2482_v55 = vsub.f32 1.0, %v2481_v37 }
  0xd5   : > { %v1370_v54 = vrot.slane %v1369_v36, 1  ;;  %v1380_v22 = vrot.slane %v1379_v24, 4  ;;  %v2489_v0 = vand.u32 2147483647, %v4868_v44  ;;  %v1077_v37 = vmax.f32 %v1075_v40, %v1076_v2 }
  0xd6   : > { %v1364_v56 = vadd.f32 %v1363_v12, %v1362_v6  ;;  %v1072_v6 = vmax.f32 %v1070_v25, %v1071_v60  ;;  %v4921_v12 = vld.sshfl [vmem:[#allocation1 + $0x20] sm:$0xff pattern:$0x75316420]  ;;  %v1374_v49 = vadd.f32 %v1373_v16, %v1372_v52  ;;  %v4932_v25 = vpop.eup %3979  ;;  %v2503_v16 = vand.u32 2147483647, %v4871_v10 }
  0xd7   : > { %v1371_v50 = vadd.f32 %v1370_v54, %v1369_v36  ;;  %6788 = vst [vmem:[#allocation30_spill] sm:$0xff] %v4921_v12  ;;  %v2497_v36 = vmul.f32 %v4904_v5, %v2496_v28  ;;  %v4925_v54 = vld.sshfl [vmem:[#allocation1 + $0x28] sm:$0xff pattern:$0x75316420]  ;;  %v1381_v3 = vadd.f32 %v1380_v22, %v1379_v24  ;;  %v534_v28 = vpop.f32.mrf.mxu2  ;;  %v2505_v24 = vand.u32 2147483648, %v4871_v10 }
  0xd8   : > { %3981 = vlog2.f32 %v1364_v56  ;;  %6789 = vst [vmem:[#allocation31_spill] sm:$0xff] %v4925_v54  ;;  %v4930_v56 = vsub.f32 %v4840_v11, %v1072_v6  ;;  %v1375_v32 = vrot.slane %v1374_v49, 2  ;;  %v2483_v6 = vmul.f32 %v4896_v57, %v2482_v55 }
  0xd9   : > { %3983 = vlog2.f32 %v1371_v50  ;;  %6791 = vst [vmem:[#allocation33_spill] sm:$0xff] %v4932_v25  ;;  %v554_v50 = vpop.f32.mrf.mxu3  ;;  %v1382_v52 = vrot.slane %v1381_v3, 2  ;;  %v2498_v48 = vadd.f32 %v4904_v5, %v2497_v36  ;;  %v1078_v39 = vrot.slane %v1077_v37, 1 }
  0xda   : > { %3985 = vlog2.f32 %v4871_v10  ;;  %6790 = vst [vmem:[#allocation32_spill] sm:$0xff] %v4930_v56  ;;  %v1302_v60 = vmul.f32 1.442695, %v4930_v56  ;;  %v1376_v22 = vadd.f32 %v1375_v32, %v1374_v49  ;;  %v4954_v49 = vadd.f32 %v554_v50, %v4745_v31 }
  0xdb   : > { %3987 = vlog2.f32 %v4868_v44  ;;  %2149 = vst [vmem:[#allocation1 + $0x20] ss:$2 sm:$0xff] %v4932_v25  ;;  %v1383_v40 = vadd.f32 %v1382_v52, %v1381_v3  ;;  %v4951_v25 = vadd.f32 %v534_v28, %v4745_v31  ;;  %v1079_v12 = vmax.f32 %v1077_v37, %v1078_v39 }
  0xdc   : > { %3989 = vpow2.f32 %v1302_v60  ;;  %v1377_v32 = vrot.slane %v1376_v22, 1  ;;  %vm4957_vm15 = vcmp.eq.f32.partialorder %v2503_v16, 8.507059e+37  ;;  %v2506_v4 = vor.u32 1.1754944e-38, %v2505_v24 }
  0xdd   : > { %v1384_v52 = vrot.slane %v1383_v40, 1  ;;  %v2484_v15 = vadd.f32 %v4896_v57, %v2483_v6  ;;  %v4967_v37 = vsub.f32 %v4892_v63, %v1079_v12  ;;  %v1080_v16 = vsel %vm1037_vm1, %v4951_v25, -inf }
  0xde   : > { %v3982_v11 = vpop.eup %3981  ;;  %v1378_v28 = vadd.f32 %v1377_v32, %v1376_v22  ;;  %v1087_v24 = vsel %vm1037_vm1, %v4954_v49, -inf  ;;  %v1081_v12 = vrot.slane %v1080_v16, 4  ;;  %vm4985_vm2 = vcmp.eq.f32.partialorder %v2489_v0, 8.507059e+37 }
  0xdf   : > { %v3984_v54 = vpop.eup %3983  ;;  %v1583_v55 = vmul.f32 0.6931472, %v3982_v11  ;;  %v1385_v39 = vadd.f32 %v1384_v52, %v1383_v40  ;;  %6796 = vst [vmem:[#allocation34_spill] sm:$0xff] %v4967_v37  ;;  %v1088_v40 = vrot.slane %v1087_v24, 4  ;;  %v2488_v0 = vsel %vm4978_vm0, %v4896_v57, %v2484_v15 }
  0xe0   : > { %v1585_v36 = vmul.f32 0.6931472, %v3984_v54  ;;  %v3986_v3 = vpop.eup %3985  ;;  %v2502_v54 = vsel %vm4946_vm13, %v4904_v5, %v2498_v48  ;;  %3991 = vlog2.f32 %v1378_v28  ;;  %v6799_v5 = vand.u32 2147483648, %v4868_v44 }
  0xe1   : > { %v3988_v50 = vpop.eup %3987  ;;  %v3003_v22 = vmul.f32 0.6931472, %v3986_v3  ;;  %3993 = vlog2.f32 %v1385_v39  ;;  %v6802_v3 = vsub.f32 %v4682_v34, %v4901_v13  ;;  %v1082_v39 = vmax.f32 %v1080_v16, %v1081_v12 }
  0xe2   : > { %v1647_v60 = vsub.f32 %v4813_v17, %v1585_v36  ;;  %v1646_v17 = vsub.f32 %v4810_v18, %v1583_v55  ;;  %v2156_v6 = vld.sshfl [vmem:[#allocation1 + $0x20] sm:$0xff pattern:$0x75316420]  ;;  %v3990_v36 = vpop.eup %3989  ;;  %v2492_v48 = vor.u32 1.1754944e-38, %v6799_v5  ;;  %v2507_v55 = vsel %vm4957_vm15, %v2506_v4, %v2502_v54 }
  0xe3   : > { %v2256_v32 = vsel %vm1037_vm1, %v2156_v6, 0.0  ;;  %v1386_v44 = vsel %vm1037_vm1, %v3990_v36, 0.0  ;;  %v2157_v28 = vld.sshfl [vmem:[#allocation1 + $0x28] sm:$0xff pattern:$0x75316420]  ;;  %v1089_v10 = vmax.f32 %v1087_v24, %v1088_v40  ;;  %v1083_v6 = vrot.slane %v1082_v39, 2 }
  0xe4   : > { %v3188_v11 = vrot.slane %v1647_v60, 4  ;;  %v1304_v60 = vmul.f32 1.442695, %v4967_v37  ;;  %v2257_v54 = vrot.slane %v2256_v32, 4  ;;  %v2933_v13 = vrot.slane %v2507_v55, 4 }
  0xe5   : > { %v1387_v5 = vrot.slane %v1386_v44, 4  ;;  %v2263_v36 = vsel %vm1037_vm1, %v2157_v28, 0.0  ;;  %v2493_v16 = vsel %vm4985_vm2, %v2492_v48, %v2488_v0  ;;  %v1084_v15 = vmax.f32 %v1082_v39, %v1083_v6 }
  0xe6   : > { %v3204_v18 = vsel %vm1037_vm1, %v1646_v17, %v3188_v11  ;;  %v3001_v17 = vmul.f32 0.6931472, %v3988_v50  ;;  %v3093_v11 = vrot.slane %v3003_v22, 4  ;;  %v3992_v34 = vpop.eup %3991  ;;  %3995 = vpow2.f32 %v1304_v60 }
  0xe7   : > { %v3236_v52 = vsub.f32 %v6802_v3, %v3204_v18  ;;  %v1090_v18 = vrot.slane %v1089_v10, 2  ;;  %v3994_v3 = vpop.eup %3993  ;;  %v1819_v57 = vsel %vm1037_vm1, %v4796_v1, -inf  ;;  %v1587_v50 = vmul.f32 0.6931472, %v3992_v34 }
  0xe8   : > { %v3109_v24 = vsel %vm1037_vm1, %v3001_v17, %v3093_v11  ;;  %v2258_v63 = vadd.f32 %v2257_v54, %v2256_v32  ;;  %v2264_v12 = vrot.slane %v2263_v36, 4  ;;  %v1085_v40 = vrot.slane %v1084_v15, 1 }
  0xe9   : > { %v5001_v4 = vmul.f32 %v3236_v52, %v4909_v38  ;;  %v1589_v38 = vmul.f32 0.6931472, %v3994_v3  ;;  %v1091_v22 = vmax.f32 %v1089_v10, %v1090_v18  ;;  %v2949_v52 = vsel %vm1037_vm1, %v2493_v16, %v2933_v13 }
  0xea   : > { %v1388_v28 = vadd.f32 %v1387_v5, %v1386_v44  ;;  %v1820_v2 = vrot.slane %v1819_v57, 4  ;;  %v3141_v48 = vsub.f32 %v4721_v61, %v3109_v24  ;;  %v1086_v60 = vmax.f32 %v1084_v15, %v1085_v40  ;;  %v574_v15 = vpop.f32.mrf.mxu0 }
  0xeb   : > { %6803 = vst [vmem:[#allocation35_spill] sm:$0xff] %v5001_v4  ;;  %v1649_v55 = vsub.f32 %v4879_v14, %v1589_v38  ;;  %v1092_v39 = vrot.slane %v1091_v22, 1  ;;  %v1648_v1 = vsub.f32 %v4876_v51, %v1587_v50  ;;  %v2981_v17 = vmul.f32 %v4736_v23, %v2949_v52 }
  0xec   : > { %v3996_v6 = vpop.eup %3995  ;;  %v2259_v11 = vrot.slane %v2258_v63, 2  ;;  %v2265_v32 = vadd.f32 %v2264_v12, %v2263_v36  ;;  %v1826_v10 = vsel %vm1037_vm1, %v4788_v43, -inf  ;;  %v1389_v54 = vrot.slane %v1388_v28, 2 }
  0xed   : > { %v3189_v0 = vrot.slane %v1649_v55, 4  ;;  %v5018_v44 = vsub.f32 %v4951_v25, %v1086_v60  ;;  %v1821_v61 = vmax.f32 %v1819_v57, %v1820_v2  ;;  %v1093_v13 = vmax.f32 %v1091_v22, %v1092_v39 }
  0xee   : > { %v1393_v51 = vsel %vm1037_vm1, %v3996_v6, 0.0  ;;  %v1827_v5 = vrot.slane %v1826_v10, 4  ;;  %v2260_v23 = vadd.f32 %v2259_v11, %v2258_v63  ;;  %v2266_v3 = vrot.slane %v2265_v32, 2  ;;  %v594_v63 = vpop.f32.mrf.mxu1 }
  0xef   : > { %v3205_v14 = vsel %vm1037_vm1, %v1648_v1, %v3189_v0  ;;  %v1390_v36 = vadd.f32 %v1389_v54, %v1388_v28  ;;  %v1306_v16 = vmul.f32 1.442695, %v5018_v44  ;;  %v1822_v43 = vrot.slane %v1821_v61, 2 }
  0xf0   : > { %v3237_v34 = vsub.f32 %v3141_v48, %v3205_v14  ;;  %v1394_v50 = vrot.slane %v1393_v51, 4  ;;  %v5025_v38 = vsub.f32 %v4954_v49, %v1093_v13  ;;  %v1828_v25 = vmax.f32 %v1826_v10, %v1827_v5 }
  0xf1   : > { %3997 = vpow2.f32 %v1306_v16  ;;  %v2261_v57 = vrot.slane %v2260_v23, 1  ;;  %v2267_v24 = vadd.f32 %v2266_v3, %v2265_v32  ;;  %v5029_v12 = vadd.f32 %v574_v15, %v4745_v31 }
  0xf2   : > { %v5021_v18 = vmul.f32 %v3237_v34, %v2981_v17  ;;  %v1308_v22 = vmul.f32 1.442695, %v5025_v38  ;;  %v1391_v40 = vrot.slane %v1390_v36, 1  ;;  %v1823_v55 = vmax.f32 %v1821_v61, %v1822_v43 }
  0xf3   : > { %v1829_v52 = vrot.slane %v1828_v25, 2  ;;  %v1395_v28 = vadd.f32 %v1394_v50, %v1393_v51  ;;  %v1094_v49 = vsel %vm1037_vm1, %v5029_v12, -inf  ;;  %v5034_v48 = vadd.f32 %v594_v63, %v4745_v31 }
  0xf4   : > { %6804 = vst [vmem:[#allocation36_spill] sm:$0xff] %v5021_v18  ;;  %3999 = vpow2.f32 %v1308_v22  ;;  %v5036_v60 = vadd.f32 %v2261_v57, %v2260_v23  ;;  %v2268_v39 = vrot.slane %v2267_v24, 1  ;;  %v1095_v1 = vrot.slane %v1094_v49, 4 }
  0xf5   : > { %v1830_v2 = vmax.f32 %v1828_v25, %v1829_v52  ;;  %v1392_v6 = vadd.f32 %v1391_v40, %v1390_v36  ;;  %v1824_v17 = vrot.slane %v1823_v55, 1  ;;  %v1101_v32 = vsel %vm1037_vm1, %v5034_v48, -inf }
  0xf6   : > { %v1396_v10 = vrot.slane %v1395_v28, 2  ;;  %v1096_v54 = vmax.f32 %v1094_v49, %v1095_v1  ;;  %v5041_v51 = vadd.f32 %v2268_v39, %v2267_v24  ;;  %4001 = vrcp.f32 %v5036_v60 }
  0xf7   : > { %v3998_v0 = vpop.eup %3997  ;;  %v1831_v11 = vrot.slane %v1830_v2, 1  ;;  %v1102_v23 = vrot.slane %v1101_v32, 4  ;;  %4003 = vlog2.f32 %v1392_v6  ;;  %v1825_v16 = vmax.f32 %v1823_v55, %v1824_v17 }
  0xf8   : > { %v1400_v14 = vsel %vm1037_vm1, %v3998_v0, 0.0  ;;  %6805 = vst [vmem:[#allocation37_spill] sm:$0xff] %v5041_v51  ;;  %v1097_v5 = vrot.slane %v1096_v54, 2  ;;  %v5045_v43 = vadd.f32 %v1396_v10, %v1395_v28  ;;  %v1833_v25 = vsel %vm1037_vm1, %v4670_v20, -inf }
  0xf9   : > { %v1401_v61 = vrot.slane %v1400_v14, 4  ;;  %v1832_v34 = vmax.f32 %v1830_v2, %v1831_v11  ;;  %v2519_v57 = vand.u32 2147483648, %v5036_v60  ;;  %4005 = vrcp.f32 %v5041_v51 }
  0xfa   : > { %v4000_v13 = vpop.eup %3999  ;;  %v1098_v63 = vmax.f32 %v1096_v54, %v1097_v5  ;;  %v2533_v40 = vand.u32 2147483648, %v5041_v51  ;;  %v1103_v2 = vmax.f32 %v1101_v32, %v1102_v23  ;;  %v1834_v39 = vrot.slane %v1833_v25, 4  ;;  %v614_v5 = vpop.f32.mrf.mxu2 }
  0xfb   : > { %v1402_v3 = vadd.f32 %v1401_v61, %v1400_v14  ;;  %v1407_v36 = vsel %vm1037_vm1, %v4000_v13, 0.0  ;;  %v2036_v22 = vrot.slane %v1832_v34, 4  ;;  %v1398_v20 = vrot.slane %v5045_v43, 1 }
  0xfc   : > { %v1408_v50 = vrot.slane %v1407_v36, 4  ;;  %v1099_v49 = vrot.slane %v1098_v63, 1  ;;  %v5054_v1 = vpop.eup %4001  ;;  %v5061_v10 = vor.u32 1.1754944e-38, %v2519_v57  ;;  %4007 = vlog2.f32 %v5036_v60 }
  0xfd   : > { %v1403_v24 = vrot.slane %v1402_v3, 2  ;;  %v2052_v28 = vsel %vm1037_vm1, %v1825_v16, %v2036_v22  ;;  %v4004_v11 = vpop.eup %4003  ;;  %v1104_v34 = vrot.slane %v1103_v2, 2  ;;  %v1835_v13 = vmax.f32 %v1833_v25, %v1834_v39  ;;  %v634_v16 = vpop.f32.mrf.mxu3 }
  0xfe   : > { %v1409_v52 = vadd.f32 %v1408_v50, %v1407_v36  ;;  %v5059_v17 = vsub.f32 %v4743_v30, %v2052_v28  ;;  %6806 = vst [vmem:[#allocation38_spill] sm:$0xff] %v5061_v10  ;;  %v1100_v14 = vmax.f32 %v1098_v63, %v1099_v49  ;;  %v5065_v23 = vor.u32 1.1754944e-38, %v2533_v40  ;;  %v5083_v49 = vld.sshfl [vmem:[#allocation1 + $0x30] sm:$0xff pattern:$0x75316420] }
  0xff   : > { %v1404_v55 = vadd.f32 %v1403_v24, %v1402_v3  ;;  %v1840_v30 = vsel %vm1037_vm1, %v4672_v21, -inf  ;;  %v5072_v50 = vpop.eup %4005  ;;  %v1105_v24 = vmax.f32 %v1103_v2, %v1104_v34  ;;  %v1836_v22 = vrot.slane %v1835_v13, 2  ;;  %6808 = vst [vmem:[#allocation40_spill] sm:$0xff] %v5083_v49 }
 0x100   : > { %v1410_v6 = vrot.slane %v1409_v52, 2  ;;  %v2103_v61 = vmul.f32 1.442695, %v5059_v17  ;;  %6807 = vst [vmem:[#allocation39_spill] sm:$0xff] %v5065_v23  ;;  %v5068_v36 = vsub.f32 %v5029_v12, %v1100_v14  ;;  %v1841_v63 = vrot.slane %v1840_v30, 4 }
 0x101   : > { %v1405_v32 = vrot.slane %v1404_v55, 1  ;;  %v5076_v40 = vadd.f32 %v614_v5, %v4745_v31  ;;  %v1106_v12 = vrot.slane %v1105_v24, 1  ;;  %v5079_v28 = vadd.f32 %v634_v16, %v4745_v31  ;;  %v5093_v14 = vld.sshfl [vmem:[#allocation1 + $0x38] sm:$0xff pattern:$0x75316420] }
 0x102   : > { %v1411_v54 = vadd.f32 %v1410_v6, %v1409_v52  ;;  %4009 = vpow2.f32 %v2103_v61  ;;  %v1310_v25 = vmul.f32 1.442695, %v5068_v36  ;;  %v5081_v21 = vpop.eup %4007  ;;  %v1842_v2 = vmax.f32 %v1840_v30, %v1841_v63  ;;  %6809 = vst [vmem:[#allocation41_spill] sm:$0xff] %v5093_v14 }
 0x103   : > { %v1406_v3 = vadd.f32 %v1405_v32, %v1404_v55  ;;  %v1837_v55 = vmax.f32 %v1835_v13, %v1836_v22  ;;  %v1108_v39 = vsel %vm1037_vm1, %v5076_v40, -inf  ;;  %v1847_v6 = vsel %vm1037_vm1, %v4700_v46, -inf }
 0x104   : > { %v1412_v57 = vrot.slane %v1411_v54, 1  ;;  %v5091_v32 = vmul.f32 %v5054_v1, %v5036_v60  ;;  %v1109_v61 = vrot.slane %v1108_v39, 4  ;;  %v1843_v34 = vrot.slane %v1842_v2, 2 }
 0x105   : > { %4011 = vlog2.f32 %v1406_v3  ;;  %v1115_v13 = vsel %vm1037_vm1, %v5079_v28, -inf  ;;  %v1848_v5 = vrot.slane %v1847_v6, 4  ;;  %v1854_v3 = vsel %vm1037_vm1, %v4702_v47, -inf }
 0x106   : > { %v1413_v52 = vadd.f32 %v1412_v57, %v1411_v54  ;;  %4013 = vpow2.f32 %v1310_v25  ;;  %v1107_v54 = vmax.f32 %v1105_v24, %v1106_v12  ;;  %v1110_v16 = vmax.f32 %v1108_v39, %v1109_v61 }
 0x107   : > { %v1116_v57 = vrot.slane %v1115_v13, 4  ;;  %v1399_v24 = vadd.f32 %v1398_v20, %v5045_v43  ;;  %v1838_v25 = vrot.slane %v1837_v55, 1  ;;  %v1844_v63 = vmax.f32 %v1842_v2, %v1843_v34 }
 0x108   : > { %4015 = vlog2.f32 %v1413_v52  ;;  %v5099_v30 = vpop.eup %4009  ;;  %v5103_v46 = vsub.f32 %v5034_v48, %v1107_v54  ;;  %v1855_v52 = vrot.slane %v1854_v3, 4  ;;  %v1111_v47 = vrot.slane %v1110_v16, 2 }
 0x109   : > { %4017 = vlog2.f32 %v5041_v51  ;;  %2151 = vst [vmem:[#allocation1 + $0x30] ss:$2 sm:$0xff] %v5099_v30  ;;  %v1117_v0 = vmax.f32 %v1115_v13, %v1116_v57  ;;  %v1849_v15 = vmax.f32 %v1847_v6, %v1848_v5  ;;  %v5108_v18 = vmul.f32 0.6931472, %v4004_v11 }
 0x10a   : > { %v1312_v12 = vmul.f32 1.442695, %v5103_v46  ;;  %v1845_v39 = vrot.slane %v1844_v63, 1  ;;  %v1856_v54 = vmax.f32 %v1854_v3, %v1855_v52  ;;  %v1112_v20 = vmax.f32 %v1110_v16, %v1111_v47 }
 0x10b   : > { %v4012_v22 = vpop.eup %4011  ;;  %6810 = vst [vmem:[#allocation42_spill] sm:$0xff] %v5108_v18  ;;  %v5114_v2 = vsel %vm1037_vm1, %v4747_v33, -inf  ;;  %v1118_v6 = vrot.slane %v1117_v0, 2  ;;  %v1839_v57 = vmax.f32 %v1837_v55, %v1838_v25  ;;  %v1850_v3 = vrot.slane %v1849_v15, 2 }
 0x10c   : > { %v4014_v14 = vpop.eup %4013  ;;  %4019 = vpow2.f32 %v1312_v12  ;;  %v1846_v13 = vmax.f32 %v1844_v63, %v1845_v39  ;;  %v5118_v11 = vmul.f32 0.6931472, %v4012_v22  ;;  %v1113_v48 = vrot.slane %v1112_v20, 1 }
 0x10d   : > { %v1414_v43 = vsel %vm1037_vm1, %v4014_v14, 0.0  ;;  %v1857_v14 = vrot.slane %v1856_v54, 2  ;;  %4021 = vlog2.f32 %v1399_v24  ;;  %v5123_v33 = vmul.f32 %v5072_v50, %v5041_v51 }
 0x10e   : > { %v4016_v61 = vpop.eup %4015  ;;  %v1415_v49 = vrot.slane %v1414_v43, 4  ;;  %v2037_v4 = vrot.slane %v1846_v13, 4  ;;  %v1114_v39 = vmax.f32 %v1112_v20, %v1113_v48 }
 0x10f   : > { %v1597_v34 = vmul.f32 0.6931472, %v4016_v61  ;;  %v5116_v5 = vpop.eup %4017  ;;  %v1858_v48 = vmax.f32 %v1856_v54, %v1857_v14 }
 0x110   : > { %v1416_v52 = vadd.f32 %v1415_v49, %v1414_v43  ;;  %v2158_v12 = vld.sshfl [vmem:[#allocation1 + $0x30] sm:$0xff pattern:$0x75316420]  ;;  %v2159_v47 = vld.sshfl [vmem:[#allocation1 + $0x38] sm:$0xff pattern:$0x75316420]  ;;  %v1119_v49 = vmax.f32 %v1117_v0, %v1118_v6  ;;  %v2053_v24 = vsel %vm1037_vm1, %v1839_v57, %v2037_v4  ;;  %v5130_v16 = vsub.f32 %v5076_v40, %v1114_v39 }
 0x111   : > { %v1653_v63 = vsub.f32 %v5025_v38, %v1597_v34  ;;  %v2270_v22 = vsel %vm1037_vm1, %v2158_v12, 0.0  ;;  %v2277_v55 = vsel %vm1037_vm1, %v2159_v47, 0.0  ;;  %v5134_v34 = vsub.f32 %v4662_v8, %v2053_v24 }
 0x112   : > { %v1417_v25 = vrot.slane %v1416_v52, 2  ;;  %v4020_v61 = vpop.eup %4019  ;;  %v2271_v43 = vrot.slane %v2270_v22, 4  ;;  %v2278_v13 = vrot.slane %v2277_v55, 4  ;;  %v1314_v0 = vmul.f32 1.442695, %v5130_v16 }
 0x113   : > { %v1421_v38 = vsel %vm1037_vm1, %v4020_v61, 0.0  ;;  %v2105_v53 = vmul.f32 1.442695, %v5134_v34  ;;  %v1120_v45 = vrot.slane %v1119_v49, 1  ;;  %v1851_v4 = vmax.f32 %v1849_v15, %v1850_v3  ;;  %v5138_v57 = vpop.eup %4021 }
 0x114   : > { %v1418_v37 = vadd.f32 %v1417_v25, %v1416_v52  ;;  %v2272_v20 = vadd.f32 %v2271_v43, %v2270_v22  ;;  %v2279_v12 = vadd.f32 %v2278_v13, %v2277_v55  ;;  %v1422_v47 = vrot.slane %v1421_v38, 4  ;;  %6811 = vst [vmem:[#allocation43_spill] sm:$0xff] %v5138_v57  ;;  %v654_v25 = vpop.f32.mrf.mxu0  ;;  %v674_v13 = vpop.f32.mrf.mxu1 }
 0x115   : > { %4023 = vpow2.f32 %v1314_v0  ;;  %v3191_v8 = vrot.slane %v1653_v63, 4  ;;  %v1121_v54 = vmax.f32 %v1119_v49, %v1120_v45  ;;  %v1859_v43 = vrot.slane %v1858_v48, 1 }
 0x116   : > { %v1419_v6 = vrot.slane %v1418_v37, 1  ;;  %v2273_v40 = vrot.slane %v2272_v20, 2  ;;  %v2280_v52 = vrot.slane %v2279_v12, 2  ;;  %v1423_v39 = vadd.f32 %v1422_v47, %v1421_v38 }
 0x117   : > { %4025 = vpow2.f32 %v2105_v53  ;;  %v5141_v24 = vsub.f32 %v5079_v28, %v1121_v54  ;;  %v1852_v15 = vrot.slane %v1851_v4, 1  ;;  %v5144_v3 = vadd.f32 %v654_v25, %v4745_v31 }
 0x118   : > { %v1420_v61 = vadd.f32 %v1419_v6, %v1418_v37  ;;  %v2274_v14 = vadd.f32 %v2273_v40, %v2272_v20  ;;  %v2281_v22 = vadd.f32 %v2280_v52, %v2279_v12  ;;  %v1424_v55 = vrot.slane %v1423_v39, 2 }
 0x119   : > { %v1860_v63 = vmax.f32 %v1858_v48, %v1859_v43  ;;  %v1652_v53 = vsub.f32 %v5018_v44, %v5118_v11  ;;  %v1316_v37 = vmul.f32 1.442695, %v5141_v24  ;;  %v5152_v49 = vadd.f32 %v674_v13, %v4745_v31 }
 0x11a   : > { %4027 = vlog2.f32 %v1420_v61  ;;  %v2275_v38 = vrot.slane %v2274_v14, 1  ;;  %v2282_v47 = vrot.slane %v2281_v22, 1  ;;  %v1425_v0 = vadd.f32 %v1424_v55, %v1423_v39 }
 0x11b   : > { %v4024_v28 = vpop.eup %4023  ;;  %v6812_v20 = vsub.f32 1.0, %v5091_v32  ;;  %v5167_v44 = vsel %vm1037_vm1, %v1652_v53, %v3191_v8  ;;  %4029 = vpow2.f32 %v1316_v37  ;;  %v6813_v39 = vrot.slane %v5114_v2, 4 }
 0x11c   : > { %v5160_v48 = vadd.f32 %v2275_v38, %v2274_v14  ;;  %v5162_v40 = vadd.f32 %v2282_v47, %v2281_v22  ;;  %v1426_v11 = vrot.slane %v1425_v0, 1  ;;  %v1853_v25 = vmax.f32 %v1851_v4, %v1852_v15 }
 0x11d   : > { %v5157_v12 = vmul.f32 %v5054_v1, %v6812_v20  ;;  %v5164_v52 = vpop.eup %4025  ;;  %v5172_v32 = vmax.f32 %v5114_v2, %v6813_v39  ;;  %v2038_v61 = vrot.slane %v1860_v63, 4  ;;  %v1122_v54 = vsel %vm1037_vm1, %v5144_v3, -inf }
 0x11e   : > { %4031 = vrcp.f32 %v5160_v48  ;;  %2160 = vst [vmem:[#allocation1] ss:$2 sm:$0xff] %v5164_v52  ;;  %v2547_v8 = vand.u32 2147483648, %v5160_v48  ;;  %v1428_v22 = vsel %vm1037_vm1, %v4024_v28, 0.0  ;;  %v1129_v2 = vsel %vm1037_vm1, %v5152_v49, -inf }
 0x11f   : > { %4033 = vrcp.f32 %v5162_v40  ;;  %v2545_v55 = vand.u32 2147483647, %v5160_v48  ;;  %v2559_v43 = vand.u32 2147483647, %v5162_v40  ;;  %v2561_v4 = vand.u32 2147483648, %v5162_v40 }
 0x120   : > { %v4028_v14 = vpop.eup %4027  ;;  %4035 = vlog2.f32 %v5160_v48  ;;  %v1427_v13 = vadd.f32 %v1426_v11, %v1425_v0  ;;  %v1123_v15 = vrot.slane %v1122_v54, 4  ;;  %vm2541_vm3 = vweird.f32 %v5160_v48 }
 0x121   : > { %4037 = vlog2.f32 %v5162_v40  ;;  %v1429_v47 = vrot.slane %v1428_v22, 4  ;;  %v2054_v63 = vsel %vm1037_vm1, %v1853_v25, %v2038_v61  ;;  %v1130_v53 = vrot.slane %v1129_v2, 4  ;;  %v4030_v37 = vpop.eup %4029 }
 0x122   : > { %v2548_v28 = vor.u32 1.1754944e-38, %v2547_v8  ;;  %vm2555_vm4 = vweird.f32 %v5162_v40  ;;  %v5192_v20 = vmul.f32 0.6931472, %v4028_v14  ;;  %4039 = vlog2.f32 %v1427_v13 }
 0x123   : > { %vm5194_vm5 = vcmp.eq.f32.partialorder %v2545_v55, 8.507059e+37  ;;  %vm5198_vm6 = vcmp.eq.f32.partialorder %v2559_v43, 8.507059e+37  ;;  %v2562_v11 = vor.u32 1.1754944e-38, %v2561_v4  ;;  %v1430_v6 = vadd.f32 %v1429_v47, %v1428_v22 }
 0x124   : > { %v4032_v39 = vpop.eup %4031  ;;  %v1435_v25 = vsel %vm1037_vm1, %v4030_v37, 0.0  ;;  %v5205_v13 = vsub.f32 %v4676_v27, %v2054_v63  ;;  %v1124_v55 = vmax.f32 %v1122_v54, %v1123_v15  ;;  %v1131_v51 = vmax.f32 %v1129_v2, %v1130_v53 }
 0x125   : > { %v4034_v61 = vpop.eup %4033  ;;  %v2537_v8 = vmul.f32 %v4032_v39, %v5160_v48  ;;  %vm2542_vm7 = vweird.f32 %v4032_v39  ;;  %v2164_v14 = vld.sshfl [vmem:[#allocation1] sm:$0xff pattern:$0x75316420]  ;;  %v2165_v38 = vld.sshfl [vmem:[#allocation1 + $0x8] sm:$0xff pattern:$0x75316420] }
 0x126   : > { %v4036_v18 = vpop.eup %4035  ;;  %v2551_v43 = vmul.f32 %v4034_v61, %v5162_v40  ;;  %vm2556_vm8 = vweird.f32 %v4034_v61  ;;  %v2284_v56 = vsel %vm1037_vm1, %v2164_v14, 0.0  ;;  %v2291_v22 = vsel %vm1037_vm1, %v2165_v38, 0.0  ;;  %vm5213_vm9 = vmor %vm2541_vm3, %vm2542_vm7 }
 0x127   : > { %v4038_v4 = vpop.eup %4037  ;;  %v2538_v47 = vsub.f32 1.0, %v2537_v8  ;;  %v3009_v37 = vmul.f32 0.6931472, %v4036_v18  ;;  %v2285_v23 = vrot.slane %v2284_v56, 4  ;;  %v2292_v9 = vrot.slane %v2291_v22, 4  ;;  %vm5220_vm10 = vmor %vm2555_vm4, %vm2556_vm8 }
 0x128   : > { %v2552_v59 = vsub.f32 1.0, %v2551_v43  ;;  %v3011_v10 = vmul.f32 0.6931472, %v4038_v4  ;;  %v1431_v57 = vrot.slane %v1430_v6, 2  ;;  %v1436_v19 = vrot.slane %v1435_v25, 4  ;;  %v4040_v27 = vpop.eup %4039 }
 0x129   : > { %v2539_v63 = vmul.f32 %v4032_v39, %v2538_v47  ;;  %v2286_v54 = vadd.f32 %v2285_v23, %v2284_v56  ;;  %v2293_v15 = vadd.f32 %v2292_v9, %v2291_v22  ;;  %v1601_v8 = vmul.f32 0.6931472, %v4040_v27 }
 0x12a   : > { %v2553_v38 = vmul.f32 %v4034_v61, %v2552_v59  ;;  %v3095_v18 = vrot.slane %v3011_v10, 4  ;;  %v1432_v58 = vadd.f32 %v1431_v57, %v1430_v6  ;;  %v2107_v23 = vmul.f32 1.442695, %v5205_v13 }
 0x12b   : > { %v2540_v43 = vadd.f32 %v4032_v39, %v2539_v63  ;;  %v2287_v9 = vrot.slane %v2286_v54, 2  ;;  %v2294_v56 = vrot.slane %v2293_v15, 2  ;;  %v1437_v59 = vadd.f32 %v1436_v19, %v1435_v25 }
 0x12c   : > { %v2554_v48 = vadd.f32 %v4034_v61, %v2553_v38  ;;  %v3111_v2 = vsel %vm1037_vm1, %v3009_v37, %v3095_v18  ;;  %v1433_v53 = vrot.slane %v1432_v58, 1  ;;  %v1655_v47 = vsub.f32 %v5103_v46, %v1601_v8 }
 0x12d   : > { %v2544_v10 = vsel %vm5213_vm9, %v4032_v39, %v2540_v43  ;;  %v3143_v57 = vsub.f32 %v5059_v17, %v3111_v2  ;;  %v2288_v6 = vadd.f32 %v2287_v9, %v2286_v54  ;;  %v2295_v40 = vadd.f32 %v2294_v56, %v2293_v15 }
 0x12e   : > { %v2558_v22 = vsel %vm5220_vm10, %v4034_v61, %v2554_v48  ;;  %v1434_v27 = vadd.f32 %v1433_v53, %v1432_v58  ;;  %v1125_v63 = vrot.slane %v1124_v55, 2  ;;  %v2549_v38 = vsel %vm5194_vm5, %v2548_v28, %v2544_v10 }
 0x12f   : > { %v2563_v19 = vsel %vm5198_vm6, %v2562_v11, %v2558_v22  ;;  %v2289_v25 = vrot.slane %v2288_v6, 1  ;;  %v2296_v37 = vrot.slane %v2295_v40, 1  ;;  %v1654_v17 = vsub.f32 %v5068_v36, %v5192_v20 }
 0x130   : > { %v2935_v39 = vrot.slane %v2563_v19, 4  ;;  %4041 = vlog2.f32 %v1434_v27  ;;  %v1438_v54 = vrot.slane %v1437_v59, 2  ;;  %v3239_v61 = vsub.f32 %v3143_v57, %v5167_v44 }
 0x131   : > { %v5239_v15 = vadd.f32 %v2289_v25, %v2288_v6  ;;  %v5241_v58 = vadd.f32 %v2296_v37, %v2295_v40  ;;  %4043 = vpow2.f32 %v2107_v23  ;;  %v3192_v45 = vrot.slane %v1655_v47, 4 }
 0x132   : > { %v2951_v46 = vsel %vm1037_vm1, %v2549_v38, %v2935_v39  ;;  %v1439_v28 = vadd.f32 %v1438_v54, %v1437_v59  ;;  %v6822_v0 = vrot.slane %v5172_v32, 2  ;;  %v1126_v20 = vmax.f32 %v1124_v55, %v1125_v63 }
 0x133   : > { %v2983_v36 = vmul.f32 %v5099_v30, %v2951_v46  ;;  %4045 = vrcp.f32 %v5239_v15  ;;  %v1132_v44 = vrot.slane %v1131_v51, 2  ;;  %v2573_v14 = vand.u32 2147483647, %v5239_v15  ;;  %v694_v30 = vpop.f32.mrf.mxu2 }
 0x134   : > { %v5247_v11 = vmax.f32 %v5172_v32, %v6822_v0  ;;  %v2575_v18 = vand.u32 2147483648, %v5239_v15  ;;  %4047 = vrcp.f32 %v5241_v58  ;;  %v1868_v8 = vsel %vm1037_vm1, %v4749_v35, -inf }
 0x135   : > { %v5256_v43 = vmul.f32 %v3239_v61, %v2983_v36  ;;  %v2587_v32 = vand.u32 2147483647, %v5241_v58  ;;  %v2589_v4 = vand.u32 2147483648, %v5241_v58  ;;  %4049 = vlog2.f32 %v5239_v15  ;;  %v714_v61 = vpop.f32.mrf.mxu3 }
 0x136   : > { %v4042_v55 = vpop.eup %4041  ;;  %4051 = vlog2.f32 %v5241_v58  ;;  %v5263_v9 = vsel %vm1037_vm1, %v1654_v17, %v3192_v45  ;;  %v1440_v56 = vrot.slane %v1439_v28, 1  ;;  %v1866_v23 = vrot.slane %v5247_v11, 1 }
 0x137   : > { %v5266_v48 = vpop.eup %4043  ;;  %vm2569_vm11 = vweird.f32 %v5239_v15  ;;  %vm2583_vm12 = vweird.f32 %v5241_v58  ;;  %v1127_v35 = vrot.slane %v1126_v20, 1  ;;  %v1133_v2 = vmax.f32 %v1131_v51, %v1132_v44 }
 0x138   : > { %v2576_v53 = vor.u32 1.1754944e-38, %v2575_v18  ;;  %v1441_v59 = vadd.f32 %v1440_v56, %v1439_v28  ;;  %2161 = vst [vmem:[#allocation1 + $0x10] ss:$2 sm:$0xff] %v5266_v48  ;;  %v1869_v10 = vrot.slane %v1868_v8, 4  ;;  %v5272_v57 = vadd.f32 %v694_v30, %v4745_v31 }
 0x139   : > { %v4046_v6 = vpop.eup %4045  ;;  %vm5274_vm13 = vcmp.eq.f32.partialorder %v2573_v14, 8.507059e+37  ;;  %vm5278_vm14 = vcmp.eq.f32.partialorder %v2587_v32, 8.507059e+37  ;;  %v2590_v47 = vor.u32 1.1754944e-38, %v2589_v4  ;;  %v5282_v27 = vmul.f32 0.6931472, %v4042_v55 }
 0x13a   : > { %v1128_v51 = vmax.f32 %v1126_v20, %v1127_v35  ;;  %v1134_v63 = vrot.slane %v1133_v2, 1  ;;  %v4048_v38 = vpop.eup %4047  ;;  %v2565_v19 = vmul.f32 %v4046_v6, %v5239_v15  ;;  %vm2570_vm15 = vweird.f32 %v4046_v6 }
 0x13b   : > { %4053 = vlog2.f32 %v1441_v59  ;;  %v1870_v25 = vmax.f32 %v1868_v8, %v1869_v10  ;;  %v4050_v37 = vpop.eup %4049  ;;  %v2579_v39 = vmul.f32 %v4048_v38, %v5241_v58  ;;  %vm2584_vm0 = vweird.f32 %v4048_v38  ;;  %vm5301_vm2 = vmor %vm2569_vm11, %vm2570_vm15 }
 0x13c   : > { %v5287_v17 = vsub.f32 %v5144_v3, %v1128_v51  ;;  %v1135_v54 = vmax.f32 %v1133_v2, %v1134_v63  ;;  %v4052_v46 = vpop.eup %4051  ;;  %v2566_v45 = vsub.f32 1.0, %v2565_v19  ;;  %v3013_v28 = vmul.f32 0.6931472, %v4050_v37  ;;  %vm5309_vm3 = vmor %vm2583_vm12, %vm2584_vm0 }
 0x13d   : > { %v1871_v0 = vrot.slane %v1870_v25, 2  ;;  %v1136_v36 = vsel %vm1037_vm1, %v5272_v57, -inf  ;;  %v2580_v20 = vsub.f32 1.0, %v2579_v39  ;;  %v3015_v44 = vmul.f32 0.6931472, %v4052_v46 }
 0x13e   : > { %v1318_v14 = vmul.f32 1.442695, %v5287_v17  ;;  %v5293_v18 = vsub.f32 %v5152_v49, %v1135_v54  ;;  %v2567_v8 = vmul.f32 %v4046_v6, %v2566_v45  ;;  %v1137_v3 = vrot.slane %v1136_v36, 4 }
 0x13f   : > { %v1872_v32 = vmax.f32 %v1870_v25, %v1871_v0  ;;  %v5296_v4 = vadd.f32 %v714_v61, %v4745_v31  ;;  %v2581_v55 = vmul.f32 %v4048_v38, %v2580_v20  ;;  %v3096_v56 = vrot.slane %v3015_v44, 4  ;;  %v2166_v35 = vld.sshfl [vmem:[#allocation1 + $0x10] sm:$0xff pattern:$0x75316420] }
 0x140   : > { %4055 = vpow2.f32 %v1318_v14  ;;  %v1320_v49 = vmul.f32 1.442695, %v5293_v18  ;;  %v2568_v59 = vadd.f32 %v4046_v6, %v2567_v8  ;;  %v2167_v15 = vld.sshfl [vmem:[#allocation1 + $0x18] sm:$0xff pattern:$0x75316420]  ;;  %v2298_v51 = vsel %vm1037_vm1, %v2166_v35, 0.0 }
 0x141   : > { %v4054_v2 = vpop.eup %4053  ;;  %v1873_v63 = vrot.slane %v1872_v32, 1  ;;  %v1138_v19 = vmax.f32 %v1136_v36, %v1137_v3  ;;  %v2582_v25 = vadd.f32 %v4048_v38, %v2581_v55  ;;  %v3112_v37 = vsel %vm1037_vm1, %v3013_v28, %v3096_v56 }
 0x142   : > { %v1605_v39 = vmul.f32 0.6931472, %v4054_v2  ;;  %v2299_v54 = vrot.slane %v2298_v51, 4  ;;  %v2572_v61 = vsel %vm5301_vm2, %v4046_v6, %v2568_v59  ;;  %v3144_v46 = vsub.f32 %v5134_v34, %v3112_v37 }
 0x143   : > { %v2305_v58 = vsel %vm1037_vm1, %v2167_v15, 0.0  ;;  %4057 = vpow2.f32 %v1320_v49  ;;  %v2586_v45 = vsel %vm5309_vm3, %v4048_v38, %v2582_v25  ;;  %v1867_v36 = vmax.f32 %v5247_v11, %v1866_v23 }
 0x144   : > { %v2300_v0 = vadd.f32 %v2299_v54, %v2298_v51  ;;  %v1143_v28 = vsel %vm1037_vm1, %v5296_v4, -inf  ;;  %v2577_v20 = vsel %vm5274_vm13, %v2576_v53, %v2572_v61  ;;  %v2591_v34 = vsel %vm5278_vm14, %v2590_v47, %v2586_v45 }
 0x145   : > { %v2306_v6 = vrot.slane %v2305_v58, 4  ;;  %v1874_v44 = vmax.f32 %v1872_v32, %v1873_v63  ;;  %v2936_v8 = vrot.slane %v2591_v34, 4  ;;  %v1657_v38 = vsub.f32 %v5141_v24, %v1605_v39 }
 0x146   : > { %v4056_v14 = vpop.eup %4055  ;;  %v2301_v3 = vrot.slane %v2300_v0, 2  ;;  %v1139_v30 = vrot.slane %v1138_v19, 2  ;;  %v3240_v55 = vsub.f32 %v3144_v46, %v5263_v9  ;;  %v1144_v22 = vrot.slane %v1143_v28, 4 }
 0x147   : > { %v2307_v11 = vadd.f32 %v2306_v6, %v2305_v58  ;;  %v1442_v23 = vsel %vm1037_vm1, %v4056_v14, 0.0  ;;  %v2039_v56 = vrot.slane %v1874_v44, 4  ;;  %v2952_v40 = vsel %vm1037_vm1, %v2577_v20, %v2936_v8 }
 0x148   : > { %v2302_v53 = vadd.f32 %v2301_v3, %v2300_v0  ;;  %v1443_v35 = vrot.slane %v1442_v23, 4  ;;  %v2984_v32 = vmul.f32 %v5164_v52, %v2952_v40  ;;  %v1140_v24 = vmax.f32 %v1138_v19, %v1139_v30 }
 0x149   : > { %v4058_v47 = vpop.eup %4057  ;;  %v2308_v49 = vrot.slane %v2307_v11, 2  ;;  %v2055_v2 = vsel %vm1037_vm1, %v1867_v36, %v2039_v56  ;;  %v5343_v39 = vmul.f32 0.6931472, %v5081_v21  ;;  %v3193_v46 = vrot.slane %v1657_v38, 4 }
 0x14a   : > { %v2303_v59 = vrot.slane %v2302_v53, 1  ;;  %v1444_v10 = vadd.f32 %v1443_v35, %v1442_v23  ;;  %v1449_v9 = vsel %vm1037_vm1, %v4058_v47, 0.0  ;;  %v5338_v15 = vsub.f32 %v4724_v62, %v2055_v2  ;;  %v734_v47 = vpop.f32.mrf.mxu0 }
 0x14b   : > { %v5340_v51 = vmul.f32 %v3240_v55, %v2984_v32  ;;  %v2309_v63 = vadd.f32 %v2308_v49, %v2307_v11  ;;  %v1450_v25 = vrot.slane %v1449_v9, 4  ;;  %v1141_v37 = vrot.slane %v1140_v24, 1 }
 0x14c   : > { %v5345_v52 = vadd.f32 %v2303_v59, %v2302_v53  ;;  %v1445_v54 = vrot.slane %v1444_v10, 2  ;;  %v2109_v19 = vmul.f32 1.442695, %v5338_v15  ;;  %v1656_v62 = vsub.f32 %v5130_v16, %v5282_v27 }
 0x14d   : > { %v2310_v61 = vrot.slane %v2309_v63, 1  ;;  %v1451_v58 = vadd.f32 %v1450_v25, %v1449_v9  ;;  %v1142_v45 = vmax.f32 %v1140_v24, %v1141_v37  ;;  %v1145_v36 = vmax.f32 %v1143_v28, %v1144_v22 }
 0x14e   : > { %4059 = vrcp.f32 %v5345_v52  ;;  %v2603_v0 = vand.u32 2147483648, %v5345_v52  ;;  %v1446_v21 = vadd.f32 %v1445_v54, %v1444_v10  ;;  %v5356_v6 = vmul.f32 0.6931472, %v5116_v5 }
 0x14f   : > { %v5352_v20 = vadd.f32 %v2310_v61, %v2309_v63  ;;  %4061 = vlog2.f32 %v5345_v52  ;;  %v1452_v34 = vrot.slane %v1451_v58, 2  ;;  %v5359_v44 = vsub.f32 %v5272_v57, %v1142_v45 }
 0x150   : > { %4063 = vpow2.f32 %v2109_v19  ;;  %v1875_v16 = vsel %vm1037_vm1, %v4829_v7, -inf  ;;  %vm2597_vm4 = vweird.f32 %v5345_v52  ;;  %v2601_v27 = vand.u32 2147483647, %v5345_v52 }
 0x151   : > { %4065 = vrcp.f32 %v5352_v20  ;;  %v5367_v28 = vsel %vm1037_vm1, %v1656_v62, %v3193_v46  ;;  %v1447_v5 = vrot.slane %v1446_v21, 1  ;;  %v1453_v14 = vadd.f32 %v1452_v34, %v1451_v58 }
 0x152   : > { %4067 = vlog2.f32 %v5352_v20  ;;  %v1322_v8 = vmul.f32 1.442695, %v5359_v44  ;;  %v5371_v57 = vor.u32 1.1754944e-38, %v2603_v0  ;;  %v2615_v38 = vand.u32 2147483647, %v5352_v20 }
 0x153   : > { %v1146_v7 = vrot.slane %v1145_v36, 2  ;;  %v1876_v3 = vrot.slane %v1875_v16, 4  ;;  %v1448_v55 = vadd.f32 %v1447_v5, %v1446_v21  ;;  %v1454_v11 = vrot.slane %v1453_v14, 1 }
 0x154   : > { %v5374_v30 = vpop.eup %4059  ;;  %4069 = vpow2.f32 %v1322_v8  ;;  %v1882_v23 = vsel %vm1037_vm1, %v4847_v26, -inf  ;;  %v2617_v53 = vand.u32 2147483648, %v5352_v20  ;;  %vm5384_vm6 = vcmp.eq.f32.partialorder %v2601_v27, 8.507059e+37 }
 0x155   : > { %v4062_v56 = vpop.eup %4061  ;;  %v2593_v40 = vmul.f32 %v5374_v30, %v5345_v52  ;;  %v1147_v35 = vmax.f32 %v1145_v36, %v1146_v7  ;;  %v1877_v22 = vmax.f32 %v1875_v16, %v1876_v3  ;;  %vm2598_vm5 = vweird.f32 %v5374_v30 }
 0x156   : > { %v5381_v32 = vpop.eup %4063  ;;  %v3017_v2 = vmul.f32 0.6931472, %v4062_v56  ;;  %v1455_v24 = vadd.f32 %v1454_v11, %v1453_v14  ;;  %v1883_v26 = vrot.slane %v1882_v23, 4  ;;  %4071 = vlog2.f32 %v1448_v55  ;;  %vm5400_vm9 = vmor %vm2597_vm4, %vm2598_vm5  ;;  %v754_v14 = vpop.f32.mrf.mxu1 }
 0x157   : > { %v4066_v59 = vpop.eup %4065  ;;  %v2594_v10 = vsub.f32 1.0, %v2593_v40  ;;  %2162 = vst [vmem:[#allocation1 + $0x20] ss:$2 sm:$0xff] %v5381_v32  ;;  %v1148_v9 = vrot.slane %v1147_v35, 1  ;;  %v1878_v63 = vrot.slane %v1877_v22, 2  ;;  %v5391_v19 = vadd.f32 %v734_v47, %v4745_v31 }
 0x158   : > { %v4068_v25 = vpop.eup %4067  ;;  %v2607_v37 = vmul.f32 %v4066_v59, %v5352_v20  ;;  %4073 = vlog2.f32 %v1455_v24  ;;  %v1884_v54 = vmax.f32 %v1882_v23, %v1883_v26  ;;  %vm2611_vm7 = vweird.f32 %v5352_v20 }
 0x159   : > { %v2595_v61 = vmul.f32 %v5374_v30, %v2594_v10  ;;  %v3019_v46 = vmul.f32 0.6931472, %v4068_v25  ;;  %v1149_v58 = vmax.f32 %v1147_v35, %v1148_v9  ;;  %v1879_v45 = vmax.f32 %v1877_v22, %v1878_v63 }
 0x15a   : > { %v4070_v62 = vpop.eup %4069  ;;  %v2608_v0 = vsub.f32 1.0, %v2607_v37  ;;  %vm2612_vm8 = vweird.f32 %v4066_v59  ;;  %v1885_v36 = vrot.slane %v1884_v54, 2  ;;  %vm5408_vm10 = vcmp.eq.f32.partialorder %v2615_v38, 8.507059e+37 }
 0x15b   : > { %v2596_v21 = vadd.f32 %v5374_v30, %v2595_v61  ;;  %v3097_v16 = vrot.slane %v3019_v46, 4  ;;  %v1456_v27 = vsel %vm1037_vm1, %v4070_v62, 0.0  ;;  %v5406_v5 = vsub.f32 %v5296_v4, %v1149_v58  ;;  %vm5412_vm11 = vmor %vm2611_vm7, %vm2612_vm8 }
 0x15c   : > { %v2609_v20 = vmul.f32 %v4066_v59, %v2608_v0  ;;  %v2618_v7 = vor.u32 1.1754944e-38, %v2617_v53  ;;  %v1457_v3 = vrot.slane %v1456_v27, 4  ;;  %v4072_v55 = vpop.eup %4071  ;;  %v1880_v56 = vrot.slane %v1879_v45, 1 }
 0x15d   : > { %v3113_v11 = vsel %vm1037_vm1, %v3017_v2, %v3097_v16  ;;  %v1324_v23 = vmul.f32 1.442695, %v5406_v5  ;;  %v1150_v4 = vsel %vm1037_vm1, %v5391_v19, -inf  ;;  %v2600_v38 = vsel %vm5400_vm9, %v5374_v30, %v2596_v21 }
 0x15e   : > { %v4074_v40 = vpop.eup %4073  ;;  %v2610_v53 = vadd.f32 %v4066_v59, %v2609_v20  ;;  %v2168_v35 = vld.sshfl [vmem:[#allocation1 + $0x20] sm:$0xff pattern:$0x75316420]  ;;  %v2169_v22 = vld.sshfl [vmem:[#allocation1 + $0x28] sm:$0xff pattern:$0x75316420]  ;;  %v1458_v47 = vadd.f32 %v1457_v3, %v1456_v27  ;;  %v5424_v24 = vadd.f32 %v754_v14, %v4745_v31  ;;  %v3145_v2 = vsub.f32 %v5205_v13, %v3113_v11 }
 0x15f   : > { %v2312_v26 = vsel %vm1037_vm1, %v2168_v35, 0.0  ;;  %v2319_v10 = vsel %vm1037_vm1, %v2169_v22, 0.0  ;;  %v1886_v9 = vmax.f32 %v1884_v54, %v1885_v36  ;;  %v5431_v25 = vmul.f32 0.6931472, %v4072_v55 }
 0x160   : > { %v2614_v63 = vsel %vm5412_vm11, %v4066_v59, %v2610_v53  ;;  %v2313_v30 = vrot.slane %v2312_v26, 4  ;;  %v2320_v37 = vrot.slane %v2319_v10, 4  ;;  %v2605_v61 = vsel %vm5384_vm6, %v5371_v57, %v2600_v38 }
 0x161   : > { %v2619_v46 = vsel %vm5408_vm10, %v2618_v7, %v2614_v63  ;;  %v1459_v13 = vrot.slane %v1458_v47, 2  ;;  %4075 = vpow2.f32 %v1324_v23  ;;  %v1609_v62 = vmul.f32 0.6931472, %v4074_v40 }
 0x162   : > { %v2937_v58 = vrot.slane %v2619_v46, 4  ;;  %v2314_v0 = vadd.f32 %v2313_v30, %v2312_v26  ;;  %v2321_v54 = vadd.f32 %v2320_v37, %v2319_v10  ;;  %v3241_v36 = vsub.f32 %v3145_v2, %v5367_v28 }
 0x163   : > { %v1460_v59 = vadd.f32 %v1459_v13, %v1458_v47  ;;  %v1887_v21 = vrot.slane %v1886_v9, 1  ;;  %v1151_v34 = vrot.slane %v1150_v4, 4  ;;  %v1157_v57 = vsel %vm1037_vm1, %v5424_v24, -inf }
 0x164   : > { %v2953_v16 = vsel %vm1037_vm1, %v2605_v61, %v2937_v58  ;;  %v2315_v27 = vrot.slane %v2314_v0, 2  ;;  %v2322_v14 = vrot.slane %v2321_v54, 2  ;;  %v1881_v8 = vmax.f32 %v1879_v45, %v1880_v56 }
 0x165   : > { %v2985_v49 = vmul.f32 %v5266_v48, %v2953_v16  ;;  %v1461_v20 = vrot.slane %v1460_v59, 1  ;;  %v1888_v7 = vmax.f32 %v1886_v9, %v1887_v21  ;;  %v1152_v52 = vmax.f32 %v1150_v4, %v1151_v34 }
 0x166   : > { %v2316_v3 = vadd.f32 %v2315_v27, %v2314_v0  ;;  %v2323_v55 = vadd.f32 %v2322_v14, %v2321_v54  ;;  %v1158_v11 = vrot.slane %v1157_v57, 4  ;;  %v1659_v40 = vsub.f32 %v5293_v18, %v1609_v62 }
 0x167   : > { %v4076_v28 = vpop.eup %4075  ;;  %v5443_v23 = vmul.f32 %v3241_v36, %v2985_v49  ;;  %v1462_v38 = vadd.f32 %v1461_v20, %v1460_v59  ;;  %v2040_v53 = vrot.slane %v1888_v7, 4  ;;  %v1153_v2 = vrot.slane %v1152_v52, 2  ;;  %v774_v36 = vpop.f32.mrf.mxu2 }
 0x168   : > { %v2317_v35 = vrot.slane %v2316_v3, 1  ;;  %v2324_v22 = vrot.slane %v2323_v55, 1  ;;  %v1463_v47 = vsel %vm1037_vm1, %v4076_v28, 0.0  ;;  %v5449_v48 = vadd.f32 %v5054_v1, %v5157_v12 }
 0x169   : > { %v1464_v45 = vrot.slane %v1463_v47, 4  ;;  %v2056_v56 = vsel %vm1037_vm1, %v1881_v8, %v2040_v53  ;;  %v1159_v4 = vmax.f32 %v1157_v57, %v1158_v11  ;;  %v3094_v26 = vrot.slane %v5356_v6, 4 }
 0x16a   : > { %v5453_v10 = vadd.f32 %v2317_v35, %v2316_v3  ;;  %v5455_v18 = vadd.f32 %v2324_v22, %v2323_v55  ;;  %v1889_v9 = vsel %vm1037_vm1, %v4692_v41, -inf  ;;  %v1658_v63 = vsub.f32 %v5287_v17, %v5431_v25 }
 0x16b   : > { %4077 = vlog2.f32 %v1462_v38  ;;  %v1465_v30 = vadd.f32 %v1464_v45, %v1463_v47  ;;  %v5462_v12 = vsub.f32 %v4786_v29, %v2056_v56  ;;  %v5465_v37 = vrot.slane %v1659_v40, 4 }
 0x16c   : > { %4079 = vrcp.f32 %v5453_v10  ;;  %v1154_v61 = vmax.f32 %v1152_v52, %v1153_v2  ;;  %v1160_v46 = vrot.slane %v1159_v4, 2  ;;  %v2631_v13 = vand.u32 2147483648, %v5453_v10 }
 0x16d   : > { %4081 = vrcp.f32 %v5455_v18  ;;  %v1890_v58 = vrot.slane %v1889_v9, 4  ;;  %v1896_v41 = vsel %vm1037_vm1, %v4694_v42, -inf  ;;  %v2629_v62 = vand.u32 2147483647, %v5453_v10 }
 0x16e   : > { %v2643_v0 = vand.u32 2147483647, %v5455_v18  ;;  %4083 = vlog2.f32 %v5453_v10  ;;  %v1466_v29 = vrot.slane %v1465_v30, 2  ;;  %vm2625_vm12 = vweird.f32 %v5453_v10 }
 0x16f   : > { %vm2639_vm13 = vweird.f32 %v5455_v18  ;;  %4085 = vlog2.f32 %v5455_v18  ;;  %v2111_v54 = vmul.f32 1.442695, %v5462_v12  ;;  %v2645_v59 = vand.u32 2147483648, %v5455_v18 }
 0x170   : > { %v1467_v21 = vadd.f32 %v1466_v29, %v1465_v30  ;;  %v1155_v42 = vrot.slane %v1154_v61, 1  ;;  %v1161_v34 = vmax.f32 %v1159_v4, %v1160_v46  ;;  %vm2513_vm14 = vweird.f32 %v5036_v60 }
 0x171   : > { %v5479_v16 = vpop.eup %4077  ;;  %vm2514_vm15 = vweird.f32 %v5054_v1  ;;  %v2632_v27 = vor.u32 1.1754944e-38, %v2631_v13  ;;  %4087 = vpow2.f32 %v2111_v54  ;;  %v1891_v14 = vmax.f32 %v1889_v9, %v1890_v58 }
 0x172   : > { %v1897_v57 = vrot.slane %v1896_v41, 4  ;;  %v4080_v49 = vpop.eup %4079  ;;  %vm5483_vm0 = vcmp.eq.f32.partialorder %v2629_v62, 8.507059e+37  ;;  %vm5487_vm2 = vcmp.eq.f32.partialorder %v2643_v0, 8.507059e+37  ;;  %v1468_v7 = vrot.slane %v1467_v21, 1  ;;  %vm5534_vm7 = vmor %vm2513_vm14, %vm2514_vm15 }
 0x173   : > { %v1156_v3 = vmax.f32 %v1154_v61, %v1155_v42  ;;  %v1162_v55 = vrot.slane %v1161_v34, 1  ;;  %v5492_v52 = vadd.f32 %v774_v36, %v4745_v31  ;;  %v4082_v11 = vpop.eup %4081  ;;  %v2621_v28 = vmul.f32 %v4080_v49, %v5453_v10 }
 0x174   : > { %vm2626_vm3 = vweird.f32 %v4080_v49  ;;  %v1892_v40 = vrot.slane %v1891_v14, 2  ;;  %v1898_v38 = vmax.f32 %v1896_v41, %v1897_v57  ;;  %v4084_v53 = vpop.eup %4083  ;;  %v2635_v35 = vmul.f32 %v4082_v11, %v5455_v18 }
 0x175   : > { %vm2640_vm4 = vweird.f32 %v4082_v11  ;;  %v1469_v22 = vadd.f32 %v1468_v7, %v1467_v21  ;;  %v5497_v47 = vsub.f32 %v5391_v19, %v1156_v3  ;;  %v4086_v2 = vpop.eup %4085  ;;  %v2622_v45 = vsub.f32 1.0, %v2621_v28  ;;  %v794_v19 = vpop.f32.mrf.mxu3  ;;  %vm5508_vm5 = vmor %vm2625_vm12, %vm2626_vm3 }
 0x176   : > { %v3021_v56 = vmul.f32 0.6931472, %v4084_v53  ;;  %v1163_v4 = vmax.f32 %v1161_v34, %v1162_v55  ;;  %v1893_v9 = vmax.f32 %v1891_v14, %v1892_v40  ;;  %v2636_v30 = vsub.f32 1.0, %v2635_v35  ;;  %vm5518_vm6 = vmor %vm2639_vm13, %vm2640_vm4 }
 0x177   : > { %v3023_v61 = vmul.f32 0.6931472, %v4086_v2  ;;  %4089 = vlog2.f32 %v1469_v22  ;;  %v1326_v46 = vmul.f32 1.442695, %v5497_v47  ;;  %v5500_v13 = vpop.eup %4087  ;;  %v2623_v58 = vmul.f32 %v4080_v49, %v2622_v45 }
 0x178   : > { %v2646_v41 = vor.u32 1.1754944e-38, %v2645_v59  ;;  %v5503_v62 = vsub.f32 %v5424_v24, %v1163_v4  ;;  %v1899_v0 = vrot.slane %v1898_v38, 2  ;;  %v2637_v54 = vmul.f32 %v4082_v11, %v2636_v30  ;;  %2163 = vst [vmem:[#allocation1 + $0x30] ss:$2 sm:$0xff] %v5500_v13 }
 0x179   : > { %v3098_v36 = vrot.slane %v3023_v61, 4  ;;  %4091 = vpow2.f32 %v1326_v46  ;;  %v1164_v59 = vsel %vm1037_vm1, %v5492_v52, -inf  ;;  %v2624_v21 = vadd.f32 %v4080_v49, %v2623_v58  ;;  %v6858_v58 = vld [vmem:[#allocation18_spill] sm:$0xff] }
 0x17a   : > { %v1328_v10 = vmul.f32 1.442695, %v5503_v62  ;;  %v1894_v42 = vrot.slane %v1893_v9, 1  ;;  %v1900_v34 = vmax.f32 %v1898_v38, %v1899_v0  ;;  %v2638_v14 = vadd.f32 %v4082_v11, %v2637_v54  ;;  %v6855_v38 = vld [vmem:[#allocation11_spill] sm:$0xff] }
 0x17b   : > { %v3114_v57 = vsel %vm1037_vm1, %v3021_v56, %v3098_v36  ;;  %v1165_v7 = vrot.slane %v1164_v59, 4  ;;  %v5525_v3 = vadd.f32 %v794_v19, %v4745_v31  ;;  %v2628_v55 = vsel %vm5508_vm5, %v4080_v49, %v2624_v21 }
 0x17c   : > { %v3146_v18 = vsub.f32 %v5338_v15, %v3114_v57  ;;  %4093 = vpow2.f32 %v1328_v10  ;;  %v1901_v28 = vrot.slane %v1900_v34, 1  ;;  %v2642_v53 = vsel %vm5518_vm6, %v4082_v11, %v2638_v14  ;;  %v6854_v10 = vld [vmem:[#allocation37_spill] sm:$0xff] }
 0x17d   : > { %v4090_v40 = vpop.eup %4089  ;;  %v3210_v15 = vsel %vm1037_vm1, %v1658_v63, %v5465_v37  ;;  %v1166_v49 = vmax.f32 %v1164_v59, %v1165_v7  ;;  %v1171_v35 = vsel %vm1037_vm1, %v5525_v3, -inf  ;;  %v2633_v22 = vsel %vm5483_vm0, %v2632_v27, %v2628_v55 }
 0x17e   : > { %v2647_v2 = vsel %vm5487_vm2, %v2646_v41, %v2642_v53  ;;  %v5552_v45 = vmul.f32 0.6931472, %v5479_v16  ;;  %v5554_v11 = vmul.f32 0.6931472, %v4090_v40  ;;  %v1902_v17 = vmax.f32 %v1900_v34, %v1901_v28 }
 0x17f   : > { %v4092_v56 = vpop.eup %4091  ;;  %v2938_v4 = vrot.slane %v2647_v2, 4  ;;  %v1167_v25 = vrot.slane %v1166_v49, 2  ;;  %v1172_v63 = vrot.slane %v1171_v35, 4  ;;  %v2516_v37 = vsel %vm5534_vm7, %v5054_v1, %v5449_v48  ;;  %v2170_v30 = vld.sshfl [vmem:[#allocation1 + $0x30] sm:$0xff pattern:$0x75316420] }
 0x180   : > { %v6849_v27 = vsub.f32 1.0, %v5123_v33  ;;  %v3242_v8 = vsub.f32 %v3146_v18, %v3210_v15  ;;  %v2171_v16 = vld.sshfl [vmem:[#allocation1 + $0x38] sm:$0xff pattern:$0x75316420]  ;;  %v1895_v61 = vmax.f32 %v1893_v9, %v1894_v42  ;;  %v6850_v46 = vand.u32 2147483647, %v5036_v60 }
 0x181   : > { %v2954_v41 = vsel %vm1037_vm1, %v2633_v22, %v2938_v4  ;;  %v2326_v0 = vsel %vm1037_vm1, %v2170_v30, 0.0  ;;  %v2333_v1 = vsel %vm1037_vm1, %v2171_v16, 0.0  ;;  %v1470_v33 = vsel %vm1037_vm1, %v4092_v56, 0.0  ;;  %v6853_v9 = vld [vmem:[#allocation17_spill] sm:$0xff] }
 0x182   : > { %v2525_v20 = vmul.f32 %v5072_v50, %v6849_v27  ;;  %vm5565_vm8 = vcmp.eq.f32.partialorder %v6850_v46, 8.507059e+37  ;;  %v4094_v48 = vpop.eup %4093  ;;  %v2986_v19 = vmul.f32 %v5381_v32, %v2954_v41  ;;  %v2327_v29 = vrot.slane %v2326_v0, 4 }
 0x183   : > { %v2334_v54 = vrot.slane %v2333_v1, 4  ;;  %v1903_v60 = vsel %vm1037_vm1, %v6853_v9, -inf  ;;  %v1471_v36 = vrot.slane %v1470_v33, 4  ;;  %v1477_v59 = vsel %vm1037_vm1, %v4094_v48, 0.0 }
 0x184   : > { %v2041_v21 = vrot.slane %v1902_v17, 4  ;;  %v1168_v24 = vmax.f32 %v1166_v49, %v1167_v25  ;;  %vm2527_vm9 = vweird.f32 %v6854_v10  ;;  %vm2528_vm10 = vweird.f32 %v5072_v50 }
 0x185   : > { %v5579_v42 = vmul.f32 %v3242_v8, %v2986_v19  ;;  %v1661_v34 = vsub.f32 %v5406_v5, %v5554_v11  ;;  %v2328_v32 = vadd.f32 %v2327_v29, %v2326_v0  ;;  %v2335_v14 = vadd.f32 %v2334_v54, %v2333_v1  ;;  %vm5616_vm11 = vmor %vm2527_vm9, %vm2528_vm10 }
 0x186   : > { %v1472_v57 = vadd.f32 %v1471_v36, %v1470_v33  ;;  %v1478_v7 = vrot.slane %v1477_v59, 4  ;;  %v2057_v55 = vsel %vm1037_vm1, %v1895_v61, %v2041_v21  ;;  %v1169_v18 = vrot.slane %v1168_v24, 1  ;;  %v6857_v33 = vld [vmem:[#allocation38_spill] sm:$0xff] }
 0x187   : > { %v2329_v28 = vrot.slane %v2328_v32, 2  ;;  %v2336_v40 = vrot.slane %v2335_v14, 2  ;;  %v5585_v53 = vsub.f32 %v6855_v38, %v2057_v55  ;;  %v1173_v15 = vmax.f32 %v1171_v35, %v1172_v63  ;;  %v6856_v35 = vld [vmem:[#allocation43_spill] sm:$0xff] }
 0x188   : > { %v1473_v49 = vrot.slane %v1472_v57, 2  ;;  %v1479_v22 = vadd.f32 %v1478_v7, %v1477_v59  ;;  %v1170_v2 = vmax.f32 %v1168_v24, %v1169_v18  ;;  %v1904_v56 = vrot.slane %v1903_v60, 4 }
 0x189   : > { %v2330_v4 = vadd.f32 %v2329_v28, %v2328_v32  ;;  %v2337_v17 = vadd.f32 %v2336_v40, %v2335_v14  ;;  %v2113_v5 = vmul.f32 1.442695, %v5585_v53  ;;  %v1174_v11 = vrot.slane %v1173_v15, 2 }
 0x18a   : > { %v1474_v25 = vadd.f32 %v1473_v49, %v1472_v57  ;;  %v1480_v27 = vrot.slane %v1479_v22, 2  ;;  %v5589_v8 = vsub.f32 %v5492_v52, %v1170_v2  ;;  %v1905_v30 = vmax.f32 %v1903_v60, %v1904_v56 }
 0x18b   : > { %v2331_v16 = vrot.slane %v2330_v4, 1  ;;  %v2338_v61 = vrot.slane %v2337_v17, 1  ;;  %4095 = vpow2.f32 %v2113_v5  ;;  %v1175_v46 = vmax.f32 %v1173_v15, %v1174_v11 }
 0x18c   : > { %v5592_v63 = vmul.f32 0.6931472, %v6856_v35  ;;  %v1475_v41 = vrot.slane %v1474_v25, 1  ;;  %v1481_v0 = vadd.f32 %v1480_v27, %v1479_v22  ;;  %v1330_v1 = vmul.f32 1.442695, %v5589_v8  ;;  %v834_v35 = vpop.f32.mrf.mxu1 }
 0x18d   : > { %v5598_v48 = vsel %vm5565_vm8, %v6857_v33, %v2516_v37  ;;  %v5601_v52 = vadd.f32 %v5072_v50, %v2525_v20  ;;  %v5603_v19 = vadd.f32 %v2331_v16, %v2330_v4  ;;  %v5605_v29 = vadd.f32 %v2338_v61, %v2337_v17 }
 0x18e   : > { %v1482_v54 = vrot.slane %v1481_v0, 1  ;;  %4097 = vpow2.f32 %v1330_v1  ;;  %v1176_v9 = vrot.slane %v1175_v46, 1  ;;  %v1906_v60 = vrot.slane %v1905_v30, 2 }
 0x18f   : > { %v1660_v36 = vsub.f32 %v5359_v44, %v5552_v45  ;;  %4099 = vrcp.f32 %v5603_v19  ;;  %v3195_v59 = vrot.slane %v1661_v34, 4  ;;  %v1910_v37 = vsel %vm1037_vm1, %v6858_v58, -inf  ;;  %v814_v45 = vpop.f32.mrf.mxu0 }
 0x190   : > { %v2657_v21 = vand.u32 2147483647, %v5603_v19  ;;  %v2659_v24 = vand.u32 2147483648, %v5603_v19  ;;  %4101 = vrcp.f32 %v5605_v29  ;;  %v1476_v44 = vadd.f32 %v1475_v41, %v1474_v25 }
 0x191   : > { %v5623_v34 = vpop.eup %4095  ;;  %v2671_v32 = vand.u32 2147483647, %v5605_v29  ;;  %v2673_v14 = vand.u32 2147483648, %v5605_v29  ;;  %4103 = vlog2.f32 %v5603_v19  ;;  %v1483_v57 = vadd.f32 %v1482_v54, %v1481_v0 }
 0x192   : > { %v5632_v7 = vsel %vm1037_vm1, %v5343_v39, %v3094_v26  ;;  %4105 = vlog2.f32 %v5605_v29  ;;  %2172 = vst [vmem:[#allocation1] ss:$2 sm:$0xff] %v5623_v34  ;;  %v1177_v55 = vmax.f32 %v1175_v46, %v1176_v9  ;;  %v5636_v18 = vmax.f32 %v1905_v30, %v1906_v60 }
 0x193   : > { %v2530_v28 = vsel %vm5616_vm11, %v5072_v50, %v5601_v52  ;;  %v5643_v40 = vsel %vm1037_vm1, %v1660_v36, %v3195_v59  ;;  %v1911_v6 = vrot.slane %v1910_v37, 4  ;;  %v5646_v38 = vadd.f32 %v814_v45, %v4745_v31  ;;  %v6874_v52 = vld [vmem:[#allocation13_spill] sm:$0xff] }
 0x194   : > { %v4098_v39 = vpop.eup %4097  ;;  %vm2653_vm12 = vweird.f32 %v5603_v19  ;;  %v5649_v26 = vor.u32 1.1754944e-38, %v2659_v24  ;;  %4107 = vlog2.f32 %v1483_v57  ;;  %v5652_v15 = vsub.f32 %v5525_v3, %v1177_v55 }
 0x195   : > { %v4100_v49 = vpop.eup %4099  ;;  %vm5654_vm13 = vcmp.eq.f32.partialorder %v2657_v21, 8.507059e+37  ;;  %vm5658_vm14 = vcmp.eq.f32.partialorder %v2671_v32, 8.507059e+37  ;;  %v2674_v56 = vor.u32 1.1754944e-38, %v2673_v14  ;;  %4109 = vlog2.f32 %v1476_v44  ;;  %v6865_v21 = vld [vmem:[#allocation23_spill] sm:$0xff] }
 0x196   : > { %v1484_v4 = vsel %vm1037_vm1, %v4098_v39, 0.0  ;;  %v1912_v17 = vmax.f32 %v1910_v37, %v1911_v6  ;;  %v4102_v5 = vpop.eup %4101  ;;  %v2649_v11 = vmul.f32 %v4100_v49, %v5603_v19  ;;  %v1332_v3 = vmul.f32 1.442695, %v5652_v15 }
 0x197   : > { %v1485_v25 = vrot.slane %v1484_v4, 4  ;;  %v1908_v27 = vrot.slane %v5636_v18, 1  ;;  %v4104_v30 = vpop.eup %4103  ;;  %vm2654_vm15 = vweird.f32 %v4100_v49  ;;  %v2663_v16 = vmul.f32 %v4102_v5, %v5605_v29 }
 0x198   : > { %v1913_v61 = vrot.slane %v1912_v17, 2  ;;  %v1178_v46 = vsel %vm1037_vm1, %v5646_v38, -inf  ;;  %v4106_v41 = vpop.eup %4105  ;;  %v2650_v0 = vsub.f32 1.0, %v2649_v11  ;;  %v3025_v1 = vmul.f32 0.6931472, %v4104_v30  ;;  %vm5681_vm3 = vmor %vm2653_vm12, %vm2654_vm15 }
 0x199   : > { %v1486_v33 = vadd.f32 %v1485_v25, %v1484_v4  ;;  %4111 = vpow2.f32 %v1332_v3  ;;  %v2664_v54 = vsub.f32 1.0, %v2663_v16  ;;  %vm2667_vm0 = vweird.f32 %v5605_v29  ;;  %v2176_v60 = vld.sshfl [vmem:[#allocation1] sm:$0xff pattern:$0x75316420] }
 0x19a   : > { %vm2668_vm2 = vweird.f32 %v4102_v5  ;;  %v3027_v9 = vmul.f32 0.6931472, %v4106_v41  ;;  %v4108_v36 = vpop.eup %4107  ;;  %v2651_v59 = vmul.f32 %v4100_v49, %v2650_v0  ;;  %v2340_v58 = vsel %vm1037_vm1, %v2176_v60, 0.0  ;;  %v2177_v57 = vld.sshfl [vmem:[#allocation1 + $0x8] sm:$0xff pattern:$0x75316420] }
 0x19b   : > { %v5672_v37 = vadd.f32 %v834_v35, %v4745_v31  ;;  %v5676_v24 = vsel %vm1037_vm1, %v6865_v21, -inf  ;;  %v4110_v44 = vpop.eup %4109  ;;  %v2665_v32 = vmul.f32 %v4102_v5, %v2664_v54  ;;  %v2341_v55 = vrot.slane %v2340_v58, 4  ;;  %vm5688_vm4 = vmor %vm2667_vm0, %vm2668_vm2 }
 0x19c   : > { %v3099_v14 = vrot.slane %v3027_v9, 4  ;;  %v1179_v6 = vrot.slane %v1178_v46, 4  ;;  %v2652_v39 = vadd.f32 %v4100_v49, %v2651_v59  ;;  %v2347_v11 = vsel %vm1037_vm1, %v2177_v57, 0.0 }
 0x19d   : > { %v1487_v19 = vrot.slane %v1486_v33, 2  ;;  %v1914_v25 = vmax.f32 %v1912_v17, %v1913_v61  ;;  %v2666_v3 = vadd.f32 %v4102_v5, %v2665_v32  ;;  %v1617_v16 = vmul.f32 0.6931472, %v4108_v36 }
 0x19e   : > { %v3115_v30 = vsel %vm1037_vm1, %v3025_v1, %v3099_v14  ;;  %v2342_v35 = vadd.f32 %v2341_v55, %v2340_v58  ;;  %v2656_v0 = vsel %vm5681_vm3, %v4100_v49, %v2652_v39  ;;  %v2348_v29 = vrot.slane %v2347_v11, 4 }
 0x19f   : > { %v4112_v41 = vpop.eup %4111  ;;  %v3147_v54 = vsub.f32 %v5462_v12, %v3115_v30  ;;  %v1488_v9 = vadd.f32 %v1487_v19, %v1486_v33  ;;  %v6870_v60 = vand.u32 2147483647, %v6854_v10  ;;  %v2670_v17 = vsel %vm5688_vm4, %v4102_v5, %v2666_v3 }
 0x1a0   : > { %v1615_v61 = vmul.f32 0.6931472, %v4110_v44  ;;  %v2343_v1 = vrot.slane %v2342_v35, 2  ;;  %v1180_v36 = vmax.f32 %v1178_v46, %v1179_v6  ;;  %v2661_v49 = vsel %vm5654_vm13, %v5649_v26, %v2656_v0 }
 0x1a1   : > { %vm5699_vm5 = vcmp.eq.f32.partialorder %v6870_v60, 8.507059e+37  ;;  %v2675_v12 = vsel %vm5658_vm14, %v2674_v56, %v2670_v17  ;;  %v2349_v33 = vadd.f32 %v2348_v29, %v2347_v11  ;;  %v1489_v58 = vrot.slane %v1488_v9, 1 }
 0x1a2   : > { %v2939_v10 = vrot.slane %v2675_v12, 4  ;;  %v1663_v21 = vsub.f32 %v5503_v62, %v1617_v16  ;;  %v2344_v45 = vadd.f32 %v2343_v1, %v2342_v35  ;;  %v1491_v32 = vsel %vm1037_vm1, %v4112_v41, 0.0 }
 0x1a3   : > { %v3243_v5 = vsub.f32 %v3147_v54, %v5643_v40  ;;  %v2350_v44 = vrot.slane %v2349_v33, 2  ;;  %v1492_v14 = vrot.slane %v1491_v32, 4  ;;  %v1915_v46 = vrot.slane %v1914_v25, 1 }
 0x1a4   : > { %v2955_v57 = vsel %vm1037_vm1, %v2661_v49, %v2939_v10  ;;  %v2345_v22 = vrot.slane %v2344_v45, 1  ;;  %v1181_v26 = vrot.slane %v1180_v36, 2  ;;  %v1185_v2 = vsel %vm1037_vm1, %v5672_v37, -inf }
 0x1a5   : > { %v2987_v56 = vmul.f32 %v5500_v13, %v2955_v57  ;;  %v2351_v55 = vadd.f32 %v2350_v44, %v2349_v33  ;;  %v1490_v6 = vadd.f32 %v1489_v58, %v1488_v9  ;;  %v1493_v62 = vadd.f32 %v1492_v14, %v1491_v32 }
 0x1a6   : > { %v5717_v39 = vadd.f32 %v2345_v22, %v2344_v45  ;;  %v1916_v4 = vmax.f32 %v1914_v25, %v1915_v46  ;;  %v1182_v11 = vmax.f32 %v1180_v36, %v1181_v26  ;;  %v1186_v40 = vrot.slane %v1185_v2, 4  ;;  %v6877_v26 = vld [vmem:[#allocation24_spill] sm:$0xff] }
 0x1a7   : > { %v5719_v19 = vmul.f32 %v3243_v5, %v2987_v56  ;;  %v2352_v3 = vrot.slane %v2351_v55, 1  ;;  %v3196_v30 = vrot.slane %v1663_v21, 4  ;;  %v1494_v16 = vrot.slane %v1493_v62, 2  ;;  %v854_v56 = vpop.f32.mrf.mxu2 }
 0x1a8   : > { %v1662_v35 = vsub.f32 %v5497_v47, %v1615_v61  ;;  %4113 = vrcp.f32 %v5717_v39  ;;  %v2687_v41 = vand.u32 2147483648, %v5717_v39  ;;  %v1909_v13 = vmax.f32 %v5636_v18, %v1908_v27  ;;  %v6873_v47 = vld [vmem:[#allocation39_spill] sm:$0xff] }
 0x1a9   : > { %v5727_v0 = vadd.f32 %v2352_v3, %v2351_v55  ;;  %4115 = vlog2.f32 %v5717_v39  ;;  %v1495_v25 = vadd.f32 %v1494_v16, %v1493_v62  ;;  %v2042_v54 = vrot.slane %v1916_v4, 4  ;;  %v874_v4 = vpop.f32.mrf.mxu3 }
 0x1aa   : > { %4117 = vlog2.f32 %v1490_v6  ;;  %v1183_v29 = vrot.slane %v1182_v11, 1  ;;  %v1187_v9 = vmax.f32 %v1185_v2, %v1186_v40  ;;  %v1918_v60 = vrot.slane %v5676_v24, 4 }
 0x1ab   : > { %v5739_v18 = vsel %vm5699_vm5, %v6873_v47, %v2530_v28  ;;  %v2685_v27 = vand.u32 2147483647, %v5717_v39  ;;  %4119 = vrcp.f32 %v5727_v0  ;;  %v5744_v17 = vsel %vm1037_vm1, %v1662_v35, %v3196_v30 }
 0x1ac   : > { %vm2681_vm6 = vweird.f32 %v5717_v39  ;;  %4121 = vlog2.f32 %v5727_v0  ;;  %v1496_v20 = vrot.slane %v1495_v25, 1  ;;  %v2058_v61 = vsel %vm1037_vm1, %v1909_v13, %v2042_v54 }
 0x1ad   : > { %v5749_v50 = vor.u32 1.1754944e-38, %v2687_v41  ;;  %vm2695_vm7 = vweird.f32 %v5727_v0  ;;  %v5753_v28 = vsub.f32 %v6874_v52, %v2058_v61  ;;  %v1184_v59 = vmax.f32 %v1182_v11, %v1183_v29 }
 0x1ae   : > { %v5755_v1 = vpop.eup %4113  ;;  %v2699_v36 = vand.u32 2147483647, %v5727_v0  ;;  %v1497_v49 = vadd.f32 %v1496_v20, %v1495_v25  ;;  %v1188_v12 = vrot.slane %v1187_v9, 2  ;;  %v1919_v33 = vmax.f32 %v5676_v24, %v1918_v60 }
 0x1af   : > { %v4116_v58 = vpop.eup %4115  ;;  %v2677_v10 = vmul.f32 %v5755_v1, %v5717_v39  ;;  %vm5761_vm8 = vcmp.eq.f32.partialorder %v2685_v27, 8.507059e+37  ;;  %v2701_v45 = vand.u32 2147483648, %v5727_v0  ;;  %v2115_v32 = vmul.f32 1.442695, %v5753_v28 }
 0x1b0   : > { %v5768_v5 = vsub.f32 %v5646_v38, %v1184_v59  ;;  %v5770_v44 = vpop.eup %4117  ;;  %vm2682_vm9 = vweird.f32 %v5755_v1  ;;  %4123 = vlog2.f32 %v1497_v49  ;;  %v1189_v24 = vmax.f32 %v1187_v9, %v1188_v12 }
 0x1b1   : > { %v1920_v14 = vrot.slane %v1919_v33, 2  ;;  %v4120_v46 = vpop.eup %4119  ;;  %v2678_v57 = vsub.f32 1.0, %v2677_v10  ;;  %4125 = vpow2.f32 %v2115_v32  ;;  %v1924_v2 = vsel %vm1037_vm1, %v6877_v26, -inf  ;;  %vm5782_vm11 = vmor %vm2681_vm6, %vm2682_vm9 }
 0x1b2   : > { %v1334_v22 = vmul.f32 1.442695, %v5768_v5  ;;  %v4122_v55 = vpop.eup %4121  ;;  %v2691_v38 = vmul.f32 %v4120_v46, %v5727_v0  ;;  %vm2696_vm10 = vweird.f32 %v4120_v46  ;;  %v3029_v6 = vmul.f32 0.6931472, %v4116_v58 }
 0x1b3   : > { %v1190_v62 = vrot.slane %v1189_v24, 1  ;;  %v2679_v11 = vmul.f32 %v5755_v1, %v2678_v57  ;;  %v3031_v40 = vmul.f32 0.6931472, %v4122_v55  ;;  %v1925_v3 = vrot.slane %v1924_v2, 4  ;;  %vm5810_vm13 = vmor %vm2695_vm7, %vm2696_vm10 }
 0x1b4   : > { %4127 = vpow2.f32 %v1334_v22  ;;  %v2692_v16 = vsub.f32 1.0, %v2691_v38  ;;  %v1921_v41 = vmax.f32 %v1919_v33, %v1920_v14  ;;  %v5787_v13 = vadd.f32 %v854_v56, %v4745_v31 }
 0x1b5   : > { %v1191_v35 = vmax.f32 %v1189_v24, %v1190_v62  ;;  %v2680_v25 = vadd.f32 %v5755_v1, %v2679_v11  ;;  %v3100_v54 = vrot.slane %v3031_v40, 4  ;;  %v1926_v29 = vmax.f32 %v1924_v2, %v1925_v3  ;;  %v6884_v62 = vld [vmem:[#allocation27_spill] sm:$0xff] }
 0x1b6   : > { %v5791_v9 = vadd.f32 %v874_v4, %v4745_v31  ;;  %v4124_v60 = vpop.eup %4123  ;;  %v2693_v47 = vmul.f32 %v4120_v46, %v2692_v16  ;;  %vm5793_vm12 = vcmp.eq.f32.partialorder %v2699_v36, 8.507059e+37  ;;  %v1192_v20 = vsel %vm1037_vm1, %v5787_v13, -inf  ;;  %v6885_v16 = vld [vmem:[#allocation29_spill] sm:$0xff] }
 0x1b7   : > { %v5798_v27 = vsub.f32 %v5672_v37, %v1191_v35  ;;  %v5802_v61 = vpop.eup %4125  ;;  %v2684_v52 = vsel %vm5782_vm11, %v5755_v1, %v2680_v25  ;;  %v2702_v36 = vor.u32 1.1754944e-38, %v2701_v45  ;;  %v3116_v37 = vsel %vm1037_vm1, %v3029_v6, %v3100_v54 }
 0x1b8   : > { %v1927_v49 = vrot.slane %v1926_v29, 2  ;;  %v2694_v12 = vadd.f32 %v4120_v46, %v2693_v47  ;;  %v3148_v33 = vsub.f32 %v5585_v53, %v3116_v37  ;;  %2173 = vst [vmem:[#allocation1 + $0x10] ss:$2 sm:$0xff] %v5802_v61  ;;  %v1922_v10 = vrot.slane %v1921_v41, 1 }
 0x1b9   : > { %v1336_v58 = vmul.f32 1.442695, %v5798_v27  ;;  %v1621_v32 = vmul.f32 0.6931472, %v4124_v60  ;;  %v1193_v0 = vrot.slane %v1192_v20, 4  ;;  %v1199_v14 = vsel %vm1037_vm1, %v5791_v9, -inf }
 0x1ba   : > { %v4128_v1 = vpop.eup %4127  ;;  %v1928_v24 = vmax.f32 %v1926_v29, %v1927_v49  ;;  %v2689_v45 = vsel %vm5761_vm8, %v5749_v50, %v2684_v52  ;;  %v2698_v57 = vsel %vm5810_vm13, %v4120_v46, %v2694_v12  ;;  %v3244_v38 = vsub.f32 %v3148_v33, %v5744_v17 }
 0x1bb   : > { %v1498_v53 = vsel %vm1037_vm1, %v4128_v1, 0.0  ;;  %4129 = vpow2.f32 %v1336_v58  ;;  %v2703_v22 = vsel %vm5793_vm12, %v2702_v36, %v2698_v57  ;;  %v1194_v56 = vmax.f32 %v1192_v20, %v1193_v0  ;;  %v6886_v0 = vld [vmem:[#allocation21_spill] sm:$0xff] }
 0x1bc   : > { %v1499_v26 = vrot.slane %v1498_v53, 4  ;;  %v1929_v2 = vrot.slane %v1928_v24, 1  ;;  %v2940_v55 = vrot.slane %v2703_v22, 4  ;;  %v1200_v6 = vrot.slane %v1199_v14, 4 }
 0x1bd   : > { %v1931_v21 = vsel %vm1037_vm1, %v6884_v62, -inf  ;;  %v1195_v11 = vrot.slane %v1194_v56, 2  ;;  %v5833_v3 = vmul.f32 0.6931472, %v5770_v44  ;;  %v1923_v30 = vmax.f32 %v1921_v41, %v1922_v10 }
 0x1be   : > { %v1500_v50 = vadd.f32 %v1499_v26, %v1498_v53  ;;  %v1930_v4 = vmax.f32 %v1928_v24, %v1929_v2  ;;  %v1932_v46 = vrot.slane %v1931_v21, 4  ;;  %v2956_v40 = vsel %vm1037_vm1, %v2689_v45, %v2940_v55 }
 0x1bf   : > { %v1938_v35 = vsel %vm1037_vm1, %v6885_v16, -inf  ;;  %v2988_v25 = vmul.f32 %v5623_v34, %v2956_v40  ;;  %v1665_v17 = vsub.f32 %v5652_v15, %v1621_v32  ;;  %v2178_v54 = vld.sshfl [vmem:[#allocation1 + $0x10] sm:$0xff pattern:$0x75316420]  ;;  %v1196_v60 = vmax.f32 %v1194_v56, %v1195_v11 }
 0x1c0   : > { %v2179_v29 = vld.sshfl [vmem:[#allocation1 + $0x18] sm:$0xff pattern:$0x75316420]  ;;  %v1201_v47 = vmax.f32 %v1199_v14, %v1200_v6  ;;  %v2354_v20 = vsel %vm1037_vm1, %v2178_v54, 0.0  ;;  %v1501_v59 = vrot.slane %v1500_v50, 2  ;;  %v2043_v44 = vrot.slane %v1930_v4, 4 }
 0x1c1   : > { %v4130_v39 = vpop.eup %4129  ;;  %v2361_v52 = vsel %vm1037_vm1, %v2179_v29, 0.0  ;;  %v5841_v36 = vmul.f32 %v3244_v38, %v2988_v25  ;;  %v2355_v41 = vrot.slane %v2354_v20, 4  ;;  %v1933_v49 = vmax.f32 %v1931_v21, %v1932_v46 }
 0x1c2   : > { %v2362_v37 = vrot.slane %v2361_v52, 4  ;;  %v1502_v12 = vadd.f32 %v1501_v59, %v1500_v50  ;;  %v1505_v34 = vsel %vm1037_vm1, %v4130_v39, 0.0  ;;  %v2059_v15 = vsel %vm1037_vm1, %v1923_v30, %v2043_v44  ;;  %v894_v59 = vpop.f32.mrf.mxu0 }
 0x1c3   : > { %v1197_v33 = vrot.slane %v1196_v60, 1  ;;  %v2356_v58 = vadd.f32 %v2355_v41, %v2354_v20  ;;  %v1506_v1 = vrot.slane %v1505_v34, 4  ;;  %v1939_v32 = vrot.slane %v1938_v35, 4 }
 0x1c4   : > { %v2363_v10 = vadd.f32 %v2362_v37, %v2361_v52  ;;  %v1503_v24 = vrot.slane %v1502_v12, 1  ;;  %v5846_v14 = vsub.f32 %v6886_v0, %v2059_v15  ;;  %v1202_v57 = vrot.slane %v1201_v47, 2  ;;  %v6888_v37 = vld [vmem:[#allocation14_spill] sm:$0xff] }
 0x1c5   : > { %v1198_v45 = vmax.f32 %v1196_v60, %v1197_v33  ;;  %v2357_v53 = vrot.slane %v2356_v58, 2  ;;  %v1507_v26 = vadd.f32 %v1506_v1, %v1505_v34  ;;  %v1934_v2 = vrot.slane %v1933_v49, 2 }
 0x1c6   : > { %v2364_v22 = vrot.slane %v2363_v10, 2  ;;  %v3197_v56 = vrot.slane %v1665_v17, 4  ;;  %v2117_v55 = vmul.f32 1.442695, %v5846_v14  ;;  %v1203_v6 = vmax.f32 %v1201_v47, %v1202_v57 }
 0x1c7   : > { %v5850_v38 = vsub.f32 %v5787_v13, %v1198_v45  ;;  %v2358_v62 = vadd.f32 %v2357_v53, %v2356_v58  ;;  %v1508_v50 = vrot.slane %v1507_v26, 2  ;;  %v1935_v4 = vmax.f32 %v1933_v49, %v1934_v2  ;;  %v6887_v13 = vld [vmem:[#allocation34_spill] sm:$0xff] }
 0x1c8   : > { %v2365_v21 = vadd.f32 %v2364_v22, %v2363_v10  ;;  %v1504_v11 = vadd.f32 %v1503_v24, %v1502_v12  ;;  %v1204_v40 = vrot.slane %v1203_v6, 1  ;;  %v1940_v30 = vmax.f32 %v1938_v35, %v1939_v32  ;;  %v914_v35 = vpop.f32.mrf.mxu1 }
 0x1c9   : > { %v1338_v46 = vmul.f32 1.442695, %v5850_v38  ;;  %v2359_v16 = vrot.slane %v2358_v62, 1  ;;  %v1509_v54 = vadd.f32 %v1508_v50, %v1507_v26  ;;  %4131 = vpow2.f32 %v2117_v55 }
 0x1ca   : > { %v2366_v25 = vrot.slane %v2365_v21, 1  ;;  %v1205_v17 = vmax.f32 %v1203_v6, %v1204_v40  ;;  %v1936_v29 = vrot.slane %v1935_v4, 1  ;;  %v1941_v60 = vrot.slane %v1940_v30, 2 }
 0x1cb   : > { %4133 = vpow2.f32 %v1338_v46  ;;  %v1651_v47 = vsub.f32 %v6887_v13, %v5592_v63  ;;  %v1664_v39 = vsub.f32 %v5589_v8, %v5833_v3  ;;  %v5857_v20 = vadd.f32 %v2359_v16, %v2358_v62 }
 0x1cc   : > { %v5859_v52 = vadd.f32 %v2366_v25, %v2365_v21  ;;  %v2934_v44 = vrot.slane %v5739_v18, 4  ;;  %4135 = vlog2.f32 %v1504_v11  ;;  %v1510_v41 = vrot.slane %v1509_v54, 1 }
 0x1cd   : > { %v5864_v49 = vsel %vm1037_vm1, %v6888_v37, -inf  ;;  %4137 = vrcp.f32 %v5857_v20  ;;  %v5868_v12 = vsel %vm1037_vm1, %v1664_v39, %v3197_v56  ;;  %v5871_v8 = vsub.f32 %v5791_v9, %v1205_v17 }
 0x1ce   : > { %v1942_v3 = vmax.f32 %v1940_v30, %v1941_v60  ;;  %4139 = vrcp.f32 %v5859_v52  ;;  %v1937_v34 = vmax.f32 %v1935_v4, %v1936_v29  ;;  %v5875_v15 = vadd.f32 %v894_v59, %v4745_v31 }
 0x1cf   : > { %v5878_v33 = vadd.f32 %v914_v35, %v4745_v31  ;;  %v5880_v58 = vpop.eup %4131  ;;  %vm2709_vm14 = vweird.f32 %v5857_v20  ;;  %v2713_v10 = vand.u32 2147483647, %v5857_v20  ;;  %v2715_v1 = vand.u32 2147483648, %v5857_v20 }
 0x1d0   : > { %4141 = vlog2.f32 %v5857_v20  ;;  %v2727_v32 = vand.u32 2147483647, %v5859_v52  ;;  %v2729_v24 = vand.u32 2147483648, %v5859_v52  ;;  %v1511_v0 = vadd.f32 %v1510_v41, %v1509_v54  ;;  %2174 = vst [vmem:[#allocation1 + $0x20] ss:$2 sm:$0xff] %v5880_v58 }
 0x1d1   : > { %v4134_v9 = vpop.eup %4133  ;;  %4143 = vlog2.f32 %v5859_v52  ;;  %vm2723_vm15 = vweird.f32 %v5859_v52  ;;  %v1340_v57 = vmul.f32 1.442695, %v5871_v8  ;;  %v1943_v53 = vrot.slane %v1942_v3, 1 }
 0x1d2   : > { %v1512_v45 = vsel %vm1037_vm1, %v4134_v9, 0.0  ;;  %v5893_v22 = vpop.eup %4135  ;;  %4145 = vlog2.f32 %v1511_v0  ;;  %v1206_v2 = vsel %vm1037_vm1, %v5875_v15, -inf  ;;  %v1213_v56 = vsel %vm1037_vm1, %v5878_v33, -inf }
 0x1d3   : > { %v1513_v26 = vrot.slane %v1512_v45, 4  ;;  %v4138_v55 = vpop.eup %4137  ;;  %vm5899_vm0 = vcmp.eq.f32.partialorder %v2713_v10, 8.507059e+37  ;;  %v2716_v62 = vor.u32 1.1754944e-38, %v2715_v1  ;;  %4147 = vpow2.f32 %v1340_v57 }
 0x1d4   : > { %v1944_v21 = vmax.f32 %v1942_v3, %v1943_v53  ;;  %v1207_v50 = vrot.slane %v1206_v2, 4  ;;  %v4140_v4 = vpop.eup %4139  ;;  %v2705_v11 = vmul.f32 %v4138_v55, %v5857_v20  ;;  %vm5904_vm2 = vcmp.eq.f32.partialorder %v2727_v32, 8.507059e+37 }
 0x1d5   : > { %v2730_v40 = vor.u32 1.1754944e-38, %v2729_v24  ;;  %v1514_v30 = vadd.f32 %v1513_v26, %v1512_v45  ;;  %vm2710_vm3 = vweird.f32 %v4138_v55  ;;  %v2719_v25 = vmul.f32 %v4140_v4, %v5859_v52 }
 0x1d6   : > { %v4142_v16 = vpop.eup %4141  ;;  %v2044_v54 = vrot.slane %v1944_v21, 4  ;;  %v1214_v17 = vrot.slane %v1213_v56, 4  ;;  %v2706_v60 = vsub.f32 1.0, %v2705_v11  ;;  %v1946_v35 = vrot.slane %v5864_v49, 4  ;;  %vm5915_vm5 = vmor %vm2709_vm14, %vm2710_vm3 }
 0x1d7   : > { %v4144_v29 = vpop.eup %4143  ;;  %v3033_v39 = vmul.f32 0.6931472, %v4142_v16  ;;  %v1515_v59 = vrot.slane %v1514_v30, 2  ;;  %v2720_v41 = vsub.f32 1.0, %v2719_v25  ;;  %vm2724_vm4 = vweird.f32 %v4140_v4 }
 0x1d8   : > { %v3035_v37 = vmul.f32 0.6931472, %v4144_v29  ;;  %v2180_v3 = vld.sshfl [vmem:[#allocation1 + $0x20] sm:$0xff pattern:$0x75316420]  ;;  %v1208_v10 = vmax.f32 %v1206_v2, %v1207_v50  ;;  %v4146_v1 = vpop.eup %4145  ;;  %v2707_v9 = vmul.f32 %v4138_v55, %v2706_v60  ;;  %v2060_v0 = vsel %vm1037_vm1, %v1937_v34, %v2044_v54  ;;  %vm5922_vm6 = vmor %vm2723_vm15, %vm2724_vm4  ;;  %v6897_v60 = vld [vmem:[#allocation25_spill] sm:$0xff] }
 0x1d9   : > { %v2368_v32 = vsel %vm1037_vm1, %v2180_v3, 0.0  ;;  %v1516_v24 = vadd.f32 %v1515_v59, %v1514_v30  ;;  %v4148_v45 = vpop.eup %4147  ;;  %v2721_v53 = vmul.f32 %v4140_v4, %v2720_v41  ;;  %v2181_v21 = vld.sshfl [vmem:[#allocation1 + $0x28] sm:$0xff pattern:$0x75316420]  ;;  %v1215_v2 = vmax.f32 %v1213_v56, %v1214_v17  ;;  %v6898_v30 = vld [vmem:[#allocation26_spill] sm:$0xff] }
 0x1da   : > { %v3101_v26 = vrot.slane %v3035_v37, 4  ;;  %v2369_v11 = vrot.slane %v2368_v32, 4  ;;  %v2708_v50 = vadd.f32 %v4138_v55, %v2707_v9  ;;  %v1625_v34 = vmul.f32 0.6931472, %v4146_v1 }
 0x1db   : > { %v2375_v20 = vsel %vm1037_vm1, %v2181_v21, 0.0  ;;  %v1517_v16 = vrot.slane %v1516_v24, 1  ;;  %v2722_v25 = vadd.f32 %v4140_v4, %v2721_v53  ;;  %v5929_v59 = vsub.f32 %v6897_v60, %v2060_v0 }
 0x1dc   : > { %v3117_v54 = vsel %vm1037_vm1, %v3033_v39, %v3101_v26  ;;  %v2370_v29 = vadd.f32 %v2369_v11, %v2368_v32  ;;  %v2712_v56 = vsel %vm5915_vm5, %v4138_v55, %v2708_v50  ;;  %v2376_v17 = vrot.slane %v2375_v20, 4 }
 0x1dd   : > { %v3149_v52 = vsub.f32 %v5753_v28, %v3117_v54  ;;  %v1519_v41 = vsel %vm1037_vm1, %v4148_v45, 0.0  ;;  %v2726_v37 = vsel %vm5922_vm6, %v4140_v4, %v2722_v25  ;;  %v1518_v1 = vadd.f32 %v1517_v16, %v1516_v24 }
 0x1de   : > { %v2371_v3 = vrot.slane %v2370_v29, 2  ;;  %v1947_v9 = vmax.f32 %v5864_v49, %v1946_v35  ;;  %v2717_v39 = vsel %vm5899_vm0, %v2716_v62, %v2712_v56  ;;  %v2731_v32 = vsel %vm5904_vm2, %v2730_v40, %v2726_v37 }
 0x1df   : > { %v1667_v55 = vsub.f32 %v5798_v27, %v1625_v34  ;;  %v2377_v0 = vadd.f32 %v2376_v17, %v2375_v20  ;;  %v2941_v28 = vrot.slane %v2731_v32, 4  ;;  %v3245_v57 = vsub.f32 %v3149_v52, %v5868_v12 }
 0x1e0   : > { %v2372_v45 = vadd.f32 %v2371_v3, %v2370_v29  ;;  %v1520_v53 = vrot.slane %v1519_v41, 4  ;;  %v2119_v4 = vmul.f32 1.442695, %v5929_v59  ;;  %v1209_v24 = vrot.slane %v1208_v10, 2 }
 0x1e1   : > { %v2378_v26 = vrot.slane %v2377_v0, 2  ;;  %v1216_v21 = vrot.slane %v1215_v2, 2  ;;  %v2957_v49 = vsel %vm1037_vm1, %v2717_v39, %v2941_v28  ;;  %4149 = vlog2.f32 %v1518_v1 }
 0x1e2   : > { %v2373_v6 = vrot.slane %v2372_v45, 1  ;;  %v1521_v62 = vadd.f32 %v1520_v53, %v1519_v41  ;;  %v2989_v46 = vmul.f32 %v5802_v61, %v2957_v49  ;;  %4151 = vpow2.f32 %v2119_v4 }
 0x1e3   : > { %v2379_v40 = vadd.f32 %v2378_v26, %v2377_v0  ;;  %v1210_v27 = vmax.f32 %v1208_v10, %v1209_v24  ;;  %v1623_v35 = vmul.f32 0.6931472, %v5893_v22  ;;  %v1217_v50 = vmax.f32 %v1215_v2, %v1216_v21 }
 0x1e4   : > { %v5948_v12 = vadd.f32 %v2373_v6, %v2372_v45  ;;  %v1522_v11 = vrot.slane %v1521_v62, 2  ;;  %v3142_v34 = vsub.f32 %v6898_v30, %v5632_v7  ;;  %v5952_v20 = vmul.f32 %v3245_v57, %v2989_v46 }
 0x1e5   : > { %v2380_v16 = vrot.slane %v2379_v40, 1  ;;  %v1211_v25 = vrot.slane %v1210_v27, 1  ;;  %v5958_v61 = vsel %vm1037_vm1, %v5598_v48, %v2934_v44  ;;  %v5963_v22 = vrot.slane %v1651_v47, 4  ;;  %v6899_v44 = vld [vmem:[#allocation15_spill] sm:$0xff] }
 0x1e6   : > { %4153 = vrcp.f32 %v5948_v12  ;;  %v3198_v10 = vrot.slane %v1667_v55, 4  ;;  %v1523_v54 = vadd.f32 %v1522_v11, %v1521_v62  ;;  %v1948_v29 = vrot.slane %v1947_v9, 2 }
 0x1e7   : > { %v5966_v2 = vadd.f32 %v2380_v16, %v2379_v40  ;;  %4155 = vlog2.f32 %v5948_v12  ;;  %v4150_v60 = vpop.eup %4149  ;;  %v1666_v18 = vsub.f32 %v5768_v5, %v1623_v35  ;;  %v1212_v56 = vmax.f32 %v1210_v27, %v1211_v25  ;;  %v934_v25 = vpop.f32.mrf.mxu2 }
 0x1e8   : > { %v1218_v48 = vrot.slane %v1217_v50, 1  ;;  %v1952_v52 = vsel %vm1037_vm1, %v6899_v44, -inf  ;;  %v5972_v63 = vpop.eup %4151  ;;  %v2741_v13 = vand.u32 2147483647, %v5948_v12  ;;  %v2743_v47 = vand.u32 2147483648, %v5948_v12 }
 0x1e9   : > { %4157 = vrcp.f32 %v5966_v2  ;;  %v2755_v17 = vand.u32 2147483647, %v5966_v2  ;;  %v2757_v41 = vand.u32 2147483648, %v5966_v2  ;;  %v1524_v5 = vrot.slane %v1523_v54, 1  ;;  %2175 = vst [vmem:[#allocation1 + $0x30] ss:$2 sm:$0xff] %v5972_v63 }
 0x1ea   : > { %4159 = vlog2.f32 %v5966_v2  ;;  %v5982_v37 = vsub.f32 %v5875_v15, %v1212_v56  ;;  %vm2737_vm7 = vweird.f32 %v5948_v12  ;;  %v5986_v3 = vsel %vm1037_vm1, %v1666_v18, %v3198_v10 }
 0x1eb   : > { %v1219_v1 = vmax.f32 %v1217_v50, %v1218_v48  ;;  %v1949_v39 = vmax.f32 %v1947_v9, %v1948_v29  ;;  %v5990_v55 = vmul.f32 0.6931472, %v4150_v60  ;;  %v1525_v0 = vadd.f32 %v1524_v5, %v1523_v54  ;;  %v6906_v5 = vld [vmem:[#allocation19_spill] sm:$0xff] }
 0x1ec   : > { %v5988_v32 = vpop.eup %4153  ;;  %v1342_v28 = vmul.f32 1.442695, %v5982_v37  ;;  %v1953_v57 = vrot.slane %v1952_v52, 4  ;;  %vm5995_vm8 = vcmp.eq.f32.partialorder %v2741_v13, 8.507059e+37  ;;  %v2744_v26 = vor.u32 1.1754944e-38, %v2743_v47 }
 0x1ed   : > { %v4156_v45 = vpop.eup %4155  ;;  %v2733_v15 = vmul.f32 %v5988_v32, %v5948_v12  ;;  %vm2751_vm9 = vweird.f32 %v5966_v2  ;;  %v6001_v9 = vsub.f32 %v5878_v33, %v1219_v1  ;;  %vm6003_vm10 = vcmp.eq.f32.partialorder %v2755_v17, 8.507059e+37 }
 0x1ee   : > { %v2758_v24 = vor.u32 1.1754944e-38, %v2757_v41  ;;  %4161 = vlog2.f32 %v1525_v0  ;;  %v1954_v21 = vmax.f32 %v1952_v52, %v1953_v57  ;;  %vm2738_vm11 = vweird.f32 %v5988_v32 }
 0x1ef   : > { %v4158_v49 = vpop.eup %4157  ;;  %v2734_v6 = vsub.f32 1.0, %v2733_v15  ;;  %4163 = vpow2.f32 %v1342_v28  ;;  %v1344_v62 = vmul.f32 1.442695, %v6001_v9  ;;  %v3037_v27 = vmul.f32 0.6931472, %v4156_v45  ;;  %vm6013_vm13 = vmor %vm2737_vm7, %vm2738_vm11 }
 0x1f0   : > { %v4160_v46 = vpop.eup %4159  ;;  %v2747_v40 = vmul.f32 %v4158_v49, %v5966_v2  ;;  %v1950_v33 = vrot.slane %v1949_v39, 1  ;;  %v1955_v35 = vrot.slane %v1954_v21, 2  ;;  %vm2752_vm12 = vweird.f32 %v4158_v49  ;;  %v2182_v16 = vld.sshfl [vmem:[#allocation1 + $0x30] sm:$0xff pattern:$0x75316420] }
 0x1f1   : > { %v2735_v11 = vmul.f32 %v5988_v32, %v2734_v6  ;;  %v3039_v50 = vmul.f32 0.6931472, %v4160_v46  ;;  %4165 = vpow2.f32 %v1344_v62  ;;  %v2183_v29 = vld.sshfl [vmem:[#allocation1 + $0x38] sm:$0xff pattern:$0x75316420]  ;;  %v2382_v60 = vsel %vm1037_vm1, %v2182_v16, 0.0  ;;  %vm6031_vm14 = vmor %vm2751_vm9, %vm2752_vm12 }
 0x1f2   : > { %v2748_v54 = vsub.f32 1.0, %v2747_v40  ;;  %v1956_v18 = vmax.f32 %v1954_v21, %v1955_v35  ;;  %v6019_v56 = vadd.f32 %v934_v25, %v4745_v31  ;;  %v2383_v52 = vrot.slane %v2382_v60, 4 }
 0x1f3   : > { %v2736_v48 = vadd.f32 %v5988_v32, %v2735_v11  ;;  %v3102_v44 = vrot.slane %v3039_v50, 4  ;;  %v2389_v13 = vsel %vm1037_vm1, %v2183_v29, 0.0  ;;  %v1959_v1 = vsel %vm1037_vm1, %v6906_v5, -inf }
 0x1f4   : > { %v4162_v47 = vpop.eup %4161  ;;  %v2749_v12 = vmul.f32 %v4158_v49, %v2748_v54  ;;  %v2390_v17 = vrot.slane %v2389_v13, 4  ;;  %v1957_v41 = vrot.slane %v1956_v18, 1  ;;  %v2384_v21 = vadd.f32 %v2383_v52, %v2382_v60 }
 0x1f5   : > { %v4164_v0 = vpop.eup %4163  ;;  %v2740_v28 = vsel %vm6013_vm13, %v5988_v32, %v2736_v48  ;;  %v3118_v45 = vsel %vm1037_vm1, %v3037_v27, %v3102_v44  ;;  %v1629_v15 = vmul.f32 0.6931472, %v4162_v47  ;;  %v1951_v46 = vmax.f32 %v1949_v39, %v1950_v33 }
 0x1f6   : > { %v2750_v6 = vadd.f32 %v4158_v49, %v2749_v12  ;;  %v2391_v62 = vadd.f32 %v2390_v17, %v2389_v13  ;;  %v1220_v40 = vsel %vm1037_vm1, %v6019_v56, -inf  ;;  %v3150_v32 = vsub.f32 %v5846_v14, %v3118_v45  ;;  %v6910_v45 = vld [vmem:[#allocation12_spill] sm:$0xff] }
 0x1f7   : > { %v4166_v35 = vpop.eup %4165  ;;  %v2385_v11 = vrot.slane %v2384_v21, 2  ;;  %v1526_v2 = vsel %vm1037_vm1, %v4164_v0, 0.0  ;;  %v1958_v50 = vmax.f32 %v1956_v18, %v1957_v41  ;;  %v2745_v16 = vsel %vm5995_vm8, %v2744_v26, %v2740_v28 }
 0x1f8   : > { %v2754_v27 = vsel %vm6031_vm14, %v4158_v49, %v2750_v6  ;;  %v2392_v25 = vrot.slane %v2391_v62, 2  ;;  %v1527_v10 = vrot.slane %v1526_v2, 4  ;;  %v1669_v33 = vsub.f32 %v5871_v8, %v1629_v15 }
 0x1f9   : > { %v2759_v39 = vsel %vm6003_vm10, %v2758_v24, %v2754_v27  ;;  %v2386_v54 = vadd.f32 %v2385_v11, %v2384_v21  ;;  %v1533_v14 = vsel %vm1037_vm1, %v4166_v35, 0.0  ;;  %v3246_v53 = vsub.f32 %v3150_v32, %v5986_v3  ;;  %v6909_v3 = vld [vmem:[#allocation20_spill] sm:$0xff]  ;;  %v954_v11 = vpop.f32.mrf.mxu3 }
 0x1fa   : > { %v2942_v29 = vrot.slane %v2759_v39, 4  ;;  %v2393_v60 = vadd.f32 %v2392_v25, %v2391_v62  ;;  %v1528_v48 = vadd.f32 %v1527_v10, %v1526_v2  ;;  %v1534_v18 = vrot.slane %v1533_v14, 4 }
 0x1fb   : > { %v2387_v26 = vrot.slane %v2386_v54, 1  ;;  %v2045_v44 = vrot.slane %v1958_v50, 4  ;;  %v1221_v52 = vrot.slane %v1220_v40, 4  ;;  %v1960_v17 = vrot.slane %v1959_v1, 4 }
 0x1fc   : > { %v2958_v49 = vsel %vm1037_vm1, %v2745_v16, %v2942_v29  ;;  %v2394_v13 = vrot.slane %v2393_v60, 1  ;;  %v1529_v47 = vrot.slane %v1528_v48, 2  ;;  %v1535_v4 = vadd.f32 %v1534_v18, %v1533_v14 }
 0x1fd   : > { %v2990_v24 = vmul.f32 %v5880_v58, %v2958_v49  ;;  %v6051_v8 = vadd.f32 %v2387_v26, %v2386_v54  ;;  %v2061_v12 = vsel %vm1037_vm1, %v1951_v46, %v2045_v44  ;;  %v3199_v5 = vrot.slane %v1669_v33, 4 }
 0x1fe   : > { %v6054_v41 = vadd.f32 %v2394_v13, %v2393_v60  ;;  %v1536_v0 = vrot.slane %v1535_v4, 2  ;;  %v1966_v28 = vsel %vm1037_vm1, %v6909_v3, -inf  ;;  %v6062_v15 = vsub.f32 %v6910_v45, %v2061_v12  ;;  %v974_v13 = vpop.f32.mrf.mxu0  ;;  %v994_v45 = vpop.f32.mrf.mxu1 }
 0x1ff   : > { %v6058_v57 = vmul.f32 %v3246_v53, %v2990_v24  ;;  %4167 = vrcp.f32 %v6051_v8  ;;  %v1222_v58 = vmax.f32 %v1220_v40, %v1221_v52  ;;  %v1668_v21 = vsub.f32 %v5850_v38, %v5990_v55 }
 0x200   : > { %v2769_v6 = vand.u32 2147483647, %v6051_v8  ;;  %4169 = vrcp.f32 %v6054_v41  ;;  %v6068_v62 = vadd.f32 %v1529_v47, %v1528_v48  ;;  %v2771_v46 = vand.u32 2147483648, %v6051_v8 }
 0x201   : > { %v2783_v35 = vand.u32 2147483647, %v6054_v41  ;;  %v2785_v32 = vand.u32 2147483648, %v6054_v41  ;;  %4171 = vlog2.f32 %v6051_v8  ;;  %v1537_v40 = vadd.f32 %v1536_v0, %v1535_v4 }
 0x202   : > { %4173 = vlog2.f32 %v6054_v41  ;;  %v1961_v2 = vmax.f32 %v1959_v1, %v1960_v17  ;;  %v1967_v38 = vrot.slane %v1966_v28, 4  ;;  %vm2765_vm15 = vweird.f32 %v6051_v8 }
 0x203   : > { %v6077_v55 = vsel %vm1037_vm1, %v1668_v21, %v3199_v5  ;;  %v2121_v50 = vmul.f32 1.442695, %v6062_v15  ;;  %v1223_v16 = vrot.slane %v1222_v58, 2  ;;  %vm2779_vm0 = vweird.f32 %v6054_v41 }
 0x204   : > { %v1531_v27 = vrot.slane %v6068_v62, 1  ;;  %v1538_v25 = vrot.slane %v1537_v40, 1  ;;  %v6083_v10 = vadd.f32 %v954_v11, %v4745_v31  ;;  %vm6085_vm2 = vcmp.eq.f32.partialorder %v2769_v6, 8.507059e+37 }
 0x205   : > { %v4168_v39 = vpop.eup %4167  ;;  %v2772_v33 = vor.u32 1.1754944e-38, %v2771_v46  ;;  %vm6089_vm3 = vcmp.eq.f32.partialorder %v2783_v35, 8.507059e+37  ;;  %v2786_v14 = vor.u32 1.1754944e-38, %v2785_v32  ;;  %v1224_v29 = vmax.f32 %v1222_v58, %v1223_v16 }
 0x206   : > { %v4170_v60 = vpop.eup %4169  ;;  %v2761_v48 = vmul.f32 %v4168_v39, %v6051_v8  ;;  %4175 = vpow2.f32 %v2121_v50  ;;  %v1962_v18 = vrot.slane %v1961_v2, 2  ;;  %v1968_v53 = vmax.f32 %v1966_v28, %v1967_v38 }
 0x207   : > { %v4172_v26 = vpop.eup %4171  ;;  %vm2766_vm4 = vweird.f32 %v4168_v39  ;;  %v2775_v44 = vmul.f32 %v4170_v60, %v6054_v41  ;;  %v1225_v52 = vrot.slane %v1224_v29, 1  ;;  %v1227_v49 = vsel %vm1037_vm1, %v6083_v10, -inf }
 0x208   : > { %v4174_v47 = vpop.eup %4173  ;;  %v2762_v4 = vsub.f32 1.0, %v2761_v48  ;;  %vm2780_vm5 = vweird.f32 %v4170_v60  ;;  %v1539_v24 = vadd.f32 %v1538_v25, %v1537_v40  ;;  %v1228_v12 = vrot.slane %v1227_v49, 4  ;;  %vm6103_vm6 = vmor %vm2765_vm15, %vm2766_vm4 }
 0x209   : > { %v2776_v17 = vsub.f32 1.0, %v2775_v44  ;;  %v3041_v5 = vmul.f32 0.6931472, %v4172_v26  ;;  %v3043_v0 = vmul.f32 0.6931472, %v4174_v47  ;;  %v1226_v3 = vmax.f32 %v1224_v29, %v1225_v52  ;;  %vm6115_vm7 = vmor %vm2779_vm0, %vm2780_vm5 }
 0x20a   : > { %v2763_v28 = vmul.f32 %v4168_v39, %v2762_v4  ;;  %v1229_v58 = vmax.f32 %v1227_v49, %v1228_v12  ;;  %v1969_v21 = vrot.slane %v1968_v53, 2  ;;  %v6098_v6 = vadd.f32 %v974_v13, %v4745_v31 }
 0x20b   : > { %v2777_v35 = vmul.f32 %v4170_v60, %v2776_v17  ;;  %v3103_v32 = vrot.slane %v3043_v0, 4  ;;  %v6108_v11 = vsub.f32 %v6019_v56, %v1226_v3  ;;  %v1963_v40 = vmax.f32 %v1961_v2, %v1962_v18 }
 0x20c   : > { %v6110_v38 = vpop.eup %4175  ;;  %v2764_v50 = vadd.f32 %v4168_v39, %v2763_v28  ;;  %v1230_v8 = vrot.slane %v1229_v58, 2  ;;  %v1970_v25 = vmax.f32 %v1968_v53, %v1969_v21  ;;  %v6120_v29 = vadd.f32 %v994_v45, %v4745_v31 }
 0x20d   : > { %v2778_v48 = vadd.f32 %v4170_v60, %v2777_v35  ;;  %v3119_v56 = vsel %vm1037_vm1, %v3041_v5, %v3103_v32  ;;  %4177 = vlog2.f32 %v1539_v24  ;;  %2184 = vst [vmem:[#allocation1] ss:$2 sm:$0xff] %v6110_v38  ;;  %v1346_v2 = vmul.f32 1.442695, %v6108_v11 }
 0x20e   : > { %v2768_v41 = vsel %vm6103_vm6, %v4168_v39, %v2764_v50  ;;  %v3151_v18 = vsub.f32 %v5929_v59, %v3119_v56  ;;  %v1231_v26 = vmax.f32 %v1229_v58, %v1230_v8  ;;  %v1234_v53 = vsel %vm1037_vm1, %v6098_v6, -inf  ;;  %v6920_v50 = vld [vmem:[#allocation35_spill] sm:$0xff] }
 0x20f   : > { %v2782_v44 = vsel %vm6115_vm7, %v4170_v60, %v2778_v48  ;;  %v1532_v52 = vadd.f32 %v1531_v27, %v6068_v62  ;;  %4179 = vpow2.f32 %v1346_v2  ;;  %v1964_v49 = vrot.slane %v1963_v40, 1  ;;  %v6919_v27 = vld [vmem:[#allocation30_spill] sm:$0xff] }
 0x210   : > { %v2773_v13 = vsel %vm6085_vm2, %v2772_v33, %v2768_v41  ;;  %v2787_v47 = vsel %vm6089_vm3, %v2786_v14, %v2782_v44  ;;  %v1232_v39 = vrot.slane %v1231_v26, 1  ;;  %v1971_v4 = vrot.slane %v1970_v25, 1  ;;  %v6921_v41 = vld [vmem:[#allocation31_spill] sm:$0xff]  ;;  %v6922_v44 = vld [vmem:[#allocation16_spill] sm:$0xff] }
 0x211   : > { %v2943_v59 = vrot.slane %v2787_v47, 4  ;;  %v3247_v24 = vsub.f32 %v3151_v18, %v6077_v55  ;;  %v1235_v12 = vrot.slane %v1234_v53, 4  ;;  %v1241_v17 = vsel %vm1037_vm1, %v6120_v29, -inf }
 0x212   : > { %v1233_v60 = vmax.f32 %v1231_v26, %v1232_v39  ;;  %v1972_v5 = vmax.f32 %v1970_v25, %v1971_v4  ;;  %v1242_v62 = vrot.slane %v1241_v17, 4  ;;  %v1973_v0 = vsel %vm1037_vm1, %v6919_v27, -inf }
 0x213   : > { %v4178_v1 = vpop.eup %4177  ;;  %v2959_v33 = vsel %vm1037_vm1, %v2773_v13, %v2943_v59  ;;  %v1965_v54 = vmax.f32 %v1963_v40, %v1964_v49  ;;  %v1236_v14 = vmax.f32 %v1234_v53, %v1235_v12  ;;  %v1974_v3 = vrot.slane %v1973_v0, 4 }
 0x214   : > { %v2991_v45 = vmul.f32 %v5972_v63, %v2959_v33  ;;  %4181 = vlog2.f32 %v1532_v52  ;;  %v2188_v55 = vld.sshfl [vmem:[#allocation1] sm:$0xff pattern:$0x75316420]  ;;  %v2189_v28 = vld.sshfl [vmem:[#allocation1 + $0x8] sm:$0xff pattern:$0x75316420]  ;;  %v6145_v58 = vsub.f32 %v6083_v10, %v1233_v60  ;;  %v1243_v21 = vmax.f32 %v1241_v17, %v1242_v62 }
 0x215   : > { %v4180_v46 = vpop.eup %4179  ;;  %v2396_v35 = vsel %vm1037_vm1, %v2188_v55, 0.0  ;;  %v2403_v32 = vsel %vm1037_vm1, %v2189_v28, 0.0  ;;  %3284 = vst [vmem:[#allocation1] ss:$2 sm:$0xff] %v6920_v50  ;;  %v2046_v16 = vrot.slane %v1972_v5, 4  ;;  %v1237_v40 = vrot.slane %v1236_v14, 2 }
 0x216   : > { %v6150_v8 = vmul.f32 %v3247_v24, %v2991_v45  ;;  %v2397_v25 = vrot.slane %v2396_v35, 4  ;;  %v2404_v63 = vrot.slane %v2403_v32, 4  ;;  %v1540_v48 = vsel %vm1037_vm1, %v4180_v46, 0.0 }
 0x217   : > { %v1541_v56 = vrot.slane %v1540_v48, 4  ;;  %v1348_v10 = vmul.f32 1.442695, %v6145_v58  ;;  %v2062_v2 = vsel %vm1037_vm1, %v1965_v54, %v2046_v16  ;;  %v1980_v18 = vsel %vm1037_vm1, %v6921_v41, -inf }
 0x218   : > { %v2398_v26 = vadd.f32 %v2397_v25, %v2396_v35  ;;  %v2405_v53 = vadd.f32 %v2404_v63, %v2403_v32  ;;  %v6158_v52 = vsub.f32 %v6922_v44, %v2062_v2  ;;  %v1238_v49 = vmax.f32 %v1236_v14, %v1237_v40  ;;  %v6923_v14 = vld [vmem:[#allocation32_spill] sm:$0xff] }
 0x219   : > { %v1633_v13 = vmul.f32 0.6931472, %v4178_v1  ;;  %v1542_v47 = vadd.f32 %v1541_v56, %v1540_v48  ;;  %4183 = vpow2.f32 %v1348_v10  ;;  %v1244_v39 = vrot.slane %v1243_v21, 2  ;;  %v6924_v1 = vld [vmem:[#allocation42_spill] sm:$0xff] }
 0x21a   : > { %v4182_v4 = vpop.eup %4181  ;;  %v2399_v59 = vrot.slane %v2398_v26, 2  ;;  %v2406_v24 = vrot.slane %v2405_v53, 2  ;;  %v2123_v12 = vmul.f32 1.442695, %v6158_v52  ;;  %v1239_v17 = vrot.slane %v1238_v49, 1 }
 0x21b   : > { %v1543_v60 = vrot.slane %v1542_v47, 2  ;;  %v1245_v5 = vmax.f32 %v1243_v21, %v1244_v39  ;;  %v1975_v62 = vmax.f32 %v1973_v0, %v1974_v3  ;;  %v1981_v27 = vrot.slane %v1980_v18, 4 }
 0x21c   : > { %v2400_v33 = vadd.f32 %v2399_v59, %v2398_v26  ;;  %v2407_v54 = vadd.f32 %v2406_v24, %v2405_v53  ;;  %4185 = vpow2.f32 %v2123_v12  ;;  %v1240_v45 = vmax.f32 %v1238_v49, %v1239_v17  ;;  %v6927_v17 = vld [vmem:[#allocation40_spill] sm:$0xff] }
 0x21d   : > { %v6925_v55 = vsub.f32 %v6923_v14, %v6924_v1  ;;  %v1671_v46 = vsub.f32 %v6001_v9, %v1633_v13  ;;  %v1544_v35 = vadd.f32 %v1543_v60, %v1542_v47  ;;  %v1246_v32 = vrot.slane %v1245_v5, 1  ;;  %v6926_v9 = vld [vmem:[#allocation33_spill] sm:$0xff] }
 0x21e   : > { %v2401_v50 = vrot.slane %v2400_v33, 1  ;;  %v2408_v16 = vrot.slane %v2407_v54, 1  ;;  %v1976_v40 = vrot.slane %v1975_v62, 2  ;;  %v1982_v21 = vmax.f32 %v1980_v18, %v1981_v27 }
 0x21f   : > { %v3206_v28 = vsel %vm1037_vm1, %v6925_v55, %v5963_v22  ;;  %v4184_v0 = vpop.eup %4183  ;;  %v1631_v3 = vmul.f32 0.6931472, %v4182_v4  ;;  %v1545_v25 = vrot.slane %v1544_v35, 1  ;;  %v6168_v63 = vsub.f32 %v6098_v6, %v1240_v45 }
 0x220   : > { %v1247_v48 = vmax.f32 %v1245_v5, %v1246_v32  ;;  %v6170_v56 = vadd.f32 %v2401_v50, %v2400_v33  ;;  %v6172_v10 = vadd.f32 %v2408_v16, %v2407_v54  ;;  %v1547_v22 = vsel %vm1037_vm1, %v4184_v0, 0.0 }
 0x221   : > { %v6177_v2 = vmul.f32 %v6926_v9, %v5958_v61  ;;  %v6182_v41 = vsub.f32 %v3142_v34, %v3206_v28  ;;  %v1548_v18 = vrot.slane %v1547_v22, 4  ;;  %v3200_v53 = vrot.slane %v1671_v46, 4  ;;  %v6932_v9 = vld [vmem:[#allocation36_spill] sm:$0xff] }
 0x222   : > { %v6185_v6 = vsub.f32 %v6120_v29, %v1247_v48  ;;  %v6187_v26 = vpop.eup %4185  ;;  %4187 = vrcp.f32 %v6170_v56  ;;  %v1977_v44 = vmax.f32 %v1975_v62, %v1976_v40  ;;  %v1983_v49 = vrot.slane %v1982_v21, 2 }
 0x223   : > { %v1670_v13 = vsub.f32 %v5982_v37, %v1631_v3  ;;  %4189 = vrcp.f32 %v6172_v10  ;;  %v1546_v61 = vadd.f32 %v1545_v25, %v1544_v35  ;;  %2185 = vst [vmem:[#allocation1 + $0x10] ss:$2 sm:$0xff] %v6187_v26  ;;  %v1350_v7 = vmul.f32 1.442695, %v6168_v63 }
 0x224   : > { %v2797_v30 = vand.u32 2147483647, %v6170_v56  ;;  %v2799_v34 = vand.u32 2147483648, %v6170_v56  ;;  %4191 = vlog2.f32 %v6170_v56  ;;  %v1549_v29 = vadd.f32 %v1548_v18, %v1547_v22 }
 0x225   : > { %v2811_v47 = vand.u32 2147483647, %v6172_v10  ;;  %v2813_v39 = vand.u32 2147483648, %v6172_v10  ;;  %4193 = vlog2.f32 %v6172_v10  ;;  %v1352_v37 = vmul.f32 1.442695, %v6185_v6 }
 0x226   : > { %v6202_v4 = vsel %vm1037_vm1, %v1670_v13, %v3200_v53  ;;  %v1550_v59 = vrot.slane %v1549_v29, 2  ;;  %v1978_v24 = vrot.slane %v1977_v44, 1  ;;  %v1984_v12 = vmax.f32 %v1982_v21, %v1983_v49 }
 0x227   : > { %vm2793_vm8 = vweird.f32 %v6170_v56  ;;  %vm2807_vm9 = vweird.f32 %v6172_v10  ;;  %4195 = vpow2.f32 %v1350_v7  ;;  %v6208_v60 = vsel %vm1037_vm1, %v6927_v17, -inf  ;;  %v1014_v17 = vpop.f32.mrf.mxu2 }
 0x228   : > { %v4188_v5 = vpop.eup %4187  ;;  %vm6210_vm10 = vcmp.eq.f32.partialorder %v2797_v30, 8.507059e+37  ;;  %v2800_v27 = vor.u32 1.1754944e-38, %v2799_v34  ;;  %v1551_v33 = vadd.f32 %v1550_v59, %v1549_v29  ;;  %4197 = vpow2.f32 %v1352_v37 }
 0x229   : > { %v4190_v54 = vpop.eup %4189  ;;  %v2789_v45 = vmul.f32 %v4188_v5, %v6170_v56  ;;  %vm6215_vm11 = vcmp.eq.f32.partialorder %v2811_v47, 8.507059e+37  ;;  %v2814_v1 = vor.u32 1.1754944e-38, %v2813_v39  ;;  %4199 = vlog2.f32 %v1546_v61 }
 0x22a   : > { %v4192_v55 = vpop.eup %4191  ;;  %v2803_v28 = vmul.f32 %v4190_v54, %v6172_v10  ;;  %v1552_v46 = vrot.slane %v1551_v33, 1  ;;  %v2190_v35 = vld.sshfl [vmem:[#allocation1 + $0x10] sm:$0xff pattern:$0x75316420]  ;;  %v1979_v32 = vmax.f32 %v1977_v44, %v1978_v24  ;;  %v1985_v50 = vrot.slane %v1984_v12, 1 }
 0x22b   : > { %v4194_v16 = vpop.eup %4193  ;;  %v2790_v40 = vsub.f32 1.0, %v2789_v45  ;;  %vm2794_vm12 = vweird.f32 %v4188_v5  ;;  %vm2808_vm13 = vweird.f32 %v4190_v54  ;;  %v3045_v21 = vmul.f32 0.6931472, %v4192_v55  ;;  %v2191_v0 = vld.sshfl [vmem:[#allocation1 + $0x18] sm:$0xff pattern:$0x75316420] }
 0x22c   : > { %v2804_v3 = vsub.f32 1.0, %v2803_v28  ;;  %v3047_v25 = vmul.f32 0.6931472, %v4194_v16  ;;  %v1553_v48 = vadd.f32 %v1552_v46, %v1551_v33  ;;  %v2410_v22 = vsel %vm1037_vm1, %v2190_v35, 0.0  ;;  %3286 = vst [vmem:[#allocation1 + $0x10] ss:$2 sm:$0xff] %v6932_v9  ;;  %vm6227_vm14 = vmor %vm2793_vm8, %vm2794_vm12 }
 0x22d   : > { %v4196_v18 = vpop.eup %4195  ;;  %v2791_v53 = vmul.f32 %v4188_v5, %v2790_v40  ;;  %v2411_v49 = vrot.slane %v2410_v22, 4  ;;  %v2417_v13 = vsel %vm1037_vm1, %v2191_v0, 0.0  ;;  %v1988_v44 = vrot.slane %v6208_v60, 4  ;;  %vm6234_vm15 = vmor %vm2807_vm9, %vm2808_vm13 }
 0x22e   : > { %v4198_v61 = vpop.eup %4197  ;;  %v2805_v30 = vmul.f32 %v4190_v54, %v2804_v3  ;;  %v3104_v34 = vrot.slane %v3047_v25, 4  ;;  %4201 = vlog2.f32 %v1553_v48  ;;  %v2418_v29 = vrot.slane %v2417_v13, 4 }
 0x22f   : > { %v4200_v47 = vpop.eup %4199  ;;  %v2792_v39 = vadd.f32 %v4188_v5, %v2791_v53  ;;  %v2412_v59 = vadd.f32 %v2411_v49, %v2410_v22  ;;  %v1554_v56 = vsel %vm1037_vm1, %v4196_v18, 0.0  ;;  %v1986_v24 = vmax.f32 %v1984_v12, %v1985_v50 }
 0x230   : > { %v2806_v33 = vadd.f32 %v4190_v54, %v2805_v30  ;;  %v3120_v45 = vsel %vm1037_vm1, %v3045_v21, %v3104_v34  ;;  %v2419_v55 = vadd.f32 %v2418_v29, %v2417_v13  ;;  %v1555_v28 = vrot.slane %v1554_v56, 4  ;;  %v1034_v13 = vpop.f32.mrf.mxu3 }
 0x231   : > { %v2796_v46 = vsel %vm6227_vm14, %v4188_v5, %v2792_v39  ;;  %v3152_v35 = vsub.f32 %v6062_v15, %v3120_v45  ;;  %v2413_v10 = vrot.slane %v2412_v59, 2  ;;  %v1561_v16 = vsel %vm1037_vm1, %v4198_v61, 0.0  ;;  %v6937_v61 = vld [vmem:[#allocation41_spill] sm:$0xff] }
 0x232   : > { %v2810_v40 = vsel %vm6234_vm15, %v4190_v54, %v2806_v33  ;;  %v2420_v0 = vrot.slane %v2419_v55, 2  ;;  %v1556_v3 = vadd.f32 %v1555_v28, %v1554_v56  ;;  %v6247_v12 = vadd.f32 %v1014_v17, %v4745_v31 }
 0x233   : > { %v2801_v50 = vsel %vm6210_vm10, %v2800_v27, %v2796_v46  ;;  %v2815_v21 = vsel %vm6215_vm11, %v2814_v1, %v2810_v40  ;;  %v2414_v5 = vadd.f32 %v2413_v10, %v2412_v59  ;;  %v1562_v25 = vrot.slane %v1561_v16, 4 }
 0x234   : > { %v4202_v15 = vpop.eup %4201  ;;  %v2944_v48 = vrot.slane %v2815_v21, 4  ;;  %v2421_v22 = vadd.f32 %v2420_v0, %v2419_v55  ;;  %v1557_v9 = vrot.slane %v1556_v3, 2  ;;  %v2047_v18 = vrot.slane %v1986_v24, 4 }
 0x235   : > { %v3248_v54 = vsub.f32 %v3152_v35, %v6202_v4  ;;  %v2415_v53 = vrot.slane %v2414_v5, 1  ;;  %v1563_v49 = vadd.f32 %v1562_v25, %v1561_v16  ;;  %v1994_v7 = vsel %vm1037_vm1, %v6937_v61, -inf }
 0x236   : > { %v2960_v62 = vsel %vm1037_vm1, %v2801_v50, %v2944_v48  ;;  %v1637_v27 = vmul.f32 0.6931472, %v4202_v15  ;;  %v2422_v14 = vrot.slane %v2421_v22, 1  ;;  %v2063_v1 = vsel %vm1037_vm1, %v1979_v32, %v2047_v18  ;;  %v3291_v15 = vld.sshfl [vmem:[#allocation1] sm:$0xff pattern:$0x75316420] }
 0x237   : > { %v2992_v30 = vmul.f32 %v6110_v38, %v2960_v62  ;;  %v6259_v34 = vadd.f32 %v2415_v53, %v2414_v5  ;;  %v1558_v29 = vadd.f32 %v1557_v9, %v1556_v3  ;;  %v1248_v4 = vsel %vm1037_vm1, %v6247_v12, -inf  ;;  %v6938_v38 = vld [vmem:[#allocation22_spill] sm:$0xff]  ;;  %v3292_v53 = vld.sshfl [vmem:[#allocation1 + $0x8] sm:$0xff pattern:$0x75316420] }
 0x238   : > { %v6263_v39 = vmul.f32 0.6931472, %v4200_v47  ;;  %v6265_v37 = vadd.f32 %v2422_v14, %v2421_v22  ;;  %v6268_v59 = vadd.f32 %v1034_v13, %v4745_v31  ;;  %v1995_v56 = vrot.slane %v1994_v7, 4  ;;  %3299 = vst [vmem:[#allocation1] ss:$2 sm:$0xff] %v5340_v51 }
 0x239   : > { %v6270_v24 = vmul.f32 %v3248_v54, %v2992_v30  ;;  %4203 = vrcp.f32 %v6259_v34  ;;  %v1564_v32 = vrot.slane %v1563_v49, 2  ;;  %v6274_v17 = vsub.f32 %v6938_v38, %v2063_v1 }
 0x23a   : > { %v1673_v33 = vsub.f32 %v6145_v58, %v1637_v27  ;;  %v2827_v45 = vand.u32 2147483648, %v6259_v34  ;;  %4205 = vrcp.f32 %v6265_v37  ;;  %v1249_v47 = vrot.slane %v1248_v4, 4 }
 0x23b   : > { %v2825_v55 = vand.u32 2147483647, %v6259_v34  ;;  %v2839_v31 = vand.u32 2147483647, %v6265_v37  ;;  %4207 = vlog2.f32 %v6259_v34  ;;  %v1559_v28 = vrot.slane %v1558_v29, 1 }
 0x23c   : > { %v1672_v46 = vsub.f32 %v6108_v11, %v6263_v39  ;;  %vm2821_vm0 = vweird.f32 %v6259_v34  ;;  %4209 = vlog2.f32 %v6265_v37  ;;  %v1989_v58 = vmax.f32 %v6208_v60, %v1988_v44 }
 0x23d   : > { %vm2835_vm2 = vweird.f32 %v6265_v37  ;;  %v2841_v35 = vand.u32 2147483648, %v6265_v37  ;;  %v1565_v10 = vadd.f32 %v1564_v32, %v1563_v49  ;;  %v2125_v16 = vmul.f32 1.442695, %v6274_v17 }
 0x23e   : > { %v6292_v40 = vor.u32 1.1754944e-38, %v2827_v45  ;;  %v3201_v0 = vrot.slane %v1673_v33, 4  ;;  %v1250_v3 = vmax.f32 %v1248_v4, %v1249_v47  ;;  %v1255_v11 = vsel %vm1037_vm1, %v6268_v59, -inf }
 0x23f   : > { %v6296_v50 = vpop.eup %4203  ;;  %vm6298_vm3 = vcmp.eq.f32.partialorder %v2825_v55, 8.507059e+37  ;;  %vm6302_vm4 = vcmp.eq.f32.partialorder %v2839_v31, 8.507059e+37  ;;  %v1560_v44 = vadd.f32 %v1559_v28, %v1558_v29  ;;  %v1566_v5 = vrot.slane %v1565_v10, 1  ;;  %v3293_v28 = vld.sshfl [vmem:[#allocation1 + $0x10] sm:$0xff pattern:$0x75316420] }
 0x240   : > { %4211 = vpow2.f32 %v2125_v16  ;;  %v1256_v25 = vrot.slane %v1255_v11, 4  ;;  %v4206_v48 = vpop.eup %4205  ;;  %v2817_v22 = vmul.f32 %v6296_v50, %v6259_v34  ;;  %v1251_v9 = vrot.slane %v1250_v3, 2 }
 0x241   : > { %v1990_v18 = vrot.slane %v1989_v58, 2  ;;  %v1996_v54 = vmax.f32 %v1994_v7, %v1995_v56  ;;  %v4208_v49 = vpop.eup %4207  ;;  %vm2822_vm5 = vweird.f32 %v6296_v50  ;;  %v2831_v13 = vmul.f32 %v4206_v48, %v6265_v37 }
 0x242   : > { %v1567_v61 = vadd.f32 %v1566_v5, %v1565_v10  ;;  %v1257_v62 = vmax.f32 %v1255_v11, %v1256_v25  ;;  %v4210_v27 = vpop.eup %4209  ;;  %v2818_v14 = vsub.f32 1.0, %v2817_v22  ;;  %vm2836_vm6 = vweird.f32 %v4206_v48  ;;  %vm6318_vm7 = vmor %vm2821_vm0, %vm2822_vm5  ;;  %v6332_v11 = vld.sshfl [vmem:[#allocation1 + $0x18] sm:$0xff pattern:$0x75316420] }
 0x243   : > { %v3049_v1 = vmul.f32 0.6931472, %v4208_v49  ;;  %v1252_v30 = vmax.f32 %v1250_v3, %v1251_v9  ;;  %v2832_v29 = vsub.f32 1.0, %v2831_v13  ;;  %v3051_v4 = vmul.f32 0.6931472, %v4210_v27  ;;  %vm6326_vm8 = vmor %vm2835_vm2, %vm2836_vm6 }
 0x244   : > { %4213 = vlog2.f32 %v1567_v61  ;;  %v1258_v39 = vrot.slane %v1257_v62, 2  ;;  %v2819_v7 = vmul.f32 %v6296_v50, %v2818_v14  ;;  %v2842_v56 = vor.u32 1.1754944e-38, %v2841_v35  ;;  %3300 = vst [vmem:[#allocation1 + $0x10] ss:$2 sm:$0xff] %v5443_v23  ;;  %v6947_v35 = vld [vmem:[#allocation28_spill] sm:$0xff] }
 0x245   : > { %v1253_v32 = vrot.slane %v1252_v30, 1  ;;  %v1997_v38 = vrot.slane %v1996_v54, 2  ;;  %v2833_v45 = vmul.f32 %v4206_v48, %v2832_v29  ;;  %v3105_v47 = vrot.slane %v3051_v4, 4 }
 0x246   : > { %v6312_v33 = vpop.eup %4211  ;;  %v1259_v55 = vmax.f32 %v1257_v62, %v1258_v39  ;;  %v1991_v31 = vmax.f32 %v1989_v58, %v1990_v18  ;;  %v2820_v10 = vadd.f32 %v6296_v50, %v2819_v7  ;;  %v3217_v34 = vsel %vm1037_vm1, %v1672_v46, %v3201_v0 }
 0x247   : > { %2186 = vst [vmem:[#allocation1 + $0x20] ss:$2 sm:$0xff] %v6312_v33  ;;  %v1254_v16 = vmax.f32 %v1252_v30, %v1253_v32  ;;  %v1998_v3 = vmax.f32 %v1996_v54, %v1997_v38  ;;  %v2834_v5 = vadd.f32 %v4206_v48, %v2833_v45  ;;  %v3121_v58 = vsel %vm1037_vm1, %v3049_v1, %v3105_v47  ;;  %v6367_v47 = vld.sshfl [vmem:[#allocation1] sm:$0xff pattern:$0x75316420] }
 0x248   : > { %v1260_v25 = vrot.slane %v1259_v55, 1  ;;  %v3367_v37 = vsel %vm1037_vm1, %v3291_v15, 0.0  ;;  %v2824_v22 = vsel %vm6318_vm7, %v6296_v50, %v2820_v10  ;;  %v3153_v46 = vsub.f32 %v6158_v52, %v3121_v58 }
 0x249   : > { %v6342_v0 = vsub.f32 %v6247_v12, %v1254_v16  ;;  %v1999_v9 = vrot.slane %v1998_v3, 1  ;;  %v2838_v54 = vsel %vm6326_vm8, %v4206_v48, %v2834_v5  ;;  %4215 = vlog2.f32 %v1560_v44 }
 0x24a   : > { %v4214_v18 = vpop.eup %4213  ;;  %v1261_v49 = vmax.f32 %v1259_v55, %v1260_v25  ;;  %v1992_v13 = vrot.slane %v1991_v31, 1  ;;  %v3254_v23 = vmul.f32 %v6182_v41, %v6177_v2  ;;  %v2829_v50 = vsel %vm6298_vm3, %v6292_v40, %v2824_v22  ;;  %v6369_v55 = vld.sshfl [vmem:[#allocation1 + $0x8] sm:$0xff pattern:$0x75316420] }
 0x24b   : > { %v2843_v52 = vsel %vm6302_vm4, %v2842_v56, %v2838_v54  ;;  %v1354_v12 = vmul.f32 1.442695, %v6342_v0  ;;  %v2000_v48 = vmax.f32 %v1998_v3, %v1999_v9  ;;  %v3368_v44 = vrot.slane %v3367_v37, 4  ;;  %3311 = vst [vmem:[#allocation1] ss:$2 sm:$0xff] %v5841_v36 }
 0x24c   : > { %v2945_v15 = vrot.slane %v2843_v52, 4  ;;  %v6355_v61 = vsub.f32 %v6268_v59, %v1261_v49  ;;  %v3249_v62 = vsub.f32 %v3153_v46, %v3217_v34  ;;  %v1641_v27 = vmul.f32 0.6931472, %v4214_v18  ;;  %v6379_v36 = vld.sshfl [vmem:[#allocation1 + $0x10] sm:$0xff pattern:$0x75316420] }
 0x24d   : > { %4217 = vpow2.f32 %v1354_v12  ;;  %v3374_v2 = vsel %vm1037_vm1, %v3292_v53, 0.0  ;;  %v1993_v14 = vmax.f32 %v1991_v31, %v1992_v13  ;;  %v2048_v7 = vrot.slane %v2000_v48, 4  ;;  %v6382_v48 = vld.sshfl [vmem:[#allocation1 + $0x18] sm:$0xff pattern:$0x75316420] }
 0x24e   : > { %v2961_v41 = vsel %vm1037_vm1, %v2829_v50, %v2945_v15  ;;  %v2192_v21 = vld.sshfl [vmem:[#allocation1 + $0x20] sm:$0xff pattern:$0x75316420]  ;;  %v2193_v40 = vld.sshfl [vmem:[#allocation1 + $0x28] sm:$0xff pattern:$0x75316420]  ;;  %v3369_v56 = vadd.f32 %v3368_v44, %v3367_v37  ;;  %v1675_v9 = vsub.f32 %v6185_v6, %v1641_v27 }
 0x24f   : > { %v2993_v60 = vmul.f32 %v6187_v26, %v2961_v41  ;;  %v2424_v1 = vsel %vm1037_vm1, %v2192_v21, 0.0  ;;  %v2431_v30 = vsel %vm1037_vm1, %v2193_v40, 0.0  ;;  %3288 = vst [vmem:[#allocation1 + $0x20] ss:$2 sm:$0xff] %v3254_v23  ;;  %v1356_v59 = vmul.f32 1.442695, %v6355_v61  ;;  %v4216_v29 = vpop.eup %4215 }
 0x250   : > { %v2425_v4 = vrot.slane %v2424_v1, 4  ;;  %v2432_v39 = vrot.slane %v2431_v30, 4  ;;  %v3375_v32 = vrot.slane %v3374_v2, 4  ;;  %v3381_v38 = vsel %vm1037_vm1, %v3293_v28, 0.0  ;;  %3312 = vst [vmem:[#allocation1 + $0x10] ss:$2 sm:$0xff] %v5952_v20 }
 0x251   : > { %v6363_v53 = vmul.f32 %v3249_v62, %v2993_v60  ;;  %4219 = vpow2.f32 %v1356_v59  ;;  %v2064_v45 = vsel %vm1037_vm1, %v1993_v14, %v2048_v7  ;;  %v1639_v10 = vmul.f32 0.6931472, %v4216_v29 }
 0x252   : > { %v2426_v51 = vadd.f32 %v2425_v4, %v2424_v1  ;;  %v2433_v26 = vadd.f32 %v2432_v39, %v2431_v30  ;;  %v6372_v34 = vsub.f32 %v6947_v35, %v2064_v45  ;;  %v3376_v16 = vadd.f32 %v3375_v32, %v3374_v2  ;;  %v6416_v35 = vld.sshfl [vmem:[#allocation1] sm:$0xff pattern:$0x75316420] }
 0x253   : > { %v4218_v31 = vpop.eup %4217  ;;  %v3370_v58 = vrot.slane %v3369_v56, 2  ;;  %v3382_v46 = vrot.slane %v3381_v38, 4  ;;  %v1674_v60 = vsub.f32 %v6168_v63, %v1639_v10  ;;  %v3388_v29 = vsel %vm1037_vm1, %v6332_v11, 0.0 }
 0x254   : > { %v2427_v3 = vrot.slane %v2426_v51, 2  ;;  %v2434_v5 = vrot.slane %v2433_v26, 2  ;;  %v1568_v28 = vsel %vm1037_vm1, %v4218_v31, 0.0  ;;  %v2127_v37 = vmul.f32 1.442695, %v6372_v34 }
 0x255   : > { %v1569_v25 = vrot.slane %v1568_v28, 4  ;;  %v3377_v22 = vrot.slane %v3376_v16, 2  ;;  %v3371_v44 = vadd.f32 %v3370_v58, %v3369_v56  ;;  %v3383_v2 = vadd.f32 %v3382_v46, %v3381_v38 }
 0x256   : > { %v2428_v18 = vadd.f32 %v2427_v3, %v2426_v51  ;;  %v2435_v54 = vadd.f32 %v2434_v5, %v2433_v26  ;;  %v3295_v49 = vld.sshfl [vmem:[#allocation1 + $0x20] sm:$0xff pattern:$0x75316420]  ;;  %v3296_v13 = vld.sshfl [vmem:[#allocation1 + $0x28] sm:$0xff pattern:$0x75316420]  ;;  %4221 = vpow2.f32 %v2127_v37 }
 0x257   : > { %v4220_v23 = vpop.eup %4219  ;;  %v1570_v50 = vadd.f32 %v1569_v25, %v1568_v28  ;;  %3301 = vst [vmem:[#allocation1 + $0x20] ss:$2 sm:$0xff] %v5579_v42  ;;  %v3378_v27 = vadd.f32 %v3377_v22, %v3376_v16  ;;  %v3202_v42 = vrot.slane %v1675_v9, 4  ;;  %v3372_v1 = vrot.slane %v3371_v44, 1 }
 0x258   : > { %v2429_v52 = vrot.slane %v2428_v18, 1  ;;  %v2436_v12 = vrot.slane %v2435_v54, 1  ;;  %v1575_v15 = vsel %vm1037_vm1, %v4220_v23, 0.0  ;;  %v3384_v20 = vrot.slane %v3383_v2, 2 }
 0x259   : > { %v1571_v62 = vrot.slane %v1570_v50, 2  ;;  %v1576_v6 = vrot.slane %v1575_v15, 4  ;;  %v3379_v59 = vrot.slane %v3378_v27, 1  ;;  %v6399_v39 = vsel %vm1037_vm1, %v1674_v60, %v3202_v42  ;;  %v6427_v25 = vld.sshfl [vmem:[#allocation1 + $0x8] sm:$0xff pattern:$0x75316420] }
 0x25a   : > { %v6385_v41 = vadd.f32 %v2429_v52, %v2428_v18  ;;  %v6387_v21 = vadd.f32 %v2436_v12, %v2435_v54  ;;  %v6407_v38 = vsel %vm1037_vm1, %v3295_v49, 0.0  ;;  %v6412_v45 = vadd.f32 %v3372_v1, %v3371_v44  ;;  %3323 = vst [vmem:[#allocation1] ss:$2 sm:$0xff] %v6270_v24 }
 0x25b   : > { %v1572_v40 = vadd.f32 %v1571_v62, %v1570_v50  ;;  %v1577_v14 = vadd.f32 %v1576_v6, %v1575_v15  ;;  %v3389_v31 = vrot.slane %v3388_v29, 4  ;;  %v6418_v16 = vadd.f32 %v3379_v59, %v3378_v27 }
 0x25c   : > { %4223 = vrcp.f32 %v6385_v41  ;;  %v6391_v30 = vpop.eup %4221  ;;  %v2853_v4 = vand.u32 2147483647, %v6385_v41  ;;  %v2855_v7 = vand.u32 2147483648, %v6385_v41  ;;  %v2867_v11 = vand.u32 2147483647, %v6387_v21 }
 0x25d   : > { %4225 = vrcp.f32 %v6387_v21  ;;  %v1573_v63 = vrot.slane %v1572_v40, 1  ;;  %2187 = vst [vmem:[#allocation1 + $0x30] ss:$2 sm:$0xff] %v6391_v30  ;;  %v1578_v56 = vrot.slane %v1577_v14, 2  ;;  %vm2849_vm9 = vweird.f32 %v6385_v41 }
 0x25e   : > { %4227 = vlog2.f32 %v6385_v41  ;;  %v6404_v32 = vld.sshfl [vmem:[#allocation1 + $0x20] sm:$0xff pattern:$0x75316420]  ;;  %v6410_v26 = vld.sshfl [vmem:[#allocation1 + $0x28] sm:$0xff pattern:$0x75316420]  ;;  %v6420_v3 = vadd.f32 %v3384_v20, %v3383_v2  ;;  %v3390_v37 = vadd.f32 %v3389_v31, %v3388_v29  ;;  %vm2863_vm12 = vweird.f32 %v6387_v21 }
 0x25f   : > { %4229 = vlog2.f32 %v6387_v21  ;;  %v1574_v51 = vadd.f32 %v1573_v63, %v1572_v40  ;;  %v1579_v10 = vadd.f32 %v1578_v56, %v1577_v14  ;;  %3313 = vst [vmem:[#allocation1 + $0x20] ss:$2 sm:$0xff] %v6058_v57  ;;  %vm6422_vm10 = vcmp.eq.f32.partialorder %v2853_v4, 8.507059e+37 }
 0x260   : > { %v2869_v58 = vand.u32 2147483648, %v6387_v21  ;;  %v3402_v22 = vsel %vm1037_vm1, %v3296_v13, 0.0  ;;  %v2856_v9 = vor.u32 1.1754944e-38, %v2855_v7  ;;  %v3396_v54 = vrot.slane %v6407_v38, 4 }
 0x261   : > { %v1580_v18 = vrot.slane %v1579_v10, 1  ;;  %4231 = vlog2.f32 %v1574_v51  ;;  %v3391_v50 = vrot.slane %v3390_v37, 2  ;;  %v3403_v52 = vrot.slane %v3402_v22, 4 }
 0x262   : > { %v4224_v5 = vpop.eup %4223  ;;  %vm6450_vm0 = vcmp.eq.f32.partialorder %v2867_v11, 8.507059e+37 }
 0x263   : > { %v4226_v46 = vpop.eup %4225  ;;  %v2845_v57 = vmul.f32 %v4224_v5, %v6385_v41  ;;  %vm2850_vm11 = vweird.f32 %v4224_v5  ;;  %v1581_v13 = vadd.f32 %v1580_v18, %v1579_v10  ;;  %v3392_v41 = vadd.f32 %v3391_v50, %v3390_v37  ;;  %v6457_v18 = vld.sshfl [vmem:[#allocation1 + $0x18] sm:$0xff pattern:$0x75316420] }
 0x264   : > { %v4228_v49 = vpop.eup %4227  ;;  %v2859_v23 = vmul.f32 %v4226_v46, %v6387_v21  ;;  %v2194_v62 = vld.sshfl [vmem:[#allocation1 + $0x30] sm:$0xff pattern:$0x75316420]  ;;  %vm2864_vm13 = vweird.f32 %v4226_v46  ;;  %v2195_v24 = vld.sshfl [vmem:[#allocation1 + $0x38] sm:$0xff pattern:$0x75316420]  ;;  %vm6440_vm14 = vmor %vm2849_vm9, %vm2850_vm11  ;;  %v3404_v37 = vadd.f32 %v3403_v52, %v3402_v22 }
 0x265   : > { %v4230_v12 = vpop.eup %4229  ;;  %v2846_v15 = vsub.f32 1.0, %v2845_v57  ;;  %v3053_v44 = vmul.f32 0.6931472, %v4228_v49  ;;  %4233 = vlog2.f32 %v1581_v13  ;;  %v2438_v42 = vsel %vm1037_vm1, %v2194_v62, 0.0  ;;  %3290 = vst [vmem:[#allocation1 + $0x30] ss:$2 sm:$0xff] %v5256_v43  ;;  %vm6446_vm15 = vmor %vm2863_vm12, %vm2864_vm13 }
 0x266   : > { %v2860_v6 = vsub.f32 1.0, %v2859_v23  ;;  %v3055_v27 = vmul.f32 0.6931472, %v4230_v12  ;;  %v2445_v40 = vsel %vm1037_vm1, %v2195_v24, 0.0  ;;  %v2439_v59 = vrot.slane %v2438_v42, 4 }
 0x267   : > { %v2847_v2 = vmul.f32 %v4224_v5, %v2846_v15  ;;  %v2446_v20 = vrot.slane %v2445_v40, 4  ;;  %v2870_v43 = vor.u32 1.1754944e-38, %v2869_v58  ;;  %v4232_v7 = vpop.eup %4231  ;;  %v6455_v57 = vld.sshfl [vmem:[#allocation1 + $0x10] sm:$0xff pattern:$0x75316420]  ;;  %v3397_v58 = vadd.f32 %v3396_v54, %v6407_v38 }
 0x268   : > { %v2861_v60 = vmul.f32 %v4226_v46, %v2860_v6  ;;  %v3106_v1 = vrot.slane %v3055_v27, 4  ;;  %v2440_v31 = vadd.f32 %v2439_v59, %v2438_v42  ;;  %3324 = vst [vmem:[#allocation1 + $0x10] ss:$2 sm:$0xff] %v6363_v53  ;;  %v3386_v12 = vrot.slane %v6420_v3, 1 }
 0x269   : > { %v2848_v29 = vadd.f32 %v4224_v5, %v2847_v2  ;;  %v2447_v10 = vadd.f32 %v2446_v20, %v2445_v40  ;;  %v3393_v13 = vrot.slane %v3392_v41, 1  ;;  %v3398_v6 = vrot.slane %v3397_v58, 2 }
 0x26a   : > { %v2862_v56 = vadd.f32 %v4226_v46, %v2861_v60  ;;  %v3122_v51 = vsel %vm1037_vm1, %v3053_v44, %v3106_v1  ;;  %v2441_v23 = vrot.slane %v2440_v31, 2  ;;  %v3405_v27 = vrot.slane %v3404_v37, 2 }
 0x26b   : > { %v2852_v21 = vsel %vm6440_vm14, %v4224_v5, %v2848_v29  ;;  %v3154_v11 = vsub.f32 %v6274_v17, %v3122_v51  ;;  %v2448_v50 = vrot.slane %v2447_v10, 2  ;;  %v4234_v15 = vpop.eup %4233  ;;  %v1643_v17 = vmul.f32 0.6931472, %v4232_v7 }
 0x26c   : > { %v2866_v49 = vsel %vm6446_vm15, %v4226_v46, %v2862_v56  ;;  %v2857_v44 = vsel %vm6422_vm10, %v2856_v9, %v2852_v21  ;;  %v1645_v62 = vmul.f32 0.6931472, %v4234_v15  ;;  %v2442_v38 = vadd.f32 %v2441_v23, %v2440_v31  ;;  %v3297_v54 = vld.sshfl [vmem:[#allocation1 + $0x30] sm:$0xff pattern:$0x75316420] }
 0x26d   : > { %v2871_v5 = vsel %vm6450_vm0, %v2870_v43, %v2866_v49  ;;  %v2449_v22 = vadd.f32 %v2448_v50, %v2447_v10  ;;  %v3250_v46 = vsub.f32 %v3154_v11, %v6399_v39  ;;  %v3298_v52 = vld.sshfl [vmem:[#allocation1 + $0x38] sm:$0xff pattern:$0x75316420]  ;;  %v3409_v24 = vsel %vm1037_vm1, %v3297_v54, 0.0 }
 0x26e   : > { %v2946_v53 = vrot.slane %v2871_v5, 4  ;;  %v1677_v9 = vsub.f32 %v6355_v61, %v1645_v62  ;;  %v2443_v2 = vrot.slane %v2442_v38, 1  ;;  %3302 = vst [vmem:[#allocation1 + $0x30] ss:$2 sm:$0xff] %v5719_v19  ;;  %v6478_v14 = vadd.f32 %v3386_v12, %v6420_v3 }
 0x26f   : > { %v2450_v42 = vrot.slane %v2449_v22, 1  ;;  %v3410_v60 = vrot.slane %v3409_v24, 4  ;;  %v3399_v59 = vadd.f32 %v3398_v6, %v3397_v58  ;;  %v3406_v20 = vadd.f32 %v3405_v27, %v3404_v37  ;;  %v6485_v61 = vld.sshfl [vmem:[#allocation1 + $0x20] sm:$0xff pattern:$0x75316420] }
 0x270   : > { %v2962_v28 = vsel %vm1037_vm1, %v2857_v44, %v2946_v53  ;;  %v6480_v39 = vadd.f32 %v2443_v2, %v2442_v38  ;;  %v1676_v4 = vsub.f32 %v6342_v0, %v1643_v17  ;;  %v6487_v63 = vadd.f32 %v3393_v13, %v3392_v41  ;;  %v6493_v43 = vld.sshfl [vmem:[#allocation1 + $0x28] sm:$0xff pattern:$0x75316420] }
 0x271   : > { %v2994_v40 = vmul.f32 %v6312_v33, %v2962_v28  ;;  %v6482_v1 = vadd.f32 %v2450_v42, %v2449_v22  ;;  %v3423_v19 = vsel %vm1037_vm1, %v6367_v47, 0.0  ;;  %v3203_v3 = vrot.slane %v1677_v9, 4 }
 0x272   : > { %4235 = vrcp.f32 %v6480_v39  ;;  %v2883_v33 = vand.u32 2147483648, %v6480_v39  ;;  %v3411_v7 = vadd.f32 %v3410_v60, %v3409_v24  ;;  %v2881_v56 = vand.u32 2147483647, %v6480_v39 }
 0x273   : > { %v3266_v29 = vmul.f32 %v3250_v46, %v2994_v40  ;;  %4237 = vrcp.f32 %v6482_v1  ;;  %v2897_v0 = vand.u32 2147483648, %v6482_v1  ;;  %v3416_v41 = vsel %vm1037_vm1, %v3298_v52, 0.0 }
 0x274   : > { %v2895_v51 = vand.u32 2147483647, %v6482_v1  ;;  %4239 = vlog2.f32 %v6480_v39  ;;  %v3400_v47 = vrot.slane %v3399_v59, 1  ;;  %v3407_v31 = vrot.slane %v3406_v20, 1 }
 0x275   : > { %3325 = vst [vmem:[#allocation1 + $0x20] ss:$2 sm:$0xff] %v3266_v29  ;;  %vm2877_vm2 = vweird.f32 %v6480_v39  ;;  %v6502_v10 = vor.u32 1.1754944e-38, %v2883_v33  ;;  %vm2891_vm3 = vweird.f32 %v6482_v1  ;;  %4241 = vlog2.f32 %v6482_v1  ;;  %v6506_v21 = vld.sshfl [vmem:[#allocation1 + $0x30] sm:$0xff pattern:$0x75316420] }
 0x276   : > { %v6509_v11 = vsel %vm1037_vm1, %v1676_v4, %v3203_v3  ;;  %v6511_v58 = vld.sshfl [vmem:[#allocation1 + $0x38] sm:$0xff pattern:$0x75316420]  ;;  %v3412_v37 = vrot.slane %v3411_v7, 2  ;;  %v3417_v49 = vrot.slane %v3416_v41, 4  ;;  %v3424_v23 = vrot.slane %v3423_v19, 4 }
 0x277   : > { %vm6513_vm4 = vcmp.eq.f32.partialorder %v2881_v56, 8.507059e+37  ;;  %v2898_v12 = vor.u32 1.1754944e-38, %v2897_v0  ;;  %3314 = vst [vmem:[#allocation1 + $0x30] ss:$2 sm:$0xff] %v6150_v8  ;;  %v3430_v15 = vsel %vm1037_vm1, %v6369_v55, 0.0  ;;  %v3437_v44 = vsel %vm1037_vm1, %v6379_v36, 0.0 }
 0x278   : > { %v3444_v5 = vsel %vm1037_vm1, %v6382_v48, 0.0  ;;  %v4236_v17 = vpop.eup %4235  ;;  %vm6524_vm5 = vcmp.eq.f32.partialorder %v2895_v51, 8.507059e+37  ;;  %v6528_v53 = vadd.f32 %v3400_v47, %v3399_v59  ;;  %v3418_v62 = vadd.f32 %v3417_v49, %v3416_v41 }
 0x279   : > { %v3425_v38 = vadd.f32 %v3424_v23, %v3423_v19  ;;  %v3431_v22 = vrot.slane %v3430_v15, 4  ;;  %v4238_v8 = vpop.eup %4237  ;;  %v2873_v54 = vmul.f32 %v4236_v17, %v6480_v39  ;;  %v6531_v55 = vadd.f32 %v3407_v31, %v3406_v20 }
 0x27a   : > { %v3413_v46 = vadd.f32 %v3412_v37, %v3411_v7  ;;  %v3438_v36 = vrot.slane %v3437_v44, 4  ;;  %v4240_v52 = vpop.eup %4239  ;;  %vm2878_vm6 = vweird.f32 %v4236_v17  ;;  %v2887_v48 = vmul.f32 %v4238_v8, %v6482_v1 }
 0x27b   : > { %v3432_v6 = vadd.f32 %v3431_v22, %v3430_v15  ;;  %v3445_v27 = vrot.slane %v3444_v5, 4  ;;  %v4242_v24 = vpop.eup %4241  ;;  %v2874_v28 = vsub.f32 1.0, %v2873_v54  ;;  %vm2892_vm7 = vweird.f32 %v4238_v8  ;;  %vm6537_vm8 = vmor %vm2877_vm2, %vm2878_vm6 }
 0x27c   : > { %v3057_v9 = vmul.f32 0.6931472, %v4240_v52  ;;  %v3419_v2 = vrot.slane %v3418_v62, 2  ;;  %v2888_v42 = vsub.f32 1.0, %v2887_v48  ;;  %v3059_v40 = vmul.f32 0.6931472, %v4242_v24  ;;  %vm6544_vm9 = vmor %vm2891_vm3, %vm2892_vm7 }
 0x27d   : > { %v3426_v60 = vrot.slane %v3425_v38, 2  ;;  %v3433_v59 = vrot.slane %v3432_v6, 2  ;;  %v2875_v29 = vmul.f32 %v4236_v17, %v2874_v28  ;;  %v3414_v20 = vrot.slane %v3413_v46, 1 }
 0x27e   : > { %v3420_v4 = vadd.f32 %v3419_v2, %v3418_v62  ;;  %v3439_v19 = vadd.f32 %v3438_v36, %v3437_v44  ;;  %v2889_v3 = vmul.f32 %v4238_v8, %v2888_v42  ;;  %v3107_v7 = vrot.slane %v3059_v40, 4 }
 0x27f   : > { %v3427_v56 = vadd.f32 %v3426_v60, %v3425_v38  ;;  %v3434_v0 = vadd.f32 %v3433_v59, %v3432_v6  ;;  %v2876_v41 = vadd.f32 %v4236_v17, %v2875_v29  ;;  %v3446_v37 = vadd.f32 %v3445_v27, %v3444_v5 }
 0x280   : > { %v3421_v47 = vrot.slane %v3420_v4, 1  ;;  %v3440_v31 = vrot.slane %v3439_v19, 2  ;;  %v2890_v39 = vadd.f32 %v4238_v8, %v2889_v3  ;;  %v3123_v49 = vsel %vm1037_vm1, %v3057_v9, %v3107_v7 }
 0x281   : > { %v3428_v23 = vrot.slane %v3427_v56, 1  ;;  %v3435_v15 = vrot.slane %v3434_v0, 1  ;;  %v2880_v44 = vsel %vm6537_vm8, %v4236_v17, %v2876_v41  ;;  %v3155_v62 = vsub.f32 %v6372_v34, %v3123_v49 }
 0x282   : > { %v6552_v38 = vadd.f32 %v3414_v20, %v3413_v46  ;;  %v3451_v1 = vsel %vm1037_vm1, %v6404_v32, 0.0  ;;  %v2885_v22 = vsel %vm6513_vm4, %v6502_v10, %v2880_v44  ;;  %v2894_v5 = vsel %vm6544_vm9, %v4238_v8, %v2890_v39  ;;  %v3321_v20 = vld.sshfl [vmem:[#allocation1 + $0x30] sm:$0xff pattern:$0x75316420] }
 0x283   : > { %v6561_v54 = vadd.f32 %v3421_v47, %v3420_v4  ;;  %v3441_v36 = vadd.f32 %v3440_v31, %v3439_v19  ;;  %v2899_v17 = vsel %vm6524_vm5, %v2898_v12, %v2894_v5  ;;  %v6565_v52 = vadd.f32 %v3428_v23, %v3427_v56 }
 0x284   : > { %v6567_v34 = vadd.f32 %v3435_v15, %v3434_v0  ;;  %v3447_v46 = vrot.slane %v3446_v37, 2  ;;  %v2947_v48 = vrot.slane %v2899_v17, 4  ;;  %v3452_v32 = vrot.slane %v3451_v1, 4 }
 0x285   : > { %v3458_v50 = vsel %vm1037_vm1, %v6410_v26, 0.0  ;;  %v3465_v10 = vsel %vm1037_vm1, %v6506_v21, 0.0  ;;  %v3251_v8 = vsub.f32 %v3155_v62, %v6509_v11  ;;  %v3472_v28 = vsel %vm1037_vm1, %v6511_v58, 0.0  ;;  %v3322_v58 = vld.sshfl [vmem:[#allocation1 + $0x38] sm:$0xff pattern:$0x75316420] }
 0x286   : > { %v3448_v6 = vadd.f32 %v3447_v46, %v3446_v37  ;;  %v3459_v27 = vrot.slane %v3458_v50, 4  ;;  %v3466_v24 = vrot.slane %v3465_v10, 4  ;;  %v2963_v12 = vsel %vm1037_vm1, %v2885_v22, %v2947_v48 }
 0x287   : > { %v3453_v13 = vadd.f32 %v3452_v32, %v3451_v1  ;;  %v3479_v9 = vsel %vm1037_vm1, %v6416_v35, 0.0  ;;  %v2995_v2 = vmul.f32 %v6391_v30, %v2963_v12  ;;  %v3442_v26 = vrot.slane %v3441_v36, 1 }
 0x288   : > { %v3460_v42 = vadd.f32 %v3459_v27, %v3458_v50  ;;  %v3467_v40 = vadd.f32 %v3466_v24, %v3465_v10  ;;  %v3473_v60 = vrot.slane %v3472_v28, 4  ;;  %v3480_v11 = vrot.slane %v3479_v9, 4 }
 0x289   : > { %v3454_v21 = vrot.slane %v3453_v13, 2  ;;  %v3486_v59 = vsel %vm1037_vm1, %v6427_v25, 0.0  ;;  %v3267_v29 = vmul.f32 %v3251_v8, %v2995_v2  ;;  %v3449_v4 = vrot.slane %v3448_v6, 1 }
 0x28a   : > { %v3461_v19 = vrot.slane %v3460_v42, 2  ;;  %v3468_v33 = vrot.slane %v3467_v40, 2  ;;  %v3474_v7 = vadd.f32 %v3473_v60, %v3472_v28  ;;  %v3481_v35 = vadd.f32 %v3480_v11, %v3479_v9  ;;  %v3328_v9 = vld.sshfl [vmem:[#allocation1 + $0x8] sm:$0xff pattern:$0x75316420] }
 0x28b   : > { %v3455_v3 = vadd.f32 %v3454_v21, %v3453_v13  ;;  %v3487_v56 = vrot.slane %v3486_v59, 4  ;;  %3326 = vst [vmem:[#allocation1 + $0x30] ss:$2 sm:$0xff] %v3267_v29  ;;  %v3493_v41 = vsel %vm1037_vm1, %v6455_v57, 0.0  ;;  %v3500_v51 = vsel %vm1037_vm1, %v6457_v18, 0.0 }
 0x28c   : > { %v3462_v30 = vadd.f32 %v3461_v19, %v3460_v42  ;;  %v3469_v0 = vadd.f32 %v3468_v33, %v3467_v40  ;;  %v3475_v47 = vrot.slane %v3474_v7, 2  ;;  %v3482_v31 = vrot.slane %v3481_v35, 2  ;;  %v3327_v18 = vld.sshfl [vmem:[#allocation1] sm:$0xff pattern:$0x75316420] }
 0x28d   : > { %v3456_v25 = vrot.slane %v3455_v3, 1  ;;  %v3488_v37 = vadd.f32 %v3487_v56, %v3486_v59  ;;  %v6586_v39 = vadd.f32 %v3442_v26, %v3441_v36  ;;  %v3494_v23 = vrot.slane %v3493_v41, 4  ;;  %v3329_v11 = vld.sshfl [vmem:[#allocation1 + $0x10] sm:$0xff pattern:$0x75316420] }
 0x28e   : > { %v3463_v49 = vrot.slane %v3462_v30, 1  ;;  %v3501_v15 = vrot.slane %v3500_v51, 4  ;;  %v3470_v44 = vrot.slane %v3469_v0, 1  ;;  %v3476_v62 = vadd.f32 %v3475_v47, %v3474_v7  ;;  %v3330_v33 = vld.sshfl [vmem:[#allocation1 + $0x18] sm:$0xff pattern:$0x75316420] }
 0x28f   : > { %v3483_v1 = vadd.f32 %v3482_v31, %v3481_v35  ;;  %v3489_v22 = vrot.slane %v3488_v37, 2  ;;  %v6588_v5 = vadd.f32 %v3449_v4, %v3448_v6  ;;  %v6590_v17 = vadd.f32 %v3456_v25, %v3455_v3 }
 0x290   : > { %v3495_v57 = vadd.f32 %v3494_v23, %v3493_v41  ;;  %v3502_v46 = vadd.f32 %v3501_v15, %v3500_v51  ;;  %v3477_v48 = vrot.slane %v3476_v62, 1  ;;  %v3507_v36 = vsel %vm1037_vm1, %v6485_v61, 0.0  ;;  %v3331_v15 = vld.sshfl [vmem:[#allocation1 + $0x20] sm:$0xff pattern:$0x75316420] }
 0x291   : > { %v3484_v32 = vrot.slane %v3483_v1, 1  ;;  %v3490_v50 = vadd.f32 %v3489_v22, %v3488_v37  ;;  %v3508_v27 = vrot.slane %v3507_v36, 4  ;;  %v3514_v24 = vsel %vm1037_vm1, %v6493_v43, 0.0 }
 0x292   : > { %v3496_v10 = vrot.slane %v3495_v57, 2  ;;  %v3503_v8 = vrot.slane %v3502_v46, 2  ;;  %v6596_v12 = vadd.f32 %v3463_v49, %v3462_v30  ;;  %v6598_v6 = vadd.f32 %v3470_v44, %v3469_v0 }
 0x293   : > { %v6600_v13 = vadd.f32 %v3477_v48, %v3476_v62  ;;  %v6602_v28 = vadd.f32 %v3484_v32, %v3483_v1  ;;  %v3491_v2 = vrot.slane %v3490_v50, 1  ;;  %v3509_v40 = vadd.f32 %v3508_v27, %v3507_v36 }
 0x294   : > { %v3497_v26 = vadd.f32 %v3496_v10, %v3495_v57  ;;  %v3504_v42 = vadd.f32 %v3503_v8, %v3502_v46  ;;  %v3515_v61 = vrot.slane %v3514_v24, 4  ;;  %v3521_v21 = vsel %vm1037_vm1, %v3321_v20, 0.0  ;;  %v3332_v8 = vld.sshfl [vmem:[#allocation1 + $0x28] sm:$0xff pattern:$0x75316420] }
 0x295   : > { %v3528_v60 = vsel %vm1037_vm1, %v3322_v58, 0.0  ;;  %v3535_v43 = vsel %vm1037_vm1, %v3327_v18, 0.0  ;;  %v6607_v59 = vadd.f32 %v3491_v2, %v3490_v50  ;;  %v3510_v19 = vrot.slane %v3509_v40, 2 }
 0x296   : > { %v3498_v29 = vrot.slane %v3497_v26, 1  ;;  %v3505_v4 = vrot.slane %v3504_v42, 1  ;;  %v3516_v3 = vadd.f32 %v3515_v61, %v3514_v24  ;;  %v3522_v7 = vrot.slane %v3521_v21, 4 }
 0x297   : > { %v3529_v35 = vrot.slane %v3528_v60, 4  ;;  %v3536_v56 = vrot.slane %v3535_v43, 4  ;;  %v3511_v20 = vadd.f32 %v3510_v19, %v3509_v40  ;;  %v3542_v58 = vsel %vm1037_vm1, %v3328_v9, 0.0 }
 0x298   : > { %v6609_v30 = vadd.f32 %v3498_v29, %v3497_v26  ;;  %v6611_v0 = vadd.f32 %v3505_v4, %v3504_v42  ;;  %v3517_v41 = vrot.slane %v3516_v3, 2  ;;  %v3523_v51 = vadd.f32 %v3522_v7, %v3521_v21  ;;  %v3333_v26 = vld.sshfl [vmem:[#allocation1 + $0x30] sm:$0xff pattern:$0x75316420] }
 0x299   : > { %v3530_v25 = vadd.f32 %v3529_v35, %v3528_v60  ;;  %v3537_v47 = vadd.f32 %v3536_v56, %v3535_v43  ;;  %v3512_v31 = vrot.slane %v3511_v20, 1  ;;  %v3543_v37 = vrot.slane %v3542_v58, 4  ;;  %v3334_v60 = vld.sshfl [vmem:[#allocation1 + $0x38] sm:$0xff pattern:$0x75316420] }
 0x29a   : > { %v3549_v49 = vsel %vm1037_vm1, %v3329_v11, 0.0  ;;  %v3556_v23 = vsel %vm1037_vm1, %v3330_v33, 0.0  ;;  %v3518_v44 = vadd.f32 %v3517_v41, %v3516_v3  ;;  %v3524_v62 = vrot.slane %v3523_v51, 2 }
 0x29b   : > { %v3531_v1 = vrot.slane %v3530_v25, 2  ;;  %v3538_v22 = vrot.slane %v3537_v47, 2  ;;  %v6616_v57 = vadd.f32 %v3512_v31, %v3511_v20  ;;  %v3544_v46 = vadd.f32 %v3543_v37, %v3542_v58 }
 0x29c   : > { %v3550_v18 = vrot.slane %v3549_v49, 4  ;;  %v3557_v48 = vrot.slane %v3556_v23, 4  ;;  %v3519_v32 = vrot.slane %v3518_v44, 1  ;;  %v3525_v50 = vadd.f32 %v3524_v62, %v3523_v51 }
 0x29d   : > { %v3532_v36 = vadd.f32 %v3531_v1, %v3530_v25  ;;  %v3539_v10 = vadd.f32 %v3538_v22, %v3537_v47  ;;  %v3545_v27 = vrot.slane %v3544_v46, 2  ;;  %v3563_v2 = vsel %vm1037_vm1, %v3331_v15, 0.0 }
 0x29e   : > { %v3551_v24 = vadd.f32 %v3550_v18, %v3549_v49  ;;  %v3558_v9 = vadd.f32 %v3557_v48, %v3556_v23  ;;  %v6619_v42 = vadd.f32 %v3519_v32, %v3518_v44  ;;  %v3526_v40 = vrot.slane %v3525_v50, 1 }
 0x29f   : > { %v3533_v61 = vrot.slane %v3532_v36, 1  ;;  %v3540_v21 = vrot.slane %v3539_v10, 1  ;;  %v3546_v43 = vadd.f32 %v3545_v27, %v3544_v46  ;;  %v3564_v4 = vrot.slane %v3563_v2, 4 }
 0x2a0   : > { %v3552_v11 = vrot.slane %v3551_v24, 2  ;;  %v3559_v29 = vrot.slane %v3558_v9, 2  ;;  %v6621_v19 = vadd.f32 %v3526_v40, %v3525_v50  ;;  %v3570_v7 = vsel %vm1037_vm1, %v3332_v8, 0.0 }
 0x2a1   : > { %v6623_v33 = vadd.f32 %v3533_v61, %v3532_v36  ;;  %v6625_v3 = vadd.f32 %v3540_v21, %v3539_v10  ;;  %v3547_v35 = vrot.slane %v3546_v43, 1  ;;  %v3565_v58 = vadd.f32 %v3564_v4, %v3563_v2 }
 0x2a2   : > { %v3553_v56 = vadd.f32 %v3552_v11, %v3551_v24  ;;  %v3560_v20 = vadd.f32 %v3559_v29, %v3558_v9  ;;  %v3571_v41 = vrot.slane %v3570_v7, 4  ;;  %v3577_v51 = vsel %vm1037_vm1, %v3333_v26, 0.0 }
 0x2a3   : > { %v3584_v25 = vsel %vm1037_vm1, %v3334_v60, 0.0  ;;  %v3627_v47 = vrot.slane %v6418_v16, 7  ;;  %v6631_v31 = vadd.f32 %v3547_v35, %v3546_v43  ;;  %v3566_v23 = vrot.slane %v3565_v58, 2 }
 0x2a4   : > { %v3554_v37 = vrot.slane %v3553_v56, 1  ;;  %v3561_v49 = vrot.slane %v3560_v20, 1  ;;  %v3572_v15 = vadd.f32 %v3571_v41, %v3570_v7  ;;  %v3578_v44 = vrot.slane %v3577_v51, 4 }
 0x2a5   : > { %v3585_v62 = vrot.slane %v3584_v25, 4  ;;  %v3628_v1 = vrot.slane %v6478_v14, 6  ;;  %v3567_v18 = vadd.f32 %v3566_v23, %v3565_v58  ;;  %v3629_v48 = vrot.slane %v6487_v63, 5 }
 0x2a6   : > { %v6634_v22 = vadd.f32 %v3554_v37, %v3553_v56  ;;  %v6636_v46 = vadd.f32 %v3561_v49, %v3560_v20  ;;  %v3573_v32 = vrot.slane %v3572_v15, 2  ;;  %v3579_v50 = vadd.f32 %v3578_v44, %v3577_v51 }
 0x2a7   : > { %v3586_v16 = vadd.f32 %v3585_v62, %v3584_v25  ;;  %v3630_v36 = vrot.slane %v6528_v53, 4  ;;  %v3568_v10 = vrot.slane %v3567_v18, 1  ;;  %v3631_v8 = vrot.slane %v6531_v55, 3 }
 0x2a8   : > { %v3632_v27 = vrot.slane %v6552_v38, 2  ;;  %v3633_v24 = vrot.slane %v6561_v54, 1  ;;  %v3574_v14 = vadd.f32 %v3573_v32, %v3572_v15  ;;  %v3580_v9 = vrot.slane %v3579_v50, 2 }
 0x2a9   : > { %v3587_v2 = vrot.slane %v3586_v16, 2  ;;  %v3634_v26 = vrot.slane %v6567_v34, 7  ;;  %v6644_v40 = vadd.f32 %v3568_v10, %v3567_v18  ;;  %v3635_v63 = vrot.slane %v6586_v39, 6 }
 0x2aa   : > { %v3636_v61 = vrot.slane %v6588_v5, 5  ;;  %v3637_v53 = vrot.slane %v6590_v17, 4  ;;  %v3575_v21 = vrot.slane %v3574_v14, 1  ;;  %v3581_v60 = vadd.f32 %v3580_v9, %v3579_v50 }
 0x2ab   : > { %v3588_v55 = vadd.f32 %v3587_v2, %v3586_v16  ;;  %v3638_v38 = vrot.slane %v6596_v12, 3  ;;  %v3639_v54 = vrot.slane %v6598_v6, 2  ;;  %v3640_v43 = vrot.slane %v6600_v13, 1 }
 0x2ac   : > { %v3641_v11 = vrot.slane %v6607_v59, 7  ;;  %v3642_v34 = vrot.slane %v6609_v30, 6  ;;  %v3576_v29 = vadd.f32 %v3575_v21, %v3574_v14  ;;  %v3582_v4 = vrot.slane %v3581_v60, 1 }
 0x2ad   : > { %v3589_v39 = vrot.slane %v3588_v55, 1  ;;  %v3643_v5 = vrot.slane %v6611_v0, 5  ;;  %v3644_v17 = vrot.slane %v6616_v57, 4  ;;  %v3645_v7 = vrot.slane %v6619_v42, 3 }
 0x2ae   : > { %v3646_v35 = vrot.slane %v6621_v19, 2  ;;  %v3647_v12 = vrot.slane %v6623_v33, 1  ;;  %v3583_v6 = vadd.f32 %v3582_v4, %v3581_v60  ;;  %v3648_v13 = vrot.slane %v6631_v31, 7 }
 0x2af   : > { %v3590_v56 = vadd.f32 %v3589_v39, %v3588_v55  ;;  %v3649_v59 = vrot.slane %v6634_v22, 6  ;;  %v3650_v30 = vrot.slane %v6636_v46, 5  ;;  %v3651_v20 = vrot.slane %v6644_v40, 4 }
 0x2b0   : > { %v3652_v0 = vrot.slane %v3576_v29, 3  ;;  %vm3655_vm10 = vcmask 1040384   ;;  %v3653_v57 = vrot.slane %v3583_v6, 2  ;;  %vm3657_vm11 = vcmask 1042434  }
 0x2b1   : > { %v3654_v58 = vrot.slane %v3590_v56, 1  ;;  %v3656_v42 = vsel %vm3655_vm10, %v6412_v45, %v3627_v47  ;;  %v3658_v19 = vsel %vm3657_vm11, %v3628_v1, %v3629_v48  ;;  %vm3659_vm12 = vcmask 1041408  }
 0x2b2   : > { %vm3661_vm13 = vcmask 1044484   ;;  %vm3663_vm14 = vcmask 1046534   ;;  %v3660_v33 = vsel %vm3659_vm12, %v3656_v42, %v3658_v19  ;;  %vm3665_vm15 = vcmask 1045508  }
 0x2b3   : > { %v3662_v41 = vsel %vm3661_vm13, %v3630_v36, %v3631_v8  ;;  %v3664_v51 = vsel %vm3663_vm14, %v3632_v27, %v3633_v24  ;;  %v3668_v31 = vsel %vm3655_vm10, %v6565_v52, %v3634_v26  ;;  %v3669_v45 = vsel %vm3657_vm11, %v3635_v63, %v3636_v61 }
 0x2b4   : > { %v3666_v25 = vsel %vm3665_vm15, %v3662_v41, %v3664_v51  ;;  %v3671_v47 = vsel %vm3661_vm13, %v3637_v53, %v3638_v38  ;;  %v3670_v49 = vsel %vm3659_vm12, %v3668_v31, %v3669_v45  ;;  %v3672_v23 = vsel %vm3663_vm14, %v3639_v54, %v3640_v43 }
 0x2b5   : > { %v3667_v37 = vsel %vm1037_vm1, %v3660_v33, %v3666_v25  ;;  %v3675_v15 = vsel %vm3655_vm10, %v6602_v28, %v3641_v11  ;;  %v3673_v44 = vsel %vm3665_vm15, %v3671_v47, %v3672_v23  ;;  %v3676_v62 = vsel %vm3657_vm11, %v3642_v34, %v3643_v5 }
 0x2b6   : > { %v3678_v52 = vsel %vm3661_vm13, %v3644_v17, %v3645_v7  ;;  %v3679_v1 = vsel %vm3663_vm14, %v3646_v35, %v3647_v12  ;;  %v3674_v22 = vsel %vm1037_vm1, %v3670_v49, %v3673_v44  ;;  %v3677_v46 = vsel %vm3659_vm12, %v3675_v15, %v3676_v62  ;;  %3697 = vst [vmem:[%s292_s10] sm:$0xff] %v3667_v37 }
 0x2b7   : > { %v3680_v18 = vsel %vm3665_vm15, %v3678_v52, %v3679_v1  ;;  %v3682_v28 = vsel %vm3655_vm10, %v6625_v3, %v3648_v13  ;;  %v3683_v32 = vsel %vm3657_vm11, %v3649_v59, %v3650_v30  ;;  %v3685_v50 = vsel %vm3661_vm13, %v3651_v20, %v3652_v0  ;;  %3698 = vst [vmem:[%s292_s10 + $0x8] sm:$0xff] %v3674_v22 }
 0x2b8   : > { %v3681_v48 = vsel %vm1037_vm1, %v3677_v46, %v3680_v18  ;;  %v3686_v16 = vsel %vm3663_vm14, %v3653_v57, %v3654_v58  ;;  %v3684_v36 = vsel %vm3659_vm12, %v3682_v28, %v3683_v32 }
 0x2b9   : > { %v3687_v10 = vsel %vm3665_vm15, %v3685_v50, %v3686_v16  ;;  %3699 = vst [vmem:[%s292_s10 + $0x10] sm:$0xff] %v3681_v48 }
 0x2ba   : > { %v3688_v8 = vsel %vm1037_vm1, %v3684_v36, %v3687_v10 }
 0x2bb   : > { %3700 = vst [vmem:[%s292_s10 + $0x18] sm:$0xff] %v3688_v8 }
 0x2bc   : > { %4330 = shalt.err (!%p4327_p13)
}
 0x2bd   : > { %3887 = dma.vmem_to_hbm [thread:$0]  (%p4470_p9), %s3716_s11, 512, %s3718_s13, %s3702_s21  }
 0x2be PF: > { %s3729_s12 = sand.u32 1, %s4369_s15   ;;  %p3897_p0 = pnand %p3834_p12, %p4477_p11 }
 0x2bf   : > { %s3730_s6 = scalar_lea.sflag [#allocation4], %s3729_s12 }
 0x2c0   : > { %p3898_p1 = pneg %p3897_p0 }
 0x2c2   : > { %4364 = dma.done.wait (%p3898_p1), %s3730_s6, 512  }
 0x2c3   : > { %4366 = vsyncadd (%p3898_p1), %s3730_s6, 4294966784  ;;  %s23_s20 = sadd.s32 1, %s4389_s20   ;;  %s6964_s15 = smov %s4373_s16 }
 0x2c4   : > { %p20_p2 = scmp.ge.s32.totalorder %s23_s20, 4   ;;  %s6965_s16 = smov %s4377_s17 }
 0x2c5   : > { %s6966_s17 = smov %s4475_s29  ;;  %s6967_s18 = smov %s4385_s19 }
 0x2c6   : > { %s6968_s19 = smov %s6970_s23  ;;  %22 = sbr.rel (!%p20_p2) target bundleno = 10 (0xa), region = 107 }
 0x2cb   :  { %3736 = vsyncpa [#allocation3], 1 }
 0x2cc   :  { %3738 = vsyncpa [#allocation3 + $0x1], 1 }
 0x2cd   :  { %3739 = vsyncpa [#allocation6], 1 }
 0x2ce   :  { %3741 = vsyncpa [#allocation6 + $0x1], 1 }
 0x2cf   :  { %3742 = vsyncpa [#allocation4], 1 }
 0x2d0   :  { %3744 = vsyncpa [#allocation4 + $0x1], 1 }

</bundles_post_ra>
